<compile_context>
chip_gen: v7x
topology: tpu7x:2x2x1
jax: 0.10.0
libtpu: 0.0.40
codegen_flags: <defaults>
</compile_context>

<pallas_src>
import functools

import jax
import jax.numpy as jnp
from jax.experimental import pallas as pl
from jax.experimental.pallas import tpu as pltpu

NEG_SLOPE = 0.01          # default negative slope of F.leaky_relu / nn.LeakyReLU
NEG_INF_MASK = -900000000.0
VMEM_LIMIT = 32 * 1024 * 1024   # conservative for v7x (64 MiB physical VMEM)


def _leaky(x):
    return jnp.where(x >= 0, x, NEG_SLOPE * x)


def _elu(x):
    return jnp.where(x > 0, x, jnp.exp(x) - 1.0)


def _pick_tile(m, prefs=(1024, 512, 256, 128, 64, 32, 16, 8)):
    """Largest preferred tile that divides m, else the full extent."""
    for t in prefs:
        if m % t == 0:
            return t
    return m


# ----------------------------------------------------------------------------
# Kernel 1: fused linear + leaky_relu  (atom_fc, neighbor_fc), row-tiled
# ----------------------------------------------------------------------------
def _linear_leaky_kernel(x_ref, w_ref, b_ref, o_ref):
    y = jnp.dot(x_ref[...].astype(jnp.bfloat16), w_ref[...],
                preferred_element_type=jnp.float32) + b_ref[...]
    o_ref[...] = _leaky(y)


def linear_leaky(x, w_bf16, b):
    # x: (M, K) f32, w_bf16: (K, Nout) bf16, b: (1, Nout) f32
    M, K = x.shape
    Nout = w_bf16.shape[1]
    TM = _pick_tile(M)
    return pl.pallas_call(
        _linear_leaky_kernel,
        grid=(M // TM,),
        in_specs=[
            pl.BlockSpec((TM, K), lambda i: (i, 0)),
            pl.BlockSpec((K, Nout), lambda i: (0, 0)),
            pl.BlockSpec((1, Nout), lambda i: (0, 0)),
        ],
        out_specs=pl.BlockSpec((TM, Nout), lambda i: (i, 0)),
        out_shape=jax.ShapeDtypeStruct((M, Nout), jnp.float32),
        compiler_params=pltpu.CompilerParams(
            dimension_semantics=("parallel",), vmem_limit_bytes=VMEM_LIMIT),
    )(x, w_bf16, b)


# ----------------------------------------------------------------------------
# Kernel 2: the fused radius loop (all radius steps in one kernel per batch tile)
#   - in-kernel one-hot-matmul neighbor gather for d > 0
#   - attend Linear commuted with the attention-weighted sum
#   - fused (F, 3F) GRU gate matmuls (PyTorch nn.GRUCell, gate order r|z|n)
# ----------------------------------------------------------------------------
def _radius_kernel(radius, af_ref, nf0_ref, oh_ref, smask_ref, amask_ref,
                   wa_ref, wn_ref, ab_ref, attw_ref, attb_ref,
                   wih_ref, whh_ref, bih_ref, bhh_ref, o_ref, act_ref):
    af = af_ref[...]                      # (Bt, L, F)  f32
    nf0 = nf0_ref[...]                    # (Bt, L, N, F) f32
    smask = smask_ref[...]                # (Bt, L, N)  0 / -9e8
    amask = amask_ref[...]                # (Bt, L, N)  1 / 0
    Bt, L, N, F = nf0.shape
    oh = oh_ref[...] if radius > 1 else None   # (Bt, L*N, L) bf16 one-hot

    h = af          # GRU hidden state (atom_feature)
    feat = af       # "expand" side of the align layer
    nf = nf0
    for d in range(radius):
        if d > 0:
            act = _leaky(h)
            feat = act
            # in-kernel gather: nf[b, l, n, :] = act[b, adl[b, l, n], :]
            nf = jnp.einsum("bml,blf->bmf", oh, act.astype(jnp.bfloat16),
                            preferred_element_type=jnp.float32).reshape(Bt, L, N, F)

        # align: Linear(2F -> 1) split across the (atom | neighbor) concat halves
        s_a = jnp.sum(feat * wa_ref[d], axis=-1, keepdims=True)        # (Bt, L, 1)
        s_n = jnp.sum(nf * wn_ref[d], axis=-1)                         # (Bt, L, N)
        score = _leaky(s_a + s_n + ab_ref[d]) + smask                  # (Bt, L, N)

        # softmax over the neighbor axis, then attend_mask
        m = jnp.max(score, axis=-1, keepdims=True)
        e = jnp.exp(score - m)
        att = (e / jnp.sum(e, axis=-1, keepdims=True)) * amask         # (Bt, L, N)

        # attend Linear commuted with the attention sum:
        #   sum_n att * (nf @ W + b)  ==  (sum_n att * nf) @ W + (sum_n att) * b
        wnf = jnp.sum(att[..., None] * nf, axis=2)                     # (Bt, L, F)
        attsum = jnp.sum(att, axis=-1, keepdims=True)                  # (Bt, L, 1)
        ctx = _elu(
            jnp.dot(wnf.reshape(Bt * L, F).astype(jnp.bfloat16), attw_ref[d],
                    preferred_element_type=jnp.float32)
            + (attsum * attb_ref[d]).reshape(Bt * L, F))               # (Bt*L, F)

        # fused GRU gates (nn.GRUCell, gate order r | z | n)
        h2 = h.reshape(Bt * L, F)
        gi = jnp.dot(ctx.astype(jnp.bfloat16), wih_ref[d],
                     preferred_element_type=jnp.float32) + bih_ref[d]  # (Bt*L, 3F)
        gh = jnp.dot(h2.astype(jnp.bfloat16), whh_ref[d],
                     preferred_element_type=jnp.float32) + bhh_ref[d]  # (Bt*L, 3F)
        gr = jax.nn.sigmoid(gi[:, :F] + gh[:, :F])
        gz = jax.nn.sigmoid(gi[:, F:2 * F] + gh[:, F:2 * F])
        gn = jnp.tanh(gi[:, 2 * F:] + gr * gh[:, 2 * F:])
        h = ((1.0 - gz) * gn + gz * h2).reshape(Bt, L, F)

    o_ref[...] = h
    act_ref[...] = _leaky(h)


def fused_radius(af, nf0, onehot, smask, amask, rp, radius):
    wa, wn, ab, attw, attb, wih, whh, bih, bhh = rp
    B, L, N, F = nf0.shape
    R = wa.shape[0]
    G = 3 * F
    M = L * N
    Bt = _pick_tile(B, (32, 16, 8))
    kern = functools.partial(_radius_kernel, radius)
    return pl.pallas_call(
        kern,
        grid=(B // Bt,),
        in_specs=[
            pl.BlockSpec((Bt, L, F), lambda b: (b, 0, 0)),
            pl.BlockSpec((Bt, L, N, F), lambda b: (b, 0, 0, 0)),
            pl.BlockSpec((Bt, M, L), lambda b: (b, 0, 0)),
            pl.BlockSpec((Bt, L, N), lambda b: (b, 0, 0)),
            pl.BlockSpec((Bt, L, N), lambda b: (b, 0, 0)),
            pl.BlockSpec((R, 1, F), lambda b: (0, 0, 0)),
            pl.BlockSpec((R, 1, F), lambda b: (0, 0, 0)),
            pl.BlockSpec((R, 1, 1), lambda b: (0, 0, 0)),
            pl.BlockSpec((R, F, F), lambda b: (0, 0, 0)),
            pl.BlockSpec((R, 1, F), lambda b: (0, 0, 0)),
            pl.BlockSpec((R, F, G), lambda b: (0, 0, 0)),
            pl.BlockSpec((R, F, G), lambda b: (0, 0, 0)),
            pl.BlockSpec((R, 1, G), lambda b: (0, 0, 0)),
            pl.BlockSpec((R, 1, G), lambda b: (0, 0, 0)),
        ],
        out_specs=(pl.BlockSpec((Bt, L, F), lambda b: (b, 0, 0)),
                   pl.BlockSpec((Bt, L, F), lambda b: (b, 0, 0))),
        out_shape=(jax.ShapeDtypeStruct((B, L, F), jnp.float32),
                   jax.ShapeDtypeStruct((B, L, F), jnp.float32)),
        compiler_params=pltpu.CompilerParams(
            dimension_semantics=("parallel",), vmem_limit_bytes=VMEM_LIMIT),
    )(af, nf0, onehot, smask, amask, wa, wn, ab, attw, attb, wih, whh, bih, bhh)


# ----------------------------------------------------------------------------
# Kernel 3: molecule attention pooling + T GRU super-steps + residual head,
#           fused and batched over a tile of molecules
# ----------------------------------------------------------------------------
def _mol_head_kernel(T, act_ref, mask_ref, mwa_ref, mwn_ref, mb_ref,
                     mattw_ref, mattb_ref, wih_ref, whh_ref, bih_ref, bhh_ref,
                     w1_ref, b1_ref, w2_ref, b2_ref, wo_ref, bo_ref, ws_ref, bs_ref,
                     o_ref):
    act = act_ref[...]                      # (Bt, L, F)  activated atom features
    mask3 = mask_ref[...]                   # (Bt, L, 1)
    Bt, L, F = act.shape
    mask2 = mask3[..., 0]                   # (Bt, L)

    molf = jnp.sum(act * mask3, axis=1)                                 # (Bt, F)
    molsm = jnp.where(mask2 == 0.0, NEG_INF_MASK, 0.0)                  # (Bt, L)
    trans = (jnp.dot(act.reshape(Bt * L, F).astype(jnp.bfloat16), mattw_ref[...],
                     preferred_element_type=jnp.float32)
             + mattb_ref[...]).reshape(Bt, L, F)                        # (Bt, L, F)
    s_a = jnp.sum(act * mwn_ref[...], axis=-1)                          # (Bt, L)

    for _ in range(T):
        actmol = _leaky(molf)                                           # (Bt, F)
        s_m = jnp.sum(actmol * mwa_ref[...], axis=-1, keepdims=True)    # (Bt, 1)
        score = _leaky(s_m + s_a + mb_ref[...]) + molsm                 # (Bt, L)
        m = jnp.max(score, axis=-1, keepdims=True)
        e = jnp.exp(score - m)
        att = (e / jnp.sum(e, axis=-1, keepdims=True)) * mask2          # (Bt, L)
        ctx = _elu(jnp.sum(att[..., None] * trans, axis=1))             # (Bt, F)

        gi = jnp.dot(ctx.astype(jnp.bfloat16), wih_ref[...],
                     preferred_element_type=jnp.float32) + bih_ref[...]
        gh = jnp.dot(molf.astype(jnp.bfloat16), whh_ref[...],
                     preferred_element_type=jnp.float32) + bhh_ref[...]
        gr = jax.nn.sigmoid(gi[:, :F] + gh[:, :F])
        gz = jax.nn.sigmoid(gi[:, F:2 * F] + gh[:, F:2 * F])
        gn = jnp.tanh(gi[:, 2 * F:] + gr * gh[:, 2 * F:])
        molf = (1.0 - gz) * gn + gz * molf

    # fused residual MLP head + output + scaler (dropout = identity in eval mode)
    r1 = _leaky(jnp.dot(molf.astype(jnp.bfloat16), w1_ref[...],
                        preferred_element_type=jnp.float32) + b1_ref[...]) + molf
    r2 = _leaky(jnp.dot(r1.astype(jnp.bfloat16), w2_ref[...],
                        preferred_element_type=jnp.float32) + b2_ref[...]) + r1
    p = jnp.dot(r2.astype(jnp.bfloat16), wo_ref[...],
                preferred_element_type=jnp.float32) + bo_ref[...]
    o_ref[...] = jnp.dot(p.astype(jnp.bfloat16), ws_ref[...],
                         preferred_element_type=jnp.float32) + bs_ref[...]


def mol_readout_head(activated, mask3, mp, hp, T):
    mwa, mwn, mb, mattw, mattb, wih, whh, bih, bhh = mp
    w1, b1, w2, b2, wo, bo, ws, bs = hp
    B, L, F = activated.shape
    G = 3 * F
    O = wo.shape[1]
    Bt = _pick_tile(B, (32, 16, 8))
    kern = functools.partial(_mol_head_kernel, T)
    return pl.pallas_call(
        kern,
        grid=(B // Bt,),
        in_specs=[
            pl.BlockSpec((Bt, L, F), lambda b: (b, 0, 0)),
            pl.BlockSpec((Bt, L, 1), lambda b: (b, 0, 0)),
            pl.BlockSpec((1, F), lambda b: (0, 0)),
            pl.BlockSpec((1, F), lambda b: (0, 0)),
            pl.BlockSpec((1, 1), lambda b: (0, 0)),
            pl.BlockSpec((F, F), lambda b: (0, 0)),
            pl.BlockSpec((1, F), lambda b: (0, 0)),
            pl.BlockSpec((F, G), lambda b: (0, 0)),
            pl.BlockSpec((F, G), lambda b: (0, 0)),
            pl.BlockSpec((1, G), lambda b: (0, 0)),
            pl.BlockSpec((1, G), lambda b: (0, 0)),
            pl.BlockSpec((F, F), lambda b: (0, 0)),
            pl.BlockSpec((1, F), lambda b: (0, 0)),
            pl.BlockSpec((F, F), lambda b: (0, 0)),
            pl.BlockSpec((1, F), lambda b: (0, 0)),
            pl.BlockSpec((F, O), lambda b: (0, 0)),
            pl.BlockSpec((1, O), lambda b: (0, 0)),
            pl.BlockSpec((O, O), lambda b: (0, 0)),
            pl.BlockSpec((1, O), lambda b: (0, 0)),
        ],
        out_specs=pl.BlockSpec((Bt, O), lambda b: (b, 0)),
        out_shape=jax.ShapeDtypeStruct((B, O), jnp.float32),
        compiler_params=pltpu.CompilerParams(
            dimension_semantics=("parallel",), vmem_limit_bytes=VMEM_LIMIT),
    )(activated, mask3, mwa, mwn, mb, mattw, mattb, wih, whh, bih, bhh,
      w1, b1, w2, b2, wo, bo, ws, bs)


# ----------------------------------------------------------------------------
# Parameter initialization (deterministic, PyTorch Linear-style uniform ranges)
# ----------------------------------------------------------------------------
def init_params(key, radius, a_feat, b_feat, fdim, out_units):
    keys = iter(jax.random.split(key, 64))

    def lin(in_d, out_d):
        k = 1.0 / (in_d ** 0.5)
        w = jax.random.uniform(next(keys), (in_d, out_d), jnp.float32, -k, k)
        b = jax.random.uniform(next(keys), (1, out_d), jnp.float32, -k, k)
        return w, b

    def align(fd):
        k = 1.0 / ((2 * fd) ** 0.5)
        w = jax.random.uniform(next(keys), (1, 2 * fd), jnp.float32, -k, k)
        b = jax.random.uniform(next(keys), (1, 1), jnp.float32, -k, k)
        return w[:, :fd], w[:, fd:], b

    def gru(fd):
        k = 1.0 / (fd ** 0.5)
        wih = jax.random.uniform(next(keys), (3, fd, fd), jnp.float32, -k, k)
        whh = jax.random.uniform(next(keys), (3, fd, fd), jnp.float32, -k, k)
        bih = jax.random.uniform(next(keys), (3, 1, fd), jnp.float32, -k, k)
        bhh = jax.random.uniform(next(keys), (3, 1, fd), jnp.float32, -k, k)
        return wih, whh, bih, bhh

    params = {
        "atom_fc": lin(a_feat, fdim),
        "neighbor_fc": lin(a_feat + b_feat, fdim),
        "radius": [],
    }
    for _ in range(radius):
        wa, wn, ab = align(fdim)
        attw, attb = lin(fdim, fdim)
        wih, whh, bih, bhh = gru(fdim)
        params["radius"].append((wa, wn, ab, attw, attb, wih, whh, bih, bhh))
    mwa, mwn, mb = align(fdim)
    mattw, mattb = lin(fdim, fdim)
    mwih, mwhh, mbih, mbhh = gru(fdim)
    params["mol"] = (mwa, mwn, mb, mattw, mattb, mwih, mwhh, mbih, mbhh)
    w1, b1 = lin(fdim, fdim)
    w2, b2 = lin(fdim, fdim)
    wo, bo = lin(fdim, out_units)
    ws, bs = lin(out_units, out_units)
    params["head"] = (w1, b1, w2, b2, wo, bo, ws, bs)
    return params


def prepare_kernel_params(params):
    """Pack / stack / bf16-cast the PyTorch-layout params for the fused kernels."""
    bf = lambda x: x.astype(jnp.bfloat16)
    cat = lambda x: jnp.concatenate(list(x), axis=-1)   # (3,*,F) -> (*,3F)

    kp = {}
    w, b = params["atom_fc"]
    kp["atom_fc"] = (bf(w), b)
    w, b = params["neighbor_fc"]
    kp["neighbor_fc"] = (bf(w), b)

    cols = [[] for _ in range(9)]
    for (wa, wn, ab, attw, attb, wih, whh, bih, bhh) in params["radius"]:
        packed = (wa, wn, ab, bf(attw), attb,
                  bf(cat(wih)), bf(cat(whh)), cat(bih), cat(bhh))
        for c, v in zip(cols, packed):
            c.append(v)
    kp["radius"] = tuple(jnp.stack(c) for c in cols)

    mwa, mwn, mb, mattw, mattb, wih, whh, bih, bhh = params["mol"]
    kp["mol"] = (mwa, mwn, mb, bf(mattw), mattb,
                 bf(cat(wih)), bf(cat(whh)), cat(bih), cat(bhh))

    w1, b1, w2, b2, wo, bo, ws, bs = params["head"]
    kp["head"] = (bf(w1), b1, bf(w2), b2, bf(wo), bo, bf(ws), bs)
    return kp


# ----------------------------------------------------------------------------
# Forward pass (JAX glue + Pallas kernels)
# ----------------------------------------------------------------------------
def fingerprint_forward(params, atom_list, bond_list, atom_degree_list,
                        bond_degree_list, atom_mask, radius, T):
    B, L, A = atom_list.shape
    N = atom_degree_list.shape[-1]
    fdim = params["atom_fc"][0].shape[1]
    kp = prepare_kernel_params(params)
    gather = jax.vmap(lambda tab, idx: tab[idx])

    # atom_fc
    af = linear_leaky(atom_list.reshape(B * L, A), *kp["atom_fc"]).reshape(B, L, fdim)

    # neighbor_fc on [atom_neighbor, bond_neighbor]  (first-radius neighbor features)
    atom_neighbor = gather(atom_list, atom_degree_list)                 # (B, L, N, A)
    bond_neighbor = gather(bond_list, bond_degree_list)                 # (B, L, N, Bf)
    nbr_in = jnp.concatenate([atom_neighbor, bond_neighbor], axis=-1)
    nf0 = linear_leaky(nbr_in.reshape(B * L * N, nbr_in.shape[-1]),
                       *kp["neighbor_fc"]).reshape(B, L, N, fdim)

    attend_mask = (atom_degree_list != L - 1).astype(jnp.float32)       # (B, L, N)
    softmax_mask = jnp.where(atom_degree_list != L - 1, 0.0,
                             NEG_INF_MASK).astype(jnp.float32)          # (B, L, N)
    onehot = jax.nn.one_hot(atom_degree_list.reshape(B, L * N), L,
                            dtype=jnp.bfloat16)                         # (B, L*N, L)

    atom_feature, activated = fused_radius(
        af, nf0, onehot, softmax_mask, attend_mask, kp["radius"], radius)

    mol_prediction = mol_readout_head(
        activated, atom_mask[..., None], kp["mol"], kp["head"], T)      # (B, O)
    return atom_feature, mol_prediction


# ----------------------------------------------------------------------------
# Pure-JAX reference (PyTorch-faithful ordering; matmuls take bf16 operands to
# mirror the kernels' MXU numerics) for correctness checking
# ----------------------------------------------------------------------------
def reference_forward(params, atom_list, bond_list, adl, bdl, atom_mask, radius, T):
    B, L, A = atom_list.shape
    gather = jax.vmap(lambda tab, idx: tab[idx])

    def mm(x, w):
        return jnp.dot(x.astype(jnp.bfloat16), w.astype(jnp.bfloat16),
                       preferred_element_type=jnp.float32)

    w, b = params["atom_fc"]
    af = _leaky(mm(atom_list, w) + b)
    nbr = jnp.concatenate([gather(atom_list, adl), gather(bond_list, bdl)], -1)
    w, b = params["neighbor_fc"]
    nf = _leaky(mm(nbr, w) + b)
    amask = jnp.where(adl != L - 1, 1.0, 0.0)[..., None]
    smask = jnp.where(adl != L - 1, 0.0, NEG_INF_MASK)[..., None]
    h, feat = af, af
    for d in range(radius):
        if d > 0:
            act = _leaky(h)
            # mirror the kernel's bf16 one-hot gather (exact selection of bf16(act))
            nf = gather(act.astype(jnp.bfloat16).astype(jnp.float32), adl)
            feat = act
        wa, wn, ab, attw, attb, wih, whh, bih, bhh = params["radius"][d]
        s = _leaky(jnp.sum(feat * wa, -1, keepdims=True)[..., None, :]
                   + jnp.sum(nf * wn, -1, keepdims=True) + ab[0, 0]) + smask
        att = jax.nn.softmax(s, axis=-2) * amask
        ctx = _elu(jnp.sum(att * (mm(nf, attw) + attb), axis=-2))
        gr = jax.nn.sigmoid(mm(ctx, wih[0]) + bih[0] + mm(h, whh[0]) + bhh[0])
        gz = jax.nn.sigmoid(mm(ctx, wih[1]) + bih[1] + mm(h, whh[1]) + bhh[1])
        gn = jnp.tanh(mm(ctx, wih[2]) + bih[2] + gr * (mm(h, whh[2]) + bhh[2]))
        h = (1.0 - gz) * gn + gz * h
    act = _leaky(h)
    mask3 = atom_mask[..., None]
    molf = jnp.sum(act * mask3, axis=-2)
    molsm = jnp.where(mask3 == 0, NEG_INF_MASK, 0.0)
    mwa, mwn, mb, mattw, mattb, wih, whh, bih, bhh = params["mol"]
    trans = mm(act, mattw) + mattb
    for _ in range(T):
        actmol = _leaky(molf)
        s = _leaky(jnp.sum(actmol * mwa, -1)[:, None, None]
                   + jnp.sum(act * mwn, -1, keepdims=True) + mb[0, 0]) + molsm
        att = jax.nn.softmax(s, axis=-2) * mask3
        ctx = _elu(jnp.sum(att * trans, axis=-2))
        gr = jax.nn.sigmoid(mm(ctx, wih[0]) + bih[0] + mm(molf, whh[0]) + bhh[0])
        gz = jax.nn.sigmoid(mm(ctx, wih[1]) + bih[1] + mm(molf, whh[1]) + bhh[1])
        gn = jnp.tanh(mm(ctx, wih[2]) + bih[2] + gr * (mm(molf, whh[2]) + bhh[2]))
        molf = (1.0 - gz) * gn + gz * molf
    w1, b1, w2, b2, wo, bo, ws, bs = params["head"]
    r1 = _leaky(mm(molf, w1) + b1) + molf
    r2 = _leaky(mm(r1, w2) + b2) + r1
    pred = mm(mm(r2, wo) + bo, ws) + bs
    return h, pred


if __name__ == "__main__":
    B, L, N = 2, 8, 4
    A_FEAT, B_FEAT, FDIM, OUT = 16, 8, 32, 4
    RADIUS, T = 2, 2

    key = jax.random.PRNGKey(0)
    k = jax.random.split(key, 8)
    atom_list = jax.random.normal(k[0], (B, L, A_FEAT), jnp.float32)
    bond_list = jax.random.normal(k[1], (B, L, B_FEAT), jnp.float32)
    atom_degree_list = jax.random.randint(k[2], (B, L, N), 0, L)
    bond_degree_list = jax.random.randint(k[3], (B, L, N), 0, L)
    atom_mask = (jax.random.uniform(k[4], (B, L)) > 0.3).astype(jnp.float32)
    params = init_params(k[5], RADIUS, A_FEAT, B_FEAT, FDIM, OUT)

    fwd = jax.jit(functools.partial(fingerprint_forward, radius=RADIUS, T=T))
    atom_feature, mol_pred = fwd(params, atom_list, bond_list,
                                 atom_degree_list, bond_degree_list, atom_mask)
    atom_feature = jax.block_until_ready(atom_feature)
    mol_pred = jax.block_until_ready(mol_pred)

    ref_af, ref_pred = reference_forward(
        params, atom_list, bond_list, atom_degree_list, bond_degree_list,
        atom_mask, RADIUS, T)

    assert atom_feature.shape == (B, L, FDIM) and mol_pred.shape == (B, OUT)
    assert bool(jnp.allclose(atom_feature, ref_af, rtol=2e-2, atol=2e-2))
    assert bool(jnp.allclose(mol_pred, ref_pred, rtol=2e-2, atol=2e-2))
    print("KERNEL_OK")
</pallas_src>

<mosaic_0001>
module attributes {stable_mosaic.version = 11 : i64} {
  func.func @_linear_leaky_kernel(%arg0: i32, %arg1: memref<64x24xf32, #tpu.memory_space<vmem>>, %arg2: memref<24x32xbf16, #tpu.memory_space<vmem>>, %arg3: memref<1x32xf32, #tpu.memory_space<vmem>>, %arg4: memref<64x32xf32, #tpu.memory_space<vmem>>) attributes {dimension_semantics = [#tpu.dimension_semantics<parallel>], iteration_bounds = array<i64: 1>, scalar_prefetch = 0 : i64, scratch_operands = 0 : i64, tpu.core_type = #tpu.core_type<tc>, window_params = [{transform_indices = @transform_0, window_bounds = array<i64: 64, 24>}, {pipeline_mode = #tpu.pipeline_mode<synchronous>, transform_indices = @transform_1, window_bounds = array<i64: 24, 32>}, {pipeline_mode = #tpu.pipeline_mode<synchronous>, transform_indices = @transform_2, window_bounds = array<i64: 1, 32>}, {transform_indices = @transform_3, window_bounds = array<i64: 64, 32>}]} {
    %c0 = arith.constant 0 : index
    %c0_0 = arith.constant 0 : index
    %0 = vector.load %arg1[%c0, %c0_0] : memref<64x24xf32, #tpu.memory_space<vmem>>, vector<64x24xf32>
    %1 = arith.truncf %0 : vector<64x24xf32> to vector<64x24xbf16>
    %c0_1 = arith.constant 0 : index
    %c0_2 = arith.constant 0 : index
    %2 = vector.load %arg2[%c0_1, %c0_2] : memref<24x32xbf16, #tpu.memory_space<vmem>>, vector<24x32xbf16>
    %cst = arith.constant dense<0.000000e+00> : vector<64x32xf32>
    %3 = tpu.matmul %1, %2, %cst {dimension_numbers = #tpu.dot_dimension_numbers<[1], [0], [0], [1], [0, 0, 1, 1], [], []>} : vector<64x24xbf16>, vector<24x32xbf16>, vector<64x32xf32> -> vector<64x32xf32>
    %c0_3 = arith.constant 0 : index
    %c0_4 = arith.constant 0 : index
    %4 = vector.load %arg3[%c0_3, %c0_4] : memref<1x32xf32, #tpu.memory_space<vmem>>, vector<1x32xf32>
    %5 = vector.broadcast %4 : vector<1x32xf32> to vector<64x32xf32>
    %6 = arith.addf %3, %5 : vector<64x32xf32>
    %cst_5 = arith.constant 0.000000e+00 : f32
    %7 = vector.broadcast %cst_5 : f32 to vector<64x32xf32>
    %8 = arith.cmpf oge, %6, %7 : vector<64x32xf32>
    %cst_6 = arith.constant 0.00999999977 : f32
    %9 = vector.broadcast %cst_6 : f32 to vector<64x32xf32>
    %10 = arith.mulf %9, %6 : vector<64x32xf32>
    %11 = arith.select %8, %6, %10 : vector<64x32xi1>, vector<64x32xf32>
    %c0_7 = arith.constant 0 : index
    %c0_8 = arith.constant 0 : index
    %12 = vector.load %arg4[%c0_7, %c0_8] : memref<64x32xf32, #tpu.memory_space<vmem>>, vector<64x32xf32>
    tpu.vector_store %arg4[%c0_7, %c0_8], %11 {strides = array<i32>} : memref<64x32xf32, #tpu.memory_space<vmem>>, vector<64x32xf32>,
    return
  }
  func.func @transform_0(%arg0: i32) -> (i32, i32) {
    %c0_i32 = arith.constant 0 : i32
    %c0_i32_0 = arith.constant 0 : i32
    return %arg0, %c0_i32 : i32, i32
  }
  func.func @transform_1(%arg0: i32) -> (i32, i32) {
    %c0_i32 = arith.constant 0 : i32
    %c0_i32_0 = arith.constant 0 : i32
    %c0_i32_1 = arith.constant 0 : i32
    return %c0_i32, %c0_i32_0 : i32, i32
  }
  func.func @transform_2(%arg0: i32) -> (i32, i32) {
    %c0_i32 = arith.constant 0 : i32
    %c0_i32_0 = arith.constant 0 : i32
    %c0_i32_1 = arith.constant 0 : i32
    return %c0_i32, %c0_i32_0 : i32, i32
  }
  func.func @transform_3(%arg0: i32) -> (i32, i32) {
    %c0_i32 = arith.constant 0 : i32
    %c0_i32_0 = arith.constant 0 : i32
    return %arg0, %c0_i32 : i32, i32
  }
}

module attributes {stable_mosaic.version = 11 : i64} {
  func.func @_linear_leaky_kernel(%arg0: i32, %arg1: memref<16x16xf32, #tpu.memory_space<vmem>>, %arg2: memref<16x32xbf16, #tpu.memory_space<vmem>>, %arg3: memref<1x32xf32, #tpu.memory_space<vmem>>, %arg4: memref<16x32xf32, #tpu.memory_space<vmem>>) attributes {dimension_semantics = [#tpu.dimension_semantics<parallel>], iteration_bounds = array<i64: 1>, scalar_prefetch = 0 : i64, scratch_operands = 0 : i64, tpu.core_type = #tpu.core_type<tc>, window_params = [{transform_indices = @transform_0, window_bounds = array<i64: 16, 16>}, {pipeline_mode = #tpu.pipeline_mode<synchronous>, transform_indices = @transform_1, window_bounds = array<i64: 16, 32>}, {pipeline_mode = #tpu.pipeline_mode<synchronous>, transform_indices = @transform_2, window_bounds = array<i64: 1, 32>}, {transform_indices = @transform_3, window_bounds = array<i64: 16, 32>}]} {
    %c0 = arith.constant 0 : index
    %c0_0 = arith.constant 0 : index
    %0 = vector.load %arg1[%c0, %c0_0] : memref<16x16xf32, #tpu.memory_space<vmem>>, vector<16x16xf32>
    %1 = arith.truncf %0 : vector<16x16xf32> to vector<16x16xbf16>
    %c0_1 = arith.constant 0 : index
    %c0_2 = arith.constant 0 : index
    %2 = vector.load %arg2[%c0_1, %c0_2] : memref<16x32xbf16, #tpu.memory_space<vmem>>, vector<16x32xbf16>
    %cst = arith.constant dense<0.000000e+00> : vector<16x32xf32>
    %3 = tpu.matmul %1, %2, %cst {dimension_numbers = #tpu.dot_dimension_numbers<[1], [0], [0], [1], [0, 0, 1, 1], [], []>} : vector<16x16xbf16>, vector<16x32xbf16>, vector<16x32xf32> -> vector<16x32xf32>
    %c0_3 = arith.constant 0 : index
    %c0_4 = arith.constant 0 : index
    %4 = vector.load %arg3[%c0_3, %c0_4] : memref<1x32xf32, #tpu.memory_space<vmem>>, vector<1x32xf32>
    %5 = vector.broadcast %4 : vector<1x32xf32> to vector<16x32xf32>
    %6 = arith.addf %3, %5 : vector<16x32xf32>
    %cst_5 = arith.constant 0.000000e+00 : f32
    %7 = vector.broadcast %cst_5 : f32 to vector<16x32xf32>
    %8 = arith.cmpf oge, %6, %7 : vector<16x32xf32>
    %cst_6 = arith.constant 0.00999999977 : f32
    %9 = vector.broadcast %cst_6 : f32 to vector<16x32xf32>
    %10 = arith.mulf %9, %6 : vector<16x32xf32>
    %11 = arith.select %8, %6, %10 : vector<16x32xi1>, vector<16x32xf32>
    %c0_7 = arith.constant 0 : index
    %c0_8 = arith.constant 0 : index
    %12 = vector.load %arg4[%c0_7, %c0_8] : memref<16x32xf32, #tpu.memory_space<vmem>>, vector<16x32xf32>
    tpu.vector_store %arg4[%c0_7, %c0_8], %11 {strides = array<i32>} : memref<16x32xf32, #tpu.memory_space<vmem>>, vector<16x32xf32>,
    return
  }
  func.func @transform_0(%arg0: i32) -> (i32, i32) {
    %c0_i32 = arith.constant 0 : i32
    %c0_i32_0 = arith.constant 0 : i32
    return %arg0, %c0_i32 : i32, i32
  }
  func.func @transform_1(%arg0: i32) -> (i32, i32) {
    %c0_i32 = arith.constant 0 : i32
    %c0_i32_0 = arith.constant 0 : i32
    %c0_i32_1 = arith.constant 0 : i32
    return %c0_i32, %c0_i32_0 : i32, i32
  }
  func.func @transform_2(%arg0: i32) -> (i32, i32) {
    %c0_i32 = arith.constant 0 : i32
    %c0_i32_0 = arith.constant 0 : i32
    %c0_i32_1 = arith.constant 0 : i32
    return %c0_i32, %c0_i32_0 : i32, i32
  }
  func.func @transform_3(%arg0: i32) -> (i32, i32) {
    %c0_i32 = arith.constant 0 : i32
    %c0_i32_0 = arith.constant 0 : i32
    return %arg0, %c0_i32 : i32, i32
  }
}

module attributes {stable_mosaic.version = 11 : i64} {
  func.func @_radius_kernel(%arg0: i32, %arg1: memref<2x8x32xf32, #tpu.memory_space<vmem>>, %arg2: memref<2x8x4x32xf32, #tpu.memory_space<vmem>>, %arg3: memref<2x32x8xbf16, #tpu.memory_space<vmem>>, %arg4: memref<2x8x4xf32, #tpu.memory_space<vmem>>, %arg5: memref<2x8x4xf32, #tpu.memory_space<vmem>>, %arg6: memref<2x1x32xf32, #tpu.memory_space<vmem>>, %arg7: memref<2x1x32xf32, #tpu.memory_space<vmem>>, %arg8: memref<2x1x1xf32, #tpu.memory_space<vmem>>, %arg9: memref<2x32x32xbf16, #tpu.memory_space<vmem>>, %arg10: memref<2x1x32xf32, #tpu.memory_space<vmem>>, %arg11: memref<2x32x96xbf16, #tpu.memory_space<vmem>>, %arg12: memref<2x32x96xbf16, #tpu.memory_space<vmem>>, %arg13: memref<2x1x96xf32, #tpu.memory_space<vmem>>, %arg14: memref<2x1x96xf32, #tpu.memory_space<vmem>>, %arg15: memref<2x8x32xf32, #tpu.memory_space<vmem>>, %arg16: memref<2x8x32xf32, #tpu.memory_space<vmem>>) attributes {dimension_semantics = [#tpu.dimension_semantics<parallel>], iteration_bounds = array<i64: 1>, scalar_prefetch = 0 : i64, scratch_operands = 0 : i64, tpu.core_type = #tpu.core_type<tc>, window_params = [{transform_indices = @transform_0, window_bounds = array<i64: 2, 8, 32>}, {transform_indices = @transform_1, window_bounds = array<i64: 2, 8, 4, 32>}, {transform_indices = @transform_2, window_bounds = array<i64: 2, 32, 8>}, {transform_indices = @transform_3, window_bounds = array<i64: 2, 8, 4>}, {transform_indices = @transform_4, window_bounds = array<i64: 2, 8, 4>}, {pipeline_mode = #tpu.pipeline_mode<synchronous>, transform_indices = @transform_5, window_bounds = array<i64: 2, 1, 32>}, {pipeline_mode = #tpu.pipeline_mode<synchronous>, transform_indices = @transform_6, window_bounds = array<i64: 2, 1, 32>}, {pipeline_mode = #tpu.pipeline_mode<synchronous>, transform_indices = @transform_7, window_bounds = array<i64: 2, 1, 1>}, {pipeline_mode = #tpu.pipeline_mode<synchronous>, transform_indices = @transform_8, window_bounds = array<i64: 2, 32, 32>}, {pipeline_mode = #tpu.pipeline_mode<synchronous>, transform_indices = @transform_9, window_bounds = array<i64: 2, 1, 32>}, {pipeline_mode = #tpu.pipeline_mode<synchronous>, transform_indices = @transform_10, window_bounds = array<i64: 2, 32, 96>}, {pipeline_mode = #tpu.pipeline_mode<synchronous>, transform_indices = @transform_11, window_bounds = array<i64: 2, 32, 96>}, {pipeline_mode = #tpu.pipeline_mode<synchronous>, transform_indices = @transform_12, window_bounds = array<i64: 2, 1, 96>}, {pipeline_mode = #tpu.pipeline_mode<synchronous>, transform_indices = @transform_13, window_bounds = array<i64: 2, 1, 96>}, {transform_indices = @transform_14, window_bounds = array<i64: 2, 8, 32>}, {transform_indices = @transform_15, window_bounds = array<i64: 2, 8, 32>}]} {
    %c0 = arith.constant 0 : index
    %c0_0 = arith.constant 0 : index
    %c0_1 = arith.constant 0 : index
    %0 = vector.load %arg1[%c0, %c0_0, %c0_1] : memref<2x8x32xf32, #tpu.memory_space<vmem>>, vector<2x8x32xf32>
    %c0_2 = arith.constant 0 : index
    %c0_3 = arith.constant 0 : index
    %c0_4 = arith.constant 0 : index
    %c0_5 = arith.constant 0 : index
    %1 = vector.load %arg2[%c0_2, %c0_3, %c0_4, %c0_5] : memref<2x8x4x32xf32, #tpu.memory_space<vmem>>, vector<2x8x4x32xf32>
    %c0_6 = arith.constant 0 : index
    %c0_7 = arith.constant 0 : index
    %c0_8 = arith.constant 0 : index
    %2 = vector.load %arg4[%c0_6, %c0_7, %c0_8] : memref<2x8x4xf32, #tpu.memory_space<vmem>>, vector<2x8x4xf32>
    %c0_9 = arith.constant 0 : index
    %c0_10 = arith.constant 0 : index
    %c0_11 = arith.constant 0 : index
    %3 = vector.load %arg5[%c0_9, %c0_10, %c0_11] : memref<2x8x4xf32, #tpu.memory_space<vmem>>, vector<2x8x4xf32>
    %c0_12 = arith.constant 0 : index
    %c0_13 = arith.constant 0 : index
    %c0_14 = arith.constant 0 : index
    %4 = vector.load %arg3[%c0_12, %c0_13, %c0_14] : memref<2x32x8xbf16, #tpu.memory_space<vmem>>, vector<2x32x8xbf16>
    %c0_15 = arith.constant 0 : index
    %c0_16 = arith.constant 0 : index
    %c0_17 = arith.constant 0 : index
    %5 = vector.load %arg6[%c0_15, %c0_16, %c0_17] : memref<2x1x32xf32, #tpu.memory_space<vmem>>, vector<1x1x32xf32>
    %6 = vector.shape_cast %5 : vector<1x1x32xf32> to vector<1x32xf32>
    %7 = vector.shape_cast %6 : vector<1x32xf32> to vector<1x1x32xf32>
    %8 = vector.broadcast %7 : vector<1x1x32xf32> to vector<2x8x32xf32>
    %9 = arith.mulf %0, %8 : vector<2x8x32xf32>
    %cst = arith.constant dense<0.000000e+00> : vector<2x8xf32>
    %10 = vector.multi_reduction <add>, %9, %cst [2] : vector<2x8x32xf32> to vector<2x8xf32>
    %11 = vector.shape_cast %10 : vector<2x8xf32> to vector<2x8x1xf32>
    %c0_18 = arith.constant 0 : index
    %c0_19 = arith.constant 0 : index
    %c0_20 = arith.constant 0 : index
    %12 = vector.load %arg7[%c0_18, %c0_19, %c0_20] : memref<2x1x32xf32, #tpu.memory_space<vmem>>, vector<1x1x32xf32>
    %13 = vector.shape_cast %12 : vector<1x1x32xf32> to vector<1x32xf32>
    %14 = vector.shape_cast %13 : vector<1x32xf32> to vector<1x1x1x32xf32>
    %15 = vector.broadcast %14 : vector<1x1x1x32xf32> to vector<2x8x4x32xf32>
    %16 = arith.mulf %1, %15 : vector<2x8x4x32xf32>
    %cst_21 = arith.constant dense<0.000000e+00> : vector<2x8x4xf32>
    %17 = vector.multi_reduction <add>, %16, %cst_21 [3] : vector<2x8x4x32xf32> to vector<2x8x4xf32>
    %18 = vector.broadcast %11 : vector<2x8x1xf32> to vector<2x8x4xf32>
    %19 = arith.addf %18, %17 : vector<2x8x4xf32>
    %c0_22 = arith.constant 0 : index
    %c0_23 = arith.constant 0 : index
    %c0_24 = arith.constant 0 : index
    %20 = vector.load %arg8[%c0_22, %c0_23, %c0_24] : memref<2x1x1xf32, #tpu.memory_space<vmem>>, vector<1x1x1xf32>
    %21 = vector.shape_cast %20 : vector<1x1x1xf32> to vector<1x1xf32>
    %22 = vector.shape_cast %21 : vector<1x1xf32> to vector<1x1x1xf32>
    %23 = vector.broadcast %22 : vector<1x1x1xf32> to vector<2x8x4xf32>
    %24 = arith.addf %19, %23 : vector<2x8x4xf32>
    %cst_25 = arith.constant 0.000000e+00 : f32
    %25 = vector.broadcast %cst_25 : f32 to vector<2x8x4xf32>
    %26 = arith.cmpf oge, %24, %25 : vector<2x8x4xf32>
    %cst_26 = arith.constant 0.00999999977 : f32
    %27 = vector.broadcast %cst_26 : f32 to vector<2x8x4xf32>
    %28 = arith.mulf %27, %24 : vector<2x8x4xf32>
    %29 = arith.select %26, %24, %28 : vector<2x8x4xi1>, vector<2x8x4xf32>
    %30 = arith.addf %29, %2 : vector<2x8x4xf32>
    %cst_27 = arith.constant dense<0xFF800000> : vector<2x8xf32>
    %31 = vector.multi_reduction <maximumf>, %30, %cst_27 [2] : vector<2x8x4xf32> to vector<2x8xf32>
    %32 = vector.shape_cast %31 : vector<2x8xf32> to vector<2x8x1xf32>
    %33 = vector.broadcast %32 : vector<2x8x1xf32> to vector<2x8x4xf32>
    %34 = arith.subf %30, %33 : vector<2x8x4xf32>
    %35 = math.exp %34 : vector<2x8x4xf32>
    %cst_28 = arith.constant dense<0.000000e+00> : vector<2x8xf32>
    %36 = vector.multi_reduction <add>, %35, %cst_28 [2] : vector<2x8x4xf32> to vector<2x8xf32>
    %37 = vector.shape_cast %36 : vector<2x8xf32> to vector<2x8x1xf32>
    %38 = vector.broadcast %37 : vector<2x8x1xf32> to vector<2x8x4xf32>
    %39 = arith.divf %35, %38 : vector<2x8x4xf32>
    %40 = arith.mulf %39, %3 : vector<2x8x4xf32>
    %41 = vector.shape_cast %40 : vector<2x8x4xf32> to vector<2x8x4x1xf32>
    %42 = vector.broadcast %41 : vector<2x8x4x1xf32> to vector<2x8x4x32xf32>
    %43 = arith.mulf %42, %1 : vector<2x8x4x32xf32>
    %cst_29 = arith.constant dense<0.000000e+00> : vector<2x8x32xf32>
    %44 = vector.multi_reduction <add>, %43, %cst_29 [2] : vector<2x8x4x32xf32> to vector<2x8x32xf32>
    %cst_30 = arith.constant dense<0.000000e+00> : vector<2x8xf32>
    %45 = vector.multi_reduction <add>, %40, %cst_30 [2] : vector<2x8x4xf32> to vector<2x8xf32>
    %46 = vector.shape_cast %45 : vector<2x8xf32> to vector<2x8x1xf32>
    %47 = vector.shape_cast %44 : vector<2x8x32xf32> to vector<16x32xf32>
    %48 = arith.truncf %47 : vector<16x32xf32> to vector<16x32xbf16>
    %c0_31 = arith.constant 0 : index
    %c0_32 = arith.constant 0 : index
    %c0_33 = arith.constant 0 : index
    %49 = vector.load %arg9[%c0_31, %c0_32, %c0_33] : memref<2x32x32xbf16, #tpu.memory_space<vmem>>, vector<1x32x32xbf16>
    %50 = vector.shape_cast %49 : vector<1x32x32xbf16> to vector<32x32xbf16>
    %cst_34 = arith.constant dense<0.000000e+00> : vector<16x32xf32>
    %51 = tpu.matmul %48, %50, %cst_34 {dimension_numbers = #tpu.dot_dimension_numbers<[1], [0], [0], [1], [0, 0, 1, 1], [], []>} : vector<16x32xbf16>, vector<32x32xbf16>, vector<16x32xf32> -> vector<16x32xf32>
    %c0_35 = arith.constant 0 : index
    %c0_36 = arith.constant 0 : index
    %c0_37 = arith.constant 0 : index
    %52 = vector.load %arg10[%c0_35, %c0_36, %c0_37] : memref<2x1x32xf32, #tpu.memory_space<vmem>>, vector<1x1x32xf32>
    %53 = vector.shape_cast %52 : vector<1x1x32xf32> to vector<1x32xf32>
    %54 = vector.shape_cast %53 : vector<1x32xf32> to vector<1x1x32xf32>
    %55 = vector.broadcast %46 : vector<2x8x1xf32> to vector<2x8x32xf32>
    %56 = vector.broadcast %54 : vector<1x1x32xf32> to vector<2x8x32xf32>
    %57 = arith.mulf %55, %56 : vector<2x8x32xf32>
    %58 = vector.shape_cast %57 : vector<2x8x32xf32> to vector<16x32xf32>
    %59 = arith.addf %51, %58 : vector<16x32xf32>
    %cst_38 = arith.constant 0.000000e+00 : f32
    %60 = vector.broadcast %cst_38 : f32 to vector<16x32xf32>
    %61 = arith.cmpf ogt, %59, %60 : vector<16x32xf32>
    %62 = math.exp %59 : vector<16x32xf32>
    %cst_39 = arith.constant 1.000000e+00 : f32
    %63 = vector.broadcast %cst_39 : f32 to vector<16x32xf32>
    %64 = arith.subf %62, %63 : vector<16x32xf32>
    %65 = arith.select %61, %59, %64 : vector<16x32xi1>, vector<16x32xf32>
    %66 = vector.shape_cast %0 : vector<2x8x32xf32> to vector<16x32xf32>
    %67 = arith.truncf %65 : vector<16x32xf32> to vector<16x32xbf16>
    %c0_40 = arith.constant 0 : index
    %c0_41 = arith.constant 0 : index
    %c0_42 = arith.constant 0 : index
    %68 = vector.load %arg11[%c0_40, %c0_41, %c0_42] : memref<2x32x96xbf16, #tpu.memory_space<vmem>>, vector<1x32x96xbf16>
    %69 = vector.shape_cast %68 : vector<1x32x96xbf16> to vector<32x96xbf16>
    %cst_43 = arith.constant dense<0.000000e+00> : vector<16x96xf32>
    %70 = tpu.matmul %67, %69, %cst_43 {dimension_numbers = #tpu.dot_dimension_numbers<[1], [0], [0], [1], [0, 0, 1, 1], [], []>} : vector<16x32xbf16>, vector<32x96xbf16>, vector<16x96xf32> -> vector<16x96xf32>
    %c0_44 = arith.constant 0 : index
    %c0_45 = arith.constant 0 : index
    %c0_46 = arith.constant 0 : index
    %71 = vector.load %arg13[%c0_44, %c0_45, %c0_46] : memref<2x1x96xf32, #tpu.memory_space<vmem>>, vector<1x1x96xf32>
    %72 = vector.shape_cast %71 : vector<1x1x96xf32> to vector<1x96xf32>
    %73 = vector.broadcast %72 : vector<1x96xf32> to vector<16x96xf32>
    %74 = arith.addf %70, %73 : vector<16x96xf32>
    %75 = arith.truncf %66 : vector<16x32xf32> to vector<16x32xbf16>
    %c0_47 = arith.constant 0 : index
    %c0_48 = arith.constant 0 : index
    %c0_49 = arith.constant 0 : index
    %76 = vector.load %arg12[%c0_47, %c0_48, %c0_49] : memref<2x32x96xbf16, #tpu.memory_space<vmem>>, vector<1x32x96xbf16>
    %77 = vector.shape_cast %76 : vector<1x32x96xbf16> to vector<32x96xbf16>
    %cst_50 = arith.constant dense<0.000000e+00> : vector<16x96xf32>
    %78 = tpu.matmul %75, %77, %cst_50 {dimension_numbers = #tpu.dot_dimension_numbers<[1], [0], [0], [1], [0, 0, 1, 1], [], []>} : vector<16x32xbf16>, vector<32x96xbf16>, vector<16x96xf32> -> vector<16x96xf32>
    %c0_51 = arith.constant 0 : index
    %c0_52 = arith.constant 0 : index
    %c0_53 = arith.constant 0 : index
    %79 = vector.load %arg14[%c0_51, %c0_52, %c0_53] : memref<2x1x96xf32, #tpu.memory_space<vmem>>, vector<1x1x96xf32>
    %80 = vector.shape_cast %79 : vector<1x1x96xf32> to vector<1x96xf32>
    %81 = vector.broadcast %80 : vector<1x96xf32> to vector<16x96xf32>
    %82 = arith.addf %78, %81 : vector<16x96xf32>
    %83 = vector.extract_strided_slice %74 {offsets = [0, 0], sizes = [16, 32], strides = [1, 1]} : vector<16x96xf32> to vector<16x32xf32>
    %84 = vector.extract_strided_slice %82 {offsets = [0, 0], sizes = [16, 32], strides = [1, 1]} : vector<16x96xf32> to vector<16x32xf32>
    %85 = arith.addf %83, %84 : vector<16x32xf32>
    %86 = arith.negf %85 : vector<16x32xf32>
    %87 = math.exp %86 : vector<16x32xf32>
    %cst_54 = arith.constant 1.000000e+00 : f32
    %88 = vector.broadcast %cst_54 : f32 to vector<16x32xf32>
    %89 = arith.addf %88, %87 : vector<16x32xf32>
    %90 = arith.divf %88, %89 : vector<16x32xf32>
    %91 = vector.extract_strided_slice %74 {offsets = [0, 32], sizes = [16, 32], strides = [1, 1]} : vector<16x96xf32> to vector<16x32xf32>
    %92 = vector.extract_strided_slice %82 {offsets = [0, 32], sizes = [16, 32], strides = [1, 1]} : vector<16x96xf32> to vector<16x32xf32>
    %93 = arith.addf %91, %92 : vector<16x32xf32>
    %94 = arith.negf %93 : vector<16x32xf32>
    %95 = math.exp %94 : vector<16x32xf32>
    %cst_55 = arith.constant 1.000000e+00 : f32
    %96 = vector.broadcast %cst_55 : f32 to vector<16x32xf32>
    %97 = arith.addf %96, %95 : vector<16x32xf32>
    %98 = arith.divf %96, %97 : vector<16x32xf32>
    %99 = vector.extract_strided_slice %74 {offsets = [0, 64], sizes = [16, 32], strides = [1, 1]} : vector<16x96xf32> to vector<16x32xf32>
    %100 = vector.extract_strided_slice %82 {offsets = [0, 64], sizes = [16, 32], strides = [1, 1]} : vector<16x96xf32> to vector<16x32xf32>
    %101 = arith.mulf %90, %100 : vector<16x32xf32>
    %102 = arith.addf %99, %101 : vector<16x32xf32>
    %103 = math.tanh %102 : vector<16x32xf32>
    %cst_56 = arith.constant 1.000000e+00 : f32
    %104 = vector.broadcast %cst_56 : f32 to vector<16x32xf32>
    %105 = arith.subf %104, %98 : vector<16x32xf32>
    %106 = arith.mulf %105, %103 : vector<16x32xf32>
    %107 = arith.mulf %98, %66 : vector<16x32xf32>
    %108 = arith.addf %106, %107 : vector<16x32xf32>
    %109 = vector.shape_cast %108 : vector<16x32xf32> to vector<2x8x32xf32>
    %cst_57 = arith.constant 0.000000e+00 : f32
    %110 = vector.broadcast %cst_57 : f32 to vector<2x8x32xf32>
    %111 = arith.cmpf oge, %109, %110 : vector<2x8x32xf32>
    %cst_58 = arith.constant 0.00999999977 : f32
    %112 = vector.broadcast %cst_58 : f32 to vector<2x8x32xf32>
    %113 = arith.mulf %112, %109 : vector<2x8x32xf32>
    %114 = arith.select %111, %109, %113 : vector<2x8x32xi1>, vector<2x8x32xf32>
    %115 = arith.truncf %114 : vector<2x8x32xf32> to vector<2x8x32xbf16>
    "tpu.trace_start"() <{level = 10 : i32, message = "bml,blf->bmf"}> : () -> ()
    %cst_59 = arith.constant dense<0.000000e+00> : vector<2x32x32xf32>
    %116 = tpu.matmul %4, %115, %cst_59 {dimension_numbers = #tpu.dot_dimension_numbers<[2], [1], [1], [2], [0, 0, 0, 1, 1, 2], [0], [0]>} : vector<2x32x8xbf16>, vector<2x8x32xbf16>, vector<2x32x32xf32> -> vector<2x32x32xf32>
    "tpu.trace_stop"() : () -> ()
    %117 = vector.shape_cast %116 : vector<2x32x32xf32> to vector<2x8x4x32xf32>
    %c1 = arith.constant 1 : index
    %c0_60 = arith.constant 0 : index
    %c0_61 = arith.constant 0 : index
    %118 = vector.load %arg6[%c1, %c0_60, %c0_61] : memref<2x1x32xf32, #tpu.memory_space<vmem>>, vector<1x1x32xf32>
    %119 = vector.shape_cast %118 : vector<1x1x32xf32> to vector<1x32xf32>
    %120 = vector.shape_cast %119 : vector<1x32xf32> to vector<1x1x32xf32>
    %121 = vector.broadcast %120 : vector<1x1x32xf32> to vector<2x8x32xf32>
    %122 = arith.mulf %114, %121 : vector<2x8x32xf32>
    %cst_62 = arith.constant dense<0.000000e+00> : vector<2x8xf32>
    %123 = vector.multi_reduction <add>, %122, %cst_62 [2] : vector<2x8x32xf32> to vector<2x8xf32>
    %124 = vector.shape_cast %123 : vector<2x8xf32> to vector<2x8x1xf32>
    %c1_63 = arith.constant 1 : index
    %c0_64 = arith.constant 0 : index
    %c0_65 = arith.constant 0 : index
    %125 = vector.load %arg7[%c1_63, %c0_64, %c0_65] : memref<2x1x32xf32, #tpu.memory_space<vmem>>, vector<1x1x32xf32>
    %126 = vector.shape_cast %125 : vector<1x1x32xf32> to vector<1x32xf32>
    %127 = vector.shape_cast %126 : vector<1x32xf32> to vector<1x1x1x32xf32>
    %128 = vector.broadcast %127 : vector<1x1x1x32xf32> to vector<2x8x4x32xf32>
    %129 = arith.mulf %117, %128 : vector<2x8x4x32xf32>
    %cst_66 = arith.constant dense<0.000000e+00> : vector<2x8x4xf32>
    %130 = vector.multi_reduction <add>, %129, %cst_66 [3] : vector<2x8x4x32xf32> to vector<2x8x4xf32>
    %131 = vector.broadcast %124 : vector<2x8x1xf32> to vector<2x8x4xf32>
    %132 = arith.addf %131, %130 : vector<2x8x4xf32>
    %c1_67 = arith.constant 1 : index
    %c0_68 = arith.constant 0 : index
    %c0_69 = arith.constant 0 : index
    %133 = vector.load %arg8[%c1_67, %c0_68, %c0_69] : memref<2x1x1xf32, #tpu.memory_space<vmem>>, vector<1x1x1xf32>
    %134 = vector.shape_cast %133 : vector<1x1x1xf32> to vector<1x1xf32>
    %135 = vector.shape_cast %134 : vector<1x1xf32> to vector<1x1x1xf32>
    %136 = vector.broadcast %135 : vector<1x1x1xf32> to vector<2x8x4xf32>
    %137 = arith.addf %132, %136 : vector<2x8x4xf32>
    %cst_70 = arith.constant 0.000000e+00 : f32
    %138 = vector.broadcast %cst_70 : f32 to vector<2x8x4xf32>
    %139 = arith.cmpf oge, %137, %138 : vector<2x8x4xf32>
    %cst_71 = arith.constant 0.00999999977 : f32
    %140 = vector.broadcast %cst_71 : f32 to vector<2x8x4xf32>
    %141 = arith.mulf %140, %137 : vector<2x8x4xf32>
    %142 = arith.select %139, %137, %141 : vector<2x8x4xi1>, vector<2x8x4xf32>
    %143 = arith.addf %142, %2 : vector<2x8x4xf32>
    %cst_72 = arith.constant dense<0xFF800000> : vector<2x8xf32>
    %144 = vector.multi_reduction <maximumf>, %143, %cst_72 [2] : vector<2x8x4xf32> to vector<2x8xf32>
    %145 = vector.shape_cast %144 : vector<2x8xf32> to vector<2x8x1xf32>
    %146 = vector.broadcast %145 : vector<2x8x1xf32> to vector<2x8x4xf32>
    %147 = arith.subf %143, %146 : vector<2x8x4xf32>
    %148 = math.exp %147 : vector<2x8x4xf32>
    %cst_73 = arith.constant dense<0.000000e+00> : vector<2x8xf32>
    %149 = vector.multi_reduction <add>, %148, %cst_73 [2] : vector<2x8x4xf32> to vector<2x8xf32>
    %150 = vector.shape_cast %149 : vector<2x8xf32> to vector<2x8x1xf32>
    %151 = vector.broadcast %150 : vector<2x8x1xf32> to vector<2x8x4xf32>
    %152 = arith.divf %148, %151 : vector<2x8x4xf32>
    %153 = arith.mulf %152, %3 : vector<2x8x4xf32>
    %154 = vector.shape_cast %153 : vector<2x8x4xf32> to vector<2x8x4x1xf32>
    %155 = vector.broadcast %154 : vector<2x8x4x1xf32> to vector<2x8x4x32xf32>
    %156 = arith.mulf %155, %117 : vector<2x8x4x32xf32>
    %cst_74 = arith.constant dense<0.000000e+00> : vector<2x8x32xf32>
    %157 = vector.multi_reduction <add>, %156, %cst_74 [2] : vector<2x8x4x32xf32> to vector<2x8x32xf32>
    %cst_75 = arith.constant dense<0.000000e+00> : vector<2x8xf32>
    %158 = vector.multi_reduction <add>, %153, %cst_75 [2] : vector<2x8x4xf32> to vector<2x8xf32>
    %159 = vector.shape_cast %158 : vector<2x8xf32> to vector<2x8x1xf32>
    %160 = vector.shape_cast %157 : vector<2x8x32xf32> to vector<16x32xf32>
    %161 = arith.truncf %160 : vector<16x32xf32> to vector<16x32xbf16>
    %c1_76 = arith.constant 1 : index
    %c0_77 = arith.constant 0 : index
    %c0_78 = arith.constant 0 : index
    %162 = vector.load %arg9[%c1_76, %c0_77, %c0_78] : memref<2x32x32xbf16, #tpu.memory_space<vmem>>, vector<1x32x32xbf16>
    %163 = vector.shape_cast %162 : vector<1x32x32xbf16> to vector<32x32xbf16>
    %cst_79 = arith.constant dense<0.000000e+00> : vector<16x32xf32>
    %164 = tpu.matmul %161, %163, %cst_79 {dimension_numbers = #tpu.dot_dimension_numbers<[1], [0], [0], [1], [0, 0, 1, 1], [], []>} : vector<16x32xbf16>, vector<32x32xbf16>, vector<16x32xf32> -> vector<16x32xf32>
    %c1_80 = arith.constant 1 : index
    %c0_81 = arith.constant 0 : index
    %c0_82 = arith.constant 0 : index
    %165 = vector.load %arg10[%c1_80, %c0_81, %c0_82] : memref<2x1x32xf32, #tpu.memory_space<vmem>>, vector<1x1x32xf32>
    %166 = vector.shape_cast %165 : vector<1x1x32xf32> to vector<1x32xf32>
    %167 = vector.shape_cast %166 : vector<1x32xf32> to vector<1x1x32xf32>
    %168 = vector.broadcast %159 : vector<2x8x1xf32> to vector<2x8x32xf32>
    %169 = vector.broadcast %167 : vector<1x1x32xf32> to vector<2x8x32xf32>
    %170 = arith.mulf %168, %169 : vector<2x8x32xf32>
    %171 = vector.shape_cast %170 : vector<2x8x32xf32> to vector<16x32xf32>
    %172 = arith.addf %164, %171 : vector<16x32xf32>
    %cst_83 = arith.constant 0.000000e+00 : f32
    %173 = vector.broadcast %cst_83 : f32 to vector<16x32xf32>
    %174 = arith.cmpf ogt, %172, %173 : vector<16x32xf32>
    %175 = math.exp %172 : vector<16x32xf32>
    %cst_84 = arith.constant 1.000000e+00 : f32
    %176 = vector.broadcast %cst_84 : f32 to vector<16x32xf32>
    %177 = arith.subf %175, %176 : vector<16x32xf32>
    %178 = arith.select %174, %172, %177 : vector<16x32xi1>, vector<16x32xf32>
    %179 = vector.shape_cast %109 : vector<2x8x32xf32> to vector<16x32xf32>
    %180 = arith.truncf %178 : vector<16x32xf32> to vector<16x32xbf16>
    %c1_85 = arith.constant 1 : index
    %c0_86 = arith.constant 0 : index
    %c0_87 = arith.constant 0 : index
    %181 = vector.load %arg11[%c1_85, %c0_86, %c0_87] : memref<2x32x96xbf16, #tpu.memory_space<vmem>>, vector<1x32x96xbf16>
    %182 = vector.shape_cast %181 : vector<1x32x96xbf16> to vector<32x96xbf16>
    %cst_88 = arith.constant dense<0.000000e+00> : vector<16x96xf32>
    %183 = tpu.matmul %180, %182, %cst_88 {dimension_numbers = #tpu.dot_dimension_numbers<[1], [0], [0], [1], [0, 0, 1, 1], [], []>} : vector<16x32xbf16>, vector<32x96xbf16>, vector<16x96xf32> -> vector<16x96xf32>
    %c1_89 = arith.constant 1 : index
    %c0_90 = arith.constant 0 : index
    %c0_91 = arith.constant 0 : index
    %184 = vector.load %arg13[%c1_89, %c0_90, %c0_91] : memref<2x1x96xf32, #tpu.memory_space<vmem>>, vector<1x1x96xf32>
    %185 = vector.shape_cast %184 : vector<1x1x96xf32> to vector<1x96xf32>
    %186 = vector.broadcast %185 : vector<1x96xf32> to vector<16x96xf32>
    %187 = arith.addf %183, %186 : vector<16x96xf32>
    %188 = arith.truncf %179 : vector<16x32xf32> to vector<16x32xbf16>
    %c1_92 = arith.constant 1 : index
    %c0_93 = arith.constant 0 : index
    %c0_94 = arith.constant 0 : index
    %189 = vector.load %arg12[%c1_92, %c0_93, %c0_94] : memref<2x32x96xbf16, #tpu.memory_space<vmem>>, vector<1x32x96xbf16>
    %190 = vector.shape_cast %189 : vector<1x32x96xbf16> to vector<32x96xbf16>
    %cst_95 = arith.constant dense<0.000000e+00> : vector<16x96xf32>
    %191 = tpu.matmul %188, %190, %cst_95 {dimension_numbers = #tpu.dot_dimension_numbers<[1], [0], [0], [1], [0, 0, 1, 1], [], []>} : vector<16x32xbf16>, vector<32x96xbf16>, vector<16x96xf32> -> vector<16x96xf32>
    %c1_96 = arith.constant 1 : index
    %c0_97 = arith.constant 0 : index
    %c0_98 = arith.constant 0 : index
    %192 = vector.load %arg14[%c1_96, %c0_97, %c0_98] : memref<2x1x96xf32, #tpu.memory_space<vmem>>, vector<1x1x96xf32>
    %193 = vector.shape_cast %192 : vector<1x1x96xf32> to vector<1x96xf32>
    %194 = vector.broadcast %193 : vector<1x96xf32> to vector<16x96xf32>
    %195 = arith.addf %191, %194 : vector<16x96xf32>
    %196 = vector.extract_strided_slice %187 {offsets = [0, 0], sizes = [16, 32], strides = [1, 1]} : vector<16x96xf32> to vector<16x32xf32>
    %197 = vector.extract_strided_slice %195 {offsets = [0, 0], sizes = [16, 32], strides = [1, 1]} : vector<16x96xf32> to vector<16x32xf32>
    %198 = arith.addf %196, %197 : vector<16x32xf32>
    %199 = arith.negf %198 : vector<16x32xf32>
    %200 = math.exp %199 : vector<16x32xf32>
    %cst_99 = arith.constant 1.000000e+00 : f32
    %201 = vector.broadcast %cst_99 : f32 to vector<16x32xf32>
    %202 = arith.addf %201, %200 : vector<16x32xf32>
    %203 = arith.divf %201, %202 : vector<16x32xf32>
    %204 = vector.extract_strided_slice %187 {offsets = [0, 32], sizes = [16, 32], strides = [1, 1]} : vector<16x96xf32> to vector<16x32xf32>
    %205 = vector.extract_strided_slice %195 {offsets = [0, 32], sizes = [16, 32], strides = [1, 1]} : vector<16x96xf32> to vector<16x32xf32>
    %206 = arith.addf %204, %205 : vector<16x32xf32>
    %207 = arith.negf %206 : vector<16x32xf32>
    %208 = math.exp %207 : vector<16x32xf32>
    %cst_100 = arith.constant 1.000000e+00 : f32
    %209 = vector.broadcast %cst_100 : f32 to vector<16x32xf32>
    %210 = arith.addf %209, %208 : vector<16x32xf32>
    %211 = arith.divf %209, %210 : vector<16x32xf32>
    %212 = vector.extract_strided_slice %187 {offsets = [0, 64], sizes = [16, 32], strides = [1, 1]} : vector<16x96xf32> to vector<16x32xf32>
    %213 = vector.extract_strided_slice %195 {offsets = [0, 64], sizes = [16, 32], strides = [1, 1]} : vector<16x96xf32> to vector<16x32xf32>
    %214 = arith.mulf %203, %213 : vector<16x32xf32>
    %215 = arith.addf %212, %214 : vector<16x32xf32>
    %216 = math.tanh %215 : vector<16x32xf32>
    %cst_101 = arith.constant 1.000000e+00 : f32
    %217 = vector.broadcast %cst_101 : f32 to vector<16x32xf32>
    %218 = arith.subf %217, %211 : vector<16x32xf32>
    %219 = arith.mulf %218, %216 : vector<16x32xf32>
    %220 = arith.mulf %211, %179 : vector<16x32xf32>
    %221 = arith.addf %219, %220 : vector<16x32xf32>
    %222 = vector.shape_cast %221 : vector<16x32xf32> to vector<2x8x32xf32>
    %c0_102 = arith.constant 0 : index
    %c0_103 = arith.constant 0 : index
    %c0_104 = arith.constant 0 : index
    %223 = vector.load %arg15[%c0_102, %c0_103, %c0_104] : memref<2x8x32xf32, #tpu.memory_space<vmem>>, vector<2x8x32xf32>
    tpu.vector_store %arg15[%c0_102, %c0_103, %c0_104], %222 {strides = array<i32>} : memref<2x8x32xf32, #tpu.memory_space<vmem>>, vector<2x8x32xf32>,
    %cst_105 = arith.constant 0.000000e+00 : f32
    %224 = vector.broadcast %cst_105 : f32 to vector<2x8x32xf32>
    %225 = arith.cmpf oge, %222, %224 : vector<2x8x32xf32>
    %cst_106 = arith.constant 0.00999999977 : f32
    %226 = vector.broadcast %cst_106 : f32 to vector<2x8x32xf32>
    %227 = arith.mulf %226, %222 : vector<2x8x32xf32>
    %228 = arith.select %225, %222, %227 : vector<2x8x32xi1>, vector<2x8x32xf32>
    %c0_107 = arith.constant 0 : index
    %c0_108 = arith.constant 0 : index
    %c0_109 = arith.constant 0 : index
    %229 = vector.load %arg16[%c0_107, %c0_108, %c0_109] : memref<2x8x32xf32, #tpu.memory_space<vmem>>, vector<2x8x32xf32>
    tpu.vector_store %arg16[%c0_107, %c0_108, %c0_109], %228 {strides = array<i32>} : memref<2x8x32xf32, #tpu.memory_space<vmem>>, vector<2x8x32xf32>,
    return
  }
  func.func @transform_0(%arg0: i32) -> (i32, i32, i32) {
    %c0_i32 = arith.constant 0 : i32
    %c0_i32_0 = arith.constant 0 : i32
    %c0_i32_1 = arith.constant 0 : i32
    return %arg0, %c0_i32, %c0_i32_0 : i32, i32, i32
  }
  func.func @transform_1(%arg0: i32) -> (i32, i32, i32, i32) {
    %c0_i32 = arith.constant 0 : i32
    %c0_i32_0 = arith.constant 0 : i32
    %c0_i32_1 = arith.constant 0 : i32
    %c0_i32_2 = arith.constant 0 : i32
    return %arg0, %c0_i32, %c0_i32_0, %c0_i32_1 : i32, i32, i32, i32
  }
  func.func @transform_2(%arg0: i32) -> (i32, i32, i32) {
    %c0_i32 = arith.constant 0 : i32
    %c0_i32_0 = arith.constant 0 : i32
    %c0_i32_1 = arith.constant 0 : i32
    return %arg0, %c0_i32, %c0_i32_0 : i32, i32, i32
  }
  func.func @transform_3(%arg0: i32) -> (i32, i32, i32) {
    %c0_i32 = arith.constant 0 : i32
    %c0_i32_0 = arith.constant 0 : i32
    %c0_i32_1 = arith.constant 0 : i32
    return %arg0, %c0_i32, %c0_i32_0 : i32, i32, i32
  }
  func.func @transform_4(%arg0: i32) -> (i32, i32, i32) {
    %c0_i32 = arith.constant 0 : i32
    %c0_i32_0 = arith.constant 0 : i32
    %c0_i32_1 = arith.constant 0 : i32
    return %arg0, %c0_i32, %c0_i32_0 : i32, i32, i32
  }
  func.func @transform_5(%arg0: i32) -> (i32, i32, i32) {
    %c0_i32 = arith.constant 0 : i32
    %c0_i32_0 = arith.constant 0 : i32
    %c0_i32_1 = arith.constant 0 : i32
    %c0_i32_2 = arith.constant 0 : i32
    return %c0_i32, %c0_i32_0, %c0_i32_1 : i32, i32, i32
  }
  func.func @transform_6(%arg0: i32) -> (i32, i32, i32) {
    %c0_i32 = arith.constant 0 : i32
    %c0_i32_0 = arith.constant 0 : i32
    %c0_i32_1 = arith.constant 0 : i32
    %c0_i32_2 = arith.constant 0 : i32
    return %c0_i32, %c0_i32_0, %c0_i32_1 : i32, i32, i32
  }
  func.func @transform_7(%arg0: i32) -> (i32, i32, i32) {
    %c0_i32 = arith.constant 0 : i32
    %c0_i32_0 = arith.constant 0 : i32
    %c0_i32_1 = arith.constant 0 : i32
    %c0_i32_2 = arith.constant 0 : i32
    return %c0_i32, %c0_i32_0, %c0_i32_1 : i32, i32, i32
  }
  func.func @transform_8(%arg0: i32) -> (i32, i32, i32) {
    %c0_i32 = arith.constant 0 : i32
    %c0_i32_0 = arith.constant 0 : i32
    %c0_i32_1 = arith.constant 0 : i32
    %c0_i32_2 = arith.constant 0 : i32
    return %c0_i32, %c0_i32_0, %c0_i32_1 : i32, i32, i32
  }
  func.func @transform_9(%arg0: i32) -> (i32, i32, i32) {
    %c0_i32 = arith.constant 0 : i32
    %c0_i32_0 = arith.constant 0 : i32
    %c0_i32_1 = arith.constant 0 : i32
    %c0_i32_2 = arith.constant 0 : i32
    return %c0_i32, %c0_i32_0, %c0_i32_1 : i32, i32, i32
  }
  func.func @transform_10(%arg0: i32) -> (i32, i32, i32) {
    %c0_i32 = arith.constant 0 : i32
    %c0_i32_0 = arith.constant 0 : i32
    %c0_i32_1 = arith.constant 0 : i32
    %c0_i32_2 = arith.constant 0 : i32
    return %c0_i32, %c0_i32_0, %c0_i32_1 : i32, i32, i32
  }
  func.func @transform_11(%arg0: i32) -> (i32, i32, i32) {
    %c0_i32 = arith.constant 0 : i32
    %c0_i32_0 = arith.constant 0 : i32
    %c0_i32_1 = arith.constant 0 : i32
    %c0_i32_2 = arith.constant 0 : i32
    return %c0_i32, %c0_i32_0, %c0_i32_1 : i32, i32, i32
  }
  func.func @transform_12(%arg0: i32) -> (i32, i32, i32) {
    %c0_i32 = arith.constant 0 : i32
    %c0_i32_0 = arith.constant 0 : i32
    %c0_i32_1 = arith.constant 0 : i32
    %c0_i32_2 = arith.constant 0 : i32
    return %c0_i32, %c0_i32_0, %c0_i32_1 : i32, i32, i32
  }
  func.func @transform_13(%arg0: i32) -> (i32, i32, i32) {
    %c0_i32 = arith.constant 0 : i32
    %c0_i32_0 = arith.constant 0 : i32
    %c0_i32_1 = arith.constant 0 : i32
    %c0_i32_2 = arith.constant 0 : i32
    return %c0_i32, %c0_i32_0, %c0_i32_1 : i32, i32, i32
  }
  func.func @transform_14(%arg0: i32) -> (i32, i32, i32) {
    %c0_i32 = arith.constant 0 : i32
    %c0_i32_0 = arith.constant 0 : i32
    %c0_i32_1 = arith.constant 0 : i32
    return %arg0, %c0_i32, %c0_i32_0 : i32, i32, i32
  }
  func.func @transform_15(%arg0: i32) -> (i32, i32, i32) {
    %c0_i32 = arith.constant 0 : i32
    %c0_i32_0 = arith.constant 0 : i32
    %c0_i32_1 = arith.constant 0 : i32
    return %arg0, %c0_i32, %c0_i32_0 : i32, i32, i32
  }
}

module attributes {stable_mosaic.version = 11 : i64} {
  func.func @_mol_head_kernel(%arg0: i32, %arg1: memref<2x8x32xf32, #tpu.memory_space<vmem>>, %arg2: memref<2x8x1xf32, #tpu.memory_space<vmem>>, %arg3: memref<1x32xf32, #tpu.memory_space<vmem>>, %arg4: memref<1x32xf32, #tpu.memory_space<vmem>>, %arg5: memref<1x1xf32, #tpu.memory_space<vmem>>, %arg6: memref<32x32xbf16, #tpu.memory_space<vmem>>, %arg7: memref<1x32xf32, #tpu.memory_space<vmem>>, %arg8: memref<32x96xbf16, #tpu.memory_space<vmem>>, %arg9: memref<32x96xbf16, #tpu.memory_space<vmem>>, %arg10: memref<1x96xf32, #tpu.memory_space<vmem>>, %arg11: memref<1x96xf32, #tpu.memory_space<vmem>>, %arg12: memref<32x32xbf16, #tpu.memory_space<vmem>>, %arg13: memref<1x32xf32, #tpu.memory_space<vmem>>, %arg14: memref<32x32xbf16, #tpu.memory_space<vmem>>, %arg15: memref<1x32xf32, #tpu.memory_space<vmem>>, %arg16: memref<32x4xbf16, #tpu.memory_space<vmem>>, %arg17: memref<1x4xf32, #tpu.memory_space<vmem>>, %arg18: memref<4x4xbf16, #tpu.memory_space<vmem>>, %arg19: memref<1x4xf32, #tpu.memory_space<vmem>>, %arg20: memref<2x4xf32, #tpu.memory_space<vmem>>) attributes {dimension_semantics = [#tpu.dimension_semantics<parallel>], iteration_bounds = array<i64: 1>, scalar_prefetch = 0 : i64, scratch_operands = 0 : i64, tpu.core_type = #tpu.core_type<tc>, window_params = [{transform_indices = @transform_0, window_bounds = array<i64: 2, 8, 32>}, {transform_indices = @transform_1, window_bounds = array<i64: 2, 8, 1>}, {pipeline_mode = #tpu.pipeline_mode<synchronous>, transform_indices = @transform_2, window_bounds = array<i64: 1, 32>}, {pipeline_mode = #tpu.pipeline_mode<synchronous>, transform_indices = @transform_3, window_bounds = array<i64: 1, 32>}, {pipeline_mode = #tpu.pipeline_mode<synchronous>, transform_indices = @transform_4, window_bounds = array<i64: 1, 1>}, {pipeline_mode = #tpu.pipeline_mode<synchronous>, transform_indices = @transform_5, window_bounds = array<i64: 32, 32>}, {pipeline_mode = #tpu.pipeline_mode<synchronous>, transform_indices = @transform_6, window_bounds = array<i64: 1, 32>}, {pipeline_mode = #tpu.pipeline_mode<synchronous>, transform_indices = @transform_7, window_bounds = array<i64: 32, 96>}, {pipeline_mode = #tpu.pipeline_mode<synchronous>, transform_indices = @transform_8, window_bounds = array<i64: 32, 96>}, {pipeline_mode = #tpu.pipeline_mode<synchronous>, transform_indices = @transform_9, window_bounds = array<i64: 1, 96>}, {pipeline_mode = #tpu.pipeline_mode<synchronous>, transform_indices = @transform_10, window_bounds = array<i64: 1, 96>}, {pipeline_mode = #tpu.pipeline_mode<synchronous>, transform_indices = @transform_11, window_bounds = array<i64: 32, 32>}, {pipeline_mode = #tpu.pipeline_mode<synchronous>, transform_indices = @transform_12, window_bounds = array<i64: 1, 32>}, {pipeline_mode = #tpu.pipeline_mode<synchronous>, transform_indices = @transform_13, window_bounds = array<i64: 32, 32>}, {pipeline_mode = #tpu.pipeline_mode<synchronous>, transform_indices = @transform_14, window_bounds = array<i64: 1, 32>}, {pipeline_mode = #tpu.pipeline_mode<synchronous>, transform_indices = @transform_15, window_bounds = array<i64: 32, 4>}, {pipeline_mode = #tpu.pipeline_mode<synchronous>, transform_indices = @transform_16, window_bounds = array<i64: 1, 4>}, {pipeline_mode = #tpu.pipeline_mode<synchronous>, transform_indices = @transform_17, window_bounds = array<i64: 4, 4>}, {pipeline_mode = #tpu.pipeline_mode<synchronous>, transform_indices = @transform_18, window_bounds = array<i64: 1, 4>}, {transform_indices = @transform_19, window_bounds = array<i64: 2, 4>}]} {
    %c0 = arith.constant 0 : index
    %c0_0 = arith.constant 0 : index
    %c0_1 = arith.constant 0 : index
    %0 = vector.load %arg1[%c0, %c0_0, %c0_1] : memref<2x8x32xf32, #tpu.memory_space<vmem>>, vector<2x8x32xf32>
    %c0_2 = arith.constant 0 : index
    %c0_3 = arith.constant 0 : index
    %c0_4 = arith.constant 0 : index
    %1 = vector.load %arg2[%c0_2, %c0_3, %c0_4] : memref<2x8x1xf32, #tpu.memory_space<vmem>>, vector<2x8x1xf32>
    %2 = vector.shape_cast %1 : vector<2x8x1xf32> to vector<2x8xf32>
    %3 = vector.broadcast %1 : vector<2x8x1xf32> to vector<2x8x32xf32>
    %4 = arith.mulf %0, %3 : vector<2x8x32xf32>
    %cst = arith.constant dense<0.000000e+00> : vector<2x32xf32>
    %5 = vector.multi_reduction <add>, %4, %cst [1] : vector<2x8x32xf32> to vector<2x32xf32>
    %cst_5 = arith.constant 0.000000e+00 : f32
    %6 = vector.broadcast %cst_5 : f32 to vector<2x8xf32>
    %7 = arith.cmpf oeq, %2, %6 : vector<2x8xf32>
    %cst_6 = arith.constant -9.000000e+08 : f32
    %cst_7 = arith.constant 0.000000e+00 : f32
    %8 = vector.broadcast %cst_6 : f32 to vector<2x8xf32>
    %9 = vector.broadcast %cst_7 : f32 to vector<2x8xf32>
    %10 = arith.select %7, %8, %9 : vector<2x8xi1>, vector<2x8xf32>
    %11 = vector.shape_cast %0 : vector<2x8x32xf32> to vector<16x32xf32>
    %12 = arith.truncf %11 : vector<16x32xf32> to vector<16x32xbf16>
    %c0_8 = arith.constant 0 : index
    %c0_9 = arith.constant 0 : index
    %13 = vector.load %arg6[%c0_8, %c0_9] : memref<32x32xbf16, #tpu.memory_space<vmem>>, vector<32x32xbf16>
    %cst_10 = arith.constant dense<0.000000e+00> : vector<16x32xf32>
    %14 = tpu.matmul %12, %13, %cst_10 {dimension_numbers = #tpu.dot_dimension_numbers<[1], [0], [0], [1], [0, 0, 1, 1], [], []>} : vector<16x32xbf16>, vector<32x32xbf16>, vector<16x32xf32> -> vector<16x32xf32>
    %c0_11 = arith.constant 0 : index
    %c0_12 = arith.constant 0 : index
    %15 = vector.load %arg7[%c0_11, %c0_12] : memref<1x32xf32, #tpu.memory_space<vmem>>, vector<1x32xf32>
    %16 = vector.broadcast %15 : vector<1x32xf32> to vector<16x32xf32>
    %17 = arith.addf %14, %16 : vector<16x32xf32>
    %18 = vector.shape_cast %17 : vector<16x32xf32> to vector<2x8x32xf32>
    %c0_13 = arith.constant 0 : index
    %c0_14 = arith.constant 0 : index
    %19 = vector.load %arg4[%c0_13, %c0_14] : memref<1x32xf32, #tpu.memory_space<vmem>>, vector<1x32xf32>
    %20 = vector.shape_cast %19 : vector<1x32xf32> to vector<1x1x32xf32>
    %21 = vector.broadcast %20 : vector<1x1x32xf32> to vector<2x8x32xf32>
    %22 = arith.mulf %0, %21 : vector<2x8x32xf32>
    %cst_15 = arith.constant dense<0.000000e+00> : vector<2x8xf32>
    %23 = vector.multi_reduction <add>, %22, %cst_15 [2] : vector<2x8x32xf32> to vector<2x8xf32>
    %cst_16 = arith.constant 0.000000e+00 : f32
    %24 = vector.broadcast %cst_16 : f32 to vector<2x32xf32>
    %25 = arith.cmpf oge, %5, %24 : vector<2x32xf32>
    %cst_17 = arith.constant 0.00999999977 : f32
    %26 = vector.broadcast %cst_17 : f32 to vector<2x32xf32>
    %27 = arith.mulf %26, %5 : vector<2x32xf32>
    %28 = arith.select %25, %5, %27 : vector<2x32xi1>, vector<2x32xf32>
    %c0_18 = arith.constant 0 : index
    %c0_19 = arith.constant 0 : index
    %29 = vector.load %arg3[%c0_18, %c0_19] : memref<1x32xf32, #tpu.memory_space<vmem>>, vector<1x32xf32>
    %30 = vector.broadcast %29 : vector<1x32xf32> to vector<2x32xf32>
    %31 = arith.mulf %28, %30 : vector<2x32xf32>
    %cst_20 = arith.constant dense<0.000000e+00> : vector<2xf32>
    %32 = vector.multi_reduction <add>, %31, %cst_20 [1] : vector<2x32xf32> to vector<2xf32>
    %33 = vector.shape_cast %32 : vector<2xf32> to vector<2x1xf32>
    %34 = vector.broadcast %33 : vector<2x1xf32> to vector<2x8xf32>
    %35 = arith.addf %34, %23 : vector<2x8xf32>
    %c0_21 = arith.constant 0 : index
    %c0_22 = arith.constant 0 : index
    %36 = vector.load %arg5[%c0_21, %c0_22] : memref<1x1xf32, #tpu.memory_space<vmem>>, vector<1x1xf32>
    %37 = vector.broadcast %36 : vector<1x1xf32> to vector<2x8xf32>
    %38 = arith.addf %35, %37 : vector<2x8xf32>
    %cst_23 = arith.constant 0.000000e+00 : f32
    %39 = vector.broadcast %cst_23 : f32 to vector<2x8xf32>
    %40 = arith.cmpf oge, %38, %39 : vector<2x8xf32>
    %cst_24 = arith.constant 0.00999999977 : f32
    %41 = vector.broadcast %cst_24 : f32 to vector<2x8xf32>
    %42 = arith.mulf %41, %38 : vector<2x8xf32>
    %43 = arith.select %40, %38, %42 : vector<2x8xi1>, vector<2x8xf32>
    %44 = arith.addf %43, %10 : vector<2x8xf32>
    %cst_25 = arith.constant dense<0xFF800000> : vector<2xf32>
    %45 = vector.multi_reduction <maximumf>, %44, %cst_25 [1] : vector<2x8xf32> to vector<2xf32>
    %46 = vector.shape_cast %45 : vector<2xf32> to vector<2x1xf32>
    %47 = vector.broadcast %46 : vector<2x1xf32> to vector<2x8xf32>
    %48 = arith.subf %44, %47 : vector<2x8xf32>
    %49 = math.exp %48 : vector<2x8xf32>
    %cst_26 = arith.constant dense<0.000000e+00> : vector<2xf32>
    %50 = vector.multi_reduction <add>, %49, %cst_26 [1] : vector<2x8xf32> to vector<2xf32>
    %51 = vector.shape_cast %50 : vector<2xf32> to vector<2x1xf32>
    %52 = vector.broadcast %51 : vector<2x1xf32> to vector<2x8xf32>
    %53 = arith.divf %49, %52 : vector<2x8xf32>
    %54 = arith.mulf %53, %2 : vector<2x8xf32>
    %55 = vector.shape_cast %54 : vector<2x8xf32> to vector<2x8x1xf32>
    %56 = vector.broadcast %55 : vector<2x8x1xf32> to vector<2x8x32xf32>
    %57 = arith.mulf %56, %18 : vector<2x8x32xf32>
    %cst_27 = arith.constant dense<0.000000e+00> : vector<2x32xf32>
    %58 = vector.multi_reduction <add>, %57, %cst_27 [1] : vector<2x8x32xf32> to vector<2x32xf32>
    %cst_28 = arith.constant 0.000000e+00 : f32
    %59 = vector.broadcast %cst_28 : f32 to vector<2x32xf32>
    %60 = arith.cmpf ogt, %58, %59 : vector<2x32xf32>
    %61 = math.exp %58 : vector<2x32xf32>
    %cst_29 = arith.constant 1.000000e+00 : f32
    %62 = vector.broadcast %cst_29 : f32 to vector<2x32xf32>
    %63 = arith.subf %61, %62 : vector<2x32xf32>
    %64 = arith.select %60, %58, %63 : vector<2x32xi1>, vector<2x32xf32>
    %65 = arith.truncf %64 : vector<2x32xf32> to vector<2x32xbf16>
    %c0_30 = arith.constant 0 : index
    %c0_31 = arith.constant 0 : index
    %66 = vector.load %arg8[%c0_30, %c0_31] : memref<32x96xbf16, #tpu.memory_space<vmem>>, vector<32x96xbf16>
    %cst_32 = arith.constant dense<0.000000e+00> : vector<2x96xf32>
    %67 = tpu.matmul %65, %66, %cst_32 {dimension_numbers = #tpu.dot_dimension_numbers<[1], [0], [0], [1], [0, 0, 1, 1], [], []>} : vector<2x32xbf16>, vector<32x96xbf16>, vector<2x96xf32> -> vector<2x96xf32>
    %c0_33 = arith.constant 0 : index
    %c0_34 = arith.constant 0 : index
    %68 = vector.load %arg10[%c0_33, %c0_34] : memref<1x96xf32, #tpu.memory_space<vmem>>, vector<1x96xf32>
    %69 = vector.broadcast %68 : vector<1x96xf32> to vector<2x96xf32>
    %70 = arith.addf %67, %69 : vector<2x96xf32>
    %71 = arith.truncf %5 : vector<2x32xf32> to vector<2x32xbf16>
    %c0_35 = arith.constant 0 : index
    %c0_36 = arith.constant 0 : index
    %72 = vector.load %arg9[%c0_35, %c0_36] : memref<32x96xbf16, #tpu.memory_space<vmem>>, vector<32x96xbf16>
    %cst_37 = arith.constant dense<0.000000e+00> : vector<2x96xf32>
    %73 = tpu.matmul %71, %72, %cst_37 {dimension_numbers = #tpu.dot_dimension_numbers<[1], [0], [0], [1], [0, 0, 1, 1], [], []>} : vector<2x32xbf16>, vector<32x96xbf16>, vector<2x96xf32> -> vector<2x96xf32>
    %c0_38 = arith.constant 0 : index
    %c0_39 = arith.constant 0 : index
    %74 = vector.load %arg11[%c0_38, %c0_39] : memref<1x96xf32, #tpu.memory_space<vmem>>, vector<1x96xf32>
    %75 = vector.broadcast %74 : vector<1x96xf32> to vector<2x96xf32>
    %76 = arith.addf %73, %75 : vector<2x96xf32>
    %77 = vector.extract_strided_slice %70 {offsets = [0, 0], sizes = [2, 32], strides = [1, 1]} : vector<2x96xf32> to vector<2x32xf32>
    %78 = vector.extract_strided_slice %76 {offsets = [0, 0], sizes = [2, 32], strides = [1, 1]} : vector<2x96xf32> to vector<2x32xf32>
    %79 = arith.addf %77, %78 : vector<2x32xf32>
    %80 = arith.negf %79 : vector<2x32xf32>
    %81 = math.exp %80 : vector<2x32xf32>
    %cst_40 = arith.constant 1.000000e+00 : f32
    %82 = vector.broadcast %cst_40 : f32 to vector<2x32xf32>
    %83 = arith.addf %82, %81 : vector<2x32xf32>
    %84 = arith.divf %82, %83 : vector<2x32xf32>
    %85 = vector.extract_strided_slice %70 {offsets = [0, 32], sizes = [2, 32], strides = [1, 1]} : vector<2x96xf32> to vector<2x32xf32>
    %86 = vector.extract_strided_slice %76 {offsets = [0, 32], sizes = [2, 32], strides = [1, 1]} : vector<2x96xf32> to vector<2x32xf32>
    %87 = arith.addf %85, %86 : vector<2x32xf32>
    %88 = arith.negf %87 : vector<2x32xf32>
    %89 = math.exp %88 : vector<2x32xf32>
    %cst_41 = arith.constant 1.000000e+00 : f32
    %90 = vector.broadcast %cst_41 : f32 to vector<2x32xf32>
    %91 = arith.addf %90, %89 : vector<2x32xf32>
    %92 = arith.divf %90, %91 : vector<2x32xf32>
    %93 = vector.extract_strided_slice %70 {offsets = [0, 64], sizes = [2, 32], strides = [1, 1]} : vector<2x96xf32> to vector<2x32xf32>
    %94 = vector.extract_strided_slice %76 {offsets = [0, 64], sizes = [2, 32], strides = [1, 1]} : vector<2x96xf32> to vector<2x32xf32>
    %95 = arith.mulf %84, %94 : vector<2x32xf32>
    %96 = arith.addf %93, %95 : vector<2x32xf32>
    %97 = math.tanh %96 : vector<2x32xf32>
    %cst_42 = arith.constant 1.000000e+00 : f32
    %98 = vector.broadcast %cst_42 : f32 to vector<2x32xf32>
    %99 = arith.subf %98, %92 : vector<2x32xf32>
    %100 = arith.mulf %99, %97 : vector<2x32xf32>
    %101 = arith.mulf %92, %5 : vector<2x32xf32>
    %102 = arith.addf %100, %101 : vector<2x32xf32>
    %cst_43 = arith.constant 0.000000e+00 : f32
    %103 = vector.broadcast %cst_43 : f32 to vector<2x32xf32>
    %104 = arith.cmpf oge, %102, %103 : vector<2x32xf32>
    %cst_44 = arith.constant 0.00999999977 : f32
    %105 = vector.broadcast %cst_44 : f32 to vector<2x32xf32>
    %106 = arith.mulf %105, %102 : vector<2x32xf32>
    %107 = arith.select %104, %102, %106 : vector<2x32xi1>, vector<2x32xf32>
    %c0_45 = arith.constant 0 : index
    %c0_46 = arith.constant 0 : index
    %108 = vector.load %arg3[%c0_45, %c0_46] : memref<1x32xf32, #tpu.memory_space<vmem>>, vector<1x32xf32>
    %109 = vector.broadcast %108 : vector<1x32xf32> to vector<2x32xf32>
    %110 = arith.mulf %107, %109 : vector<2x32xf32>
    %cst_47 = arith.constant dense<0.000000e+00> : vector<2xf32>
    %111 = vector.multi_reduction <add>, %110, %cst_47 [1] : vector<2x32xf32> to vector<2xf32>
    %112 = vector.shape_cast %111 : vector<2xf32> to vector<2x1xf32>
    %113 = vector.broadcast %112 : vector<2x1xf32> to vector<2x8xf32>
    %114 = arith.addf %113, %23 : vector<2x8xf32>
    %c0_48 = arith.constant 0 : index
    %c0_49 = arith.constant 0 : index
    %115 = vector.load %arg5[%c0_48, %c0_49] : memref<1x1xf32, #tpu.memory_space<vmem>>, vector<1x1xf32>
    %116 = vector.broadcast %115 : vector<1x1xf32> to vector<2x8xf32>
    %117 = arith.addf %114, %116 : vector<2x8xf32>
    %cst_50 = arith.constant 0.000000e+00 : f32
    %118 = vector.broadcast %cst_50 : f32 to vector<2x8xf32>
    %119 = arith.cmpf oge, %117, %118 : vector<2x8xf32>
    %cst_51 = arith.constant 0.00999999977 : f32
    %120 = vector.broadcast %cst_51 : f32 to vector<2x8xf32>
    %121 = arith.mulf %120, %117 : vector<2x8xf32>
    %122 = arith.select %119, %117, %121 : vector<2x8xi1>, vector<2x8xf32>
    %123 = arith.addf %122, %10 : vector<2x8xf32>
    %cst_52 = arith.constant dense<0xFF800000> : vector<2xf32>
    %124 = vector.multi_reduction <maximumf>, %123, %cst_52 [1] : vector<2x8xf32> to vector<2xf32>
    %125 = vector.shape_cast %124 : vector<2xf32> to vector<2x1xf32>
    %126 = vector.broadcast %125 : vector<2x1xf32> to vector<2x8xf32>
    %127 = arith.subf %123, %126 : vector<2x8xf32>
    %128 = math.exp %127 : vector<2x8xf32>
    %cst_53 = arith.constant dense<0.000000e+00> : vector<2xf32>
    %129 = vector.multi_reduction <add>, %128, %cst_53 [1] : vector<2x8xf32> to vector<2xf32>
    %130 = vector.shape_cast %129 : vector<2xf32> to vector<2x1xf32>
    %131 = vector.broadcast %130 : vector<2x1xf32> to vector<2x8xf32>
    %132 = arith.divf %128, %131 : vector<2x8xf32>
    %133 = arith.mulf %132, %2 : vector<2x8xf32>
    %134 = vector.shape_cast %133 : vector<2x8xf32> to vector<2x8x1xf32>
    %135 = vector.broadcast %134 : vector<2x8x1xf32> to vector<2x8x32xf32>
    %136 = arith.mulf %135, %18 : vector<2x8x32xf32>
    %cst_54 = arith.constant dense<0.000000e+00> : vector<2x32xf32>
    %137 = vector.multi_reduction <add>, %136, %cst_54 [1] : vector<2x8x32xf32> to vector<2x32xf32>
    %cst_55 = arith.constant 0.000000e+00 : f32
    %138 = vector.broadcast %cst_55 : f32 to vector<2x32xf32>
    %139 = arith.cmpf ogt, %137, %138 : vector<2x32xf32>
    %140 = math.exp %137 : vector<2x32xf32>
    %cst_56 = arith.constant 1.000000e+00 : f32
    %141 = vector.broadcast %cst_56 : f32 to vector<2x32xf32>
    %142 = arith.subf %140, %141 : vector<2x32xf32>
    %143 = arith.select %139, %137, %142 : vector<2x32xi1>, vector<2x32xf32>
    %144 = arith.truncf %143 : vector<2x32xf32> to vector<2x32xbf16>
    %c0_57 = arith.constant 0 : index
    %c0_58 = arith.constant 0 : index
    %145 = vector.load %arg8[%c0_57, %c0_58] : memref<32x96xbf16, #tpu.memory_space<vmem>>, vector<32x96xbf16>
    %cst_59 = arith.constant dense<0.000000e+00> : vector<2x96xf32>
    %146 = tpu.matmul %144, %145, %cst_59 {dimension_numbers = #tpu.dot_dimension_numbers<[1], [0], [0], [1], [0, 0, 1, 1], [], []>} : vector<2x32xbf16>, vector<32x96xbf16>, vector<2x96xf32> -> vector<2x96xf32>
    %c0_60 = arith.constant 0 : index
    %c0_61 = arith.constant 0 : index
    %147 = vector.load %arg10[%c0_60, %c0_61] : memref<1x96xf32, #tpu.memory_space<vmem>>, vector<1x96xf32>
    %148 = vector.broadcast %147 : vector<1x96xf32> to vector<2x96xf32>
    %149 = arith.addf %146, %148 : vector<2x96xf32>
    %150 = arith.truncf %102 : vector<2x32xf32> to vector<2x32xbf16>
    %c0_62 = arith.constant 0 : index
    %c0_63 = arith.constant 0 : index
    %151 = vector.load %arg9[%c0_62, %c0_63] : memref<32x96xbf16, #tpu.memory_space<vmem>>, vector<32x96xbf16>
    %cst_64 = arith.constant dense<0.000000e+00> : vector<2x96xf32>
    %152 = tpu.matmul %150, %151, %cst_64 {dimension_numbers = #tpu.dot_dimension_numbers<[1], [0], [0], [1], [0, 0, 1, 1], [], []>} : vector<2x32xbf16>, vector<32x96xbf16>, vector<2x96xf32> -> vector<2x96xf32>
    %c0_65 = arith.constant 0 : index
    %c0_66 = arith.constant 0 : index
    %153 = vector.load %arg11[%c0_65, %c0_66] : memref<1x96xf32, #tpu.memory_space<vmem>>, vector<1x96xf32>
    %154 = vector.broadcast %153 : vector<1x96xf32> to vector<2x96xf32>
    %155 = arith.addf %152, %154 : vector<2x96xf32>
    %156 = vector.extract_strided_slice %149 {offsets = [0, 0], sizes = [2, 32], strides = [1, 1]} : vector<2x96xf32> to vector<2x32xf32>
    %157 = vector.extract_strided_slice %155 {offsets = [0, 0], sizes = [2, 32], strides = [1, 1]} : vector<2x96xf32> to vector<2x32xf32>
    %158 = arith.addf %156, %157 : vector<2x32xf32>
    %159 = arith.negf %158 : vector<2x32xf32>
    %160 = math.exp %159 : vector<2x32xf32>
    %cst_67 = arith.constant 1.000000e+00 : f32
    %161 = vector.broadcast %cst_67 : f32 to vector<2x32xf32>
    %162 = arith.addf %161, %160 : vector<2x32xf32>
    %163 = arith.divf %161, %162 : vector<2x32xf32>
    %164 = vector.extract_strided_slice %149 {offsets = [0, 32], sizes = [2, 32], strides = [1, 1]} : vector<2x96xf32> to vector<2x32xf32>
    %165 = vector.extract_strided_slice %155 {offsets = [0, 32], sizes = [2, 32], strides = [1, 1]} : vector<2x96xf32> to vector<2x32xf32>
    %166 = arith.addf %164, %165 : vector<2x32xf32>
    %167 = arith.negf %166 : vector<2x32xf32>
    %168 = math.exp %167 : vector<2x32xf32>
    %cst_68 = arith.constant 1.000000e+00 : f32
    %169 = vector.broadcast %cst_68 : f32 to vector<2x32xf32>
    %170 = arith.addf %169, %168 : vector<2x32xf32>
    %171 = arith.divf %169, %170 : vector<2x32xf32>
    %172 = vector.extract_strided_slice %149 {offsets = [0, 64], sizes = [2, 32], strides = [1, 1]} : vector<2x96xf32> to vector<2x32xf32>
    %173 = vector.extract_strided_slice %155 {offsets = [0, 64], sizes = [2, 32], strides = [1, 1]} : vector<2x96xf32> to vector<2x32xf32>
    %174 = arith.mulf %163, %173 : vector<2x32xf32>
    %175 = arith.addf %172, %174 : vector<2x32xf32>
    %176 = math.tanh %175 : vector<2x32xf32>
    %cst_69 = arith.constant 1.000000e+00 : f32
    %177 = vector.broadcast %cst_69 : f32 to vector<2x32xf32>
    %178 = arith.subf %177, %171 : vector<2x32xf32>
    %179 = arith.mulf %178, %176 : vector<2x32xf32>
    %180 = arith.mulf %171, %102 : vector<2x32xf32>
    %181 = arith.addf %179, %180 : vector<2x32xf32>
    %182 = arith.truncf %181 : vector<2x32xf32> to vector<2x32xbf16>
    %c0_70 = arith.constant 0 : index
    %c0_71 = arith.constant 0 : index
    %183 = vector.load %arg12[%c0_70, %c0_71] : memref<32x32xbf16, #tpu.memory_space<vmem>>, vector<32x32xbf16>
    %cst_72 = arith.constant dense<0.000000e+00> : vector<2x32xf32>
    %184 = tpu.matmul %182, %183, %cst_72 {dimension_numbers = #tpu.dot_dimension_numbers<[1], [0], [0], [1], [0, 0, 1, 1], [], []>} : vector<2x32xbf16>, vector<32x32xbf16>, vector<2x32xf32> -> vector<2x32xf32>
    %c0_73 = arith.constant 0 : index
    %c0_74 = arith.constant 0 : index
    %185 = vector.load %arg13[%c0_73, %c0_74] : memref<1x32xf32, #tpu.memory_space<vmem>>, vector<1x32xf32>
    %186 = vector.broadcast %185 : vector<1x32xf32> to vector<2x32xf32>
    %187 = arith.addf %184, %186 : vector<2x32xf32>
    %cst_75 = arith.constant 0.000000e+00 : f32
    %188 = vector.broadcast %cst_75 : f32 to vector<2x32xf32>
    %189 = arith.cmpf oge, %187, %188 : vector<2x32xf32>
    %cst_76 = arith.constant 0.00999999977 : f32
    %190 = vector.broadcast %cst_76 : f32 to vector<2x32xf32>
    %191 = arith.mulf %190, %187 : vector<2x32xf32>
    %192 = arith.select %189, %187, %191 : vector<2x32xi1>, vector<2x32xf32>
    %193 = arith.addf %192, %181 : vector<2x32xf32>
    %194 = arith.truncf %193 : vector<2x32xf32> to vector<2x32xbf16>
    %c0_77 = arith.constant 0 : index
    %c0_78 = arith.constant 0 : index
    %195 = vector.load %arg14[%c0_77, %c0_78] : memref<32x32xbf16, #tpu.memory_space<vmem>>, vector<32x32xbf16>
    %cst_79 = arith.constant dense<0.000000e+00> : vector<2x32xf32>
    %196 = tpu.matmul %194, %195, %cst_79 {dimension_numbers = #tpu.dot_dimension_numbers<[1], [0], [0], [1], [0, 0, 1, 1], [], []>} : vector<2x32xbf16>, vector<32x32xbf16>, vector<2x32xf32> -> vector<2x32xf32>
    %c0_80 = arith.constant 0 : index
    %c0_81 = arith.constant 0 : index
    %197 = vector.load %arg15[%c0_80, %c0_81] : memref<1x32xf32, #tpu.memory_space<vmem>>, vector<1x32xf32>
    %198 = vector.broadcast %197 : vector<1x32xf32> to vector<2x32xf32>
    %199 = arith.addf %196, %198 : vector<2x32xf32>
    %cst_82 = arith.constant 0.000000e+00 : f32
    %200 = vector.broadcast %cst_82 : f32 to vector<2x32xf32>
    %201 = arith.cmpf oge, %199, %200 : vector<2x32xf32>
    %cst_83 = arith.constant 0.00999999977 : f32
    %202 = vector.broadcast %cst_83 : f32 to vector<2x32xf32>
    %203 = arith.mulf %202, %199 : vector<2x32xf32>
    %204 = arith.select %201, %199, %203 : vector<2x32xi1>, vector<2x32xf32>
    %205 = arith.addf %204, %193 : vector<2x32xf32>
    %206 = arith.truncf %205 : vector<2x32xf32> to vector<2x32xbf16>
    %c0_84 = arith.constant 0 : index
    %c0_85 = arith.constant 0 : index
    %207 = vector.load %arg16[%c0_84, %c0_85] : memref<32x4xbf16, #tpu.memory_space<vmem>>, vector<32x4xbf16>
    %cst_86 = arith.constant dense<0.000000e+00> : vector<2x4xf32>
    %208 = tpu.matmul %206, %207, %cst_86 {dimension_numbers = #tpu.dot_dimension_numbers<[1], [0], [0], [1], [0, 0, 1, 1], [], []>} : vector<2x32xbf16>, vector<32x4xbf16>, vector<2x4xf32> -> vector<2x4xf32>
    %c0_87 = arith.constant 0 : index
    %c0_88 = arith.constant 0 : index
    %209 = vector.load %arg17[%c0_87, %c0_88] : memref<1x4xf32, #tpu.memory_space<vmem>>, vector<1x4xf32>
    %210 = vector.broadcast %209 : vector<1x4xf32> to vector<2x4xf32>
    %211 = arith.addf %208, %210 : vector<2x4xf32>
    %212 = arith.truncf %211 : vector<2x4xf32> to vector<2x4xbf16>
    %c0_89 = arith.constant 0 : index
    %c0_90 = arith.constant 0 : index
    %213 = vector.load %arg18[%c0_89, %c0_90] : memref<4x4xbf16, #tpu.memory_space<vmem>>, vector<4x4xbf16>
    %cst_91 = arith.constant dense<0.000000e+00> : vector<2x4xf32>
    %214 = tpu.matmul %212, %213, %cst_91 {dimension_numbers = #tpu.dot_dimension_numbers<[1], [0], [0], [1], [0, 0, 1, 1], [], []>} : vector<2x4xbf16>, vector<4x4xbf16>, vector<2x4xf32> -> vector<2x4xf32>
    %c0_92 = arith.constant 0 : index
    %c0_93 = arith.constant 0 : index
    %215 = vector.load %arg19[%c0_92, %c0_93] : memref<1x4xf32, #tpu.memory_space<vmem>>, vector<1x4xf32>
    %216 = vector.broadcast %215 : vector<1x4xf32> to vector<2x4xf32>
    %217 = arith.addf %214, %216 : vector<2x4xf32>
    %c0_94 = arith.constant 0 : index
    %c0_95 = arith.constant 0 : index
    %218 = vector.load %arg20[%c0_94, %c0_95] : memref<2x4xf32, #tpu.memory_space<vmem>>, vector<2x4xf32>
    tpu.vector_store %arg20[%c0_94, %c0_95], %217 {strides = array<i32>} : memref<2x4xf32, #tpu.memory_space<vmem>>, vector<2x4xf32>,
    return
  }
  func.func @transform_0(%arg0: i32) -> (i32, i32, i32) {
    %c0_i32 = arith.constant 0 : i32
    %c0_i32_0 = arith.constant 0 : i32
    %c0_i32_1 = arith.constant 0 : i32
    return %arg0, %c0_i32, %c0_i32_0 : i32, i32, i32
  }
  func.func @transform_1(%arg0: i32) -> (i32, i32, i32) {
    %c0_i32 = arith.constant 0 : i32
    %c0_i32_0 = arith.constant 0 : i32
    %c0_i32_1 = arith.constant 0 : i32
    return %arg0, %c0_i32, %c0_i32_0 : i32, i32, i32
  }
  func.func @transform_2(%arg0: i32) -> (i32, i32) {
    %c0_i32 = arith.constant 0 : i32
    %c0_i32_0 = arith.constant 0 : i32
    %c0_i32_1 = arith.constant 0 : i32
    return %c0_i32, %c0_i32_0 : i32, i32
  }
  func.func @transform_3(%arg0: i32) -> (i32, i32) {
    %c0_i32 = arith.constant 0 : i32
    %c0_i32_0 = arith.constant 0 : i32
    %c0_i32_1 = arith.constant 0 : i32
    return %c0_i32, %c0_i32_0 : i32, i32
  }
  func.func @transform_4(%arg0: i32) -> (i32, i32) {
    %c0_i32 = arith.constant 0 : i32
    %c0_i32_0 = arith.constant 0 : i32
    %c0_i32_1 = arith.constant 0 : i32
    return %c0_i32, %c0_i32_0 : i32, i32
  }
  func.func @transform_5(%arg0: i32) -> (i32, i32) {
    %c0_i32 = arith.constant 0 : i32
    %c0_i32_0 = arith.constant 0 : i32
    %c0_i32_1 = arith.constant 0 : i32
    return %c0_i32, %c0_i32_0 : i32, i32
  }
  func.func @transform_6(%arg0: i32) -> (i32, i32) {
    %c0_i32 = arith.constant 0 : i32
    %c0_i32_0 = arith.constant 0 : i32
    %c0_i32_1 = arith.constant 0 : i32
    return %c0_i32, %c0_i32_0 : i32, i32
  }
  func.func @transform_7(%arg0: i32) -> (i32, i32) {
    %c0_i32 = arith.constant 0 : i32
    %c0_i32_0 = arith.constant 0 : i32
    %c0_i32_1 = arith.constant 0 : i32
    return %c0_i32, %c0_i32_0 : i32, i32
  }
  func.func @transform_8(%arg0: i32) -> (i32, i32) {
    %c0_i32 = arith.constant 0 : i32
    %c0_i32_0 = arith.constant 0 : i32
    %c0_i32_1 = arith.constant 0 : i32
    return %c0_i32, %c0_i32_0 : i32, i32
  }
  func.func @transform_9(%arg0: i32) -> (i32, i32) {
    %c0_i32 = arith.constant 0 : i32
    %c0_i32_0 = arith.constant 0 : i32
    %c0_i32_1 = arith.constant 0 : i32
    return %c0_i32, %c0_i32_0 : i32, i32
  }
  func.func @transform_10(%arg0: i32) -> (i32, i32) {
    %c0_i32 = arith.constant 0 : i32
    %c0_i32_0 = arith.constant 0 : i32
    %c0_i32_1 = arith.constant 0 : i32
    return %c0_i32, %c0_i32_0 : i32, i32
  }
  func.func @transform_11(%arg0: i32) -> (i32, i32) {
    %c0_i32 = arith.constant 0 : i32
    %c0_i32_0 = arith.constant 0 : i32
    %c0_i32_1 = arith.constant 0 : i32
    return %c0_i32, %c0_i32_0 : i32, i32
  }
  func.func @transform_12(%arg0: i32) -> (i32, i32) {
    %c0_i32 = arith.constant 0 : i32
    %c0_i32_0 = arith.constant 0 : i32
    %c0_i32_1 = arith.constant 0 : i32
    return %c0_i32, %c0_i32_0 : i32, i32
  }
  func.func @transform_13(%arg0: i32) -> (i32, i32) {
    %c0_i32 = arith.constant 0 : i32
    %c0_i32_0 = arith.constant 0 : i32
    %c0_i32_1 = arith.constant 0 : i32
    return %c0_i32, %c0_i32_0 : i32, i32
  }
  func.func @transform_14(%arg0: i32) -> (i32, i32) {
    %c0_i32 = arith.constant 0 : i32
    %c0_i32_0 = arith.constant 0 : i32
    %c0_i32_1 = arith.constant 0 : i32
    return %c0_i32, %c0_i32_0 : i32, i32
  }
  func.func @transform_15(%arg0: i32) -> (i32, i32) {
    %c0_i32 = arith.constant 0 : i32
    %c0_i32_0 = arith.constant 0 : i32
    %c0_i32_1 = arith.constant 0 : i32
    return %c0_i32, %c0_i32_0 : i32, i32
  }
  func.func @transform_16(%arg0: i32) -> (i32, i32) {
    %c0_i32 = arith.constant 0 : i32
    %c0_i32_0 = arith.constant 0 : i32
    %c0_i32_1 = arith.constant 0 : i32
    return %c0_i32, %c0_i32_0 : i32, i32
  }
  func.func @transform_17(%arg0: i32) -> (i32, i32) {
    %c0_i32 = arith.constant 0 : i32
    %c0_i32_0 = arith.constant 0 : i32
    %c0_i32_1 = arith.constant 0 : i32
    return %c0_i32, %c0_i32_0 : i32, i32
  }
  func.func @transform_18(%arg0: i32) -> (i32, i32) {
    %c0_i32 = arith.constant 0 : i32
    %c0_i32_0 = arith.constant 0 : i32
    %c0_i32_1 = arith.constant 0 : i32
    return %c0_i32, %c0_i32_0 : i32, i32
  }
  func.func @transform_19(%arg0: i32) -> (i32, i32) {
    %c0_i32 = arith.constant 0 : i32
    %c0_i32_0 = arith.constant 0 : i32
    return %arg0, %c0_i32 : i32, i32
  }
}

</mosaic_0001>

<bundles_post_ra>
// kernel: eq.1
= control target key start
LH: loop header
LB: loop body
LE: loop exit
PB: predicated region body
PF: predicated region fallthrough
CT: control target
= control target key end

     0   :  { %s7_s6 = smov 3  ;;  %s21_s9 = smov 3  ;;  %vm4_vm0 = vcmask 31744   ;;  %vm11_vm1 = vcmask 261344   ;;  %vm18_vm2 = vcmask 228544   ;;  %vm25_vm3 = vcmask 195744   ;;  %s119_s0 = inlined_call_operand.vmem [shape: s32[2,8,4], index: 0, kind: input, shape index: {}]   ;;  %s120_s1 = inlined_call_operand.vmem [shape: s32[2,32], index: 1, kind: output, shape index: {}]  }
   0x1   :  { %v61_v0 = vld [vmem:[%s119_s0 + $0x7] ss:$8 sm:%s7_s6]   ;;  %s75_s10 = smov 28   ;;  %v63_v1 = vld [vmem:[%s119_s0 + $0x5] ss:$8 sm:%s21_s9]   ;;  %s14_s13 = smov 3 }
   0x2   :  { %9 = vrot.lane.b32.xlu0 %v61_v0, %s75_s10  ;;  %s76_s14 = smov 20   ;;  %v62_v2 = vld [vmem:[%s119_s0 + $0x6] ss:$8 sm:%s14_s13]   ;;  %s28_s17 = smov 3  ;;  %vm32_vm4 = vcmask 162944   ;;  %vm39_vm5 = vcmask 130144  }
   0x3   :  { %23 = vrot.lane.b32.xlu1 %v63_v1, %s76_s14  ;;  %v64_v3 = vld [vmem:[%s119_s0 + $0x4] ss:$8 sm:%s28_s17]   ;;  %s35_s20 = smov 3  ;;  %s42_s21 = smov 3  ;;  %vm46_vm6 = vcmask 97344   ;;  %vm53_vm7 = vcmask 64544  }
   0x4   :  { %s77_s22 = smov 24   ;;  %s78_s23 = smov 16   ;;  %v65_v4 = vld [vmem:[%s119_s0 + $0x3] ss:$8 sm:%s35_s20]   ;;  %v66_v5 = vld [vmem:[%s119_s0 + $0x2] ss:$8 sm:%s42_s21]  }
   0x5   :  { %s2_s26 = smov 3  ;;  %s49_s29 = smov 3 }
   0x6   :  { %16 = vrot.lane.b32.xlu0 %v62_v2, %s77_s22  ;;  %v3_v6 = vld [vmem:[%s119_s0] ss:$8 sm:%s2_s26]   ;;  %s79_s3 = smov 12   ;;  %s80_s4 = smov 8  }
   0x7   :  { %30 = vrot.lane.b32.xlu1 %v64_v3, %s78_s23  ;;  %5 = vst.msk [vmem:[#allocation0] sm:$0x3] %vm4_vm0, %v3_v6   ;;  %v67_v7 = vld [vmem:[%s119_s0 + $0x1] ss:$8 sm:%s49_s29]   ;;  %s81_s0 = smov 4  }
   0xa   :  { %37 = vrot.lane.b32.xlu0 %v65_v4, %s79_s3 }
   0xb   :  { %44 = vrot.lane.b32.xlu1 %v66_v5, %s80_s4 }
   0xe   :  { %51 = vrot.lane.b32.xlu0 %v67_v7, %s81_s0 }
  0x74   :  { %v10_v8 = vpop.permute.xlu0 %9  }
  0x75   :  { %12 = vst.msk [vmem:[#allocation0] sm:$0x3] %vm11_vm1, %v10_v8   ;;  %v24_v9 = vpop.permute.xlu1 %23  }
  0x78   :  { %v17_v10 = vpop.permute.xlu0 %16  }
  0x79   :  { %19 = vst.msk [vmem:[#allocation0] sm:$0x3] %vm18_vm2, %v17_v10   ;;  %v31_v11 = vpop.permute.xlu1 %30  }
  0x7a   :  { %26 = vst.msk [vmem:[#allocation0] sm:$0x3] %vm25_vm3, %v24_v9  }
  0x7b   :  { %33 = vst.msk [vmem:[#allocation0] sm:$0x3] %vm32_vm4, %v31_v11  }
  0x7c   :  { %v38_v12 = vpop.permute.xlu0 %37  }
  0x7d   :  { %40 = vst.msk [vmem:[#allocation0] sm:$0x3] %vm39_vm5, %v38_v12   ;;  %v45_v13 = vpop.permute.xlu1 %44  }
  0x7e   :  { %47 = vst.msk [vmem:[#allocation0] sm:$0x3] %vm46_vm6, %v45_v13  }
  0x80   :  { %v52_v14 = vpop.permute.xlu0 %51  }
  0x81   :  { %54 = vst.msk [vmem:[#allocation0] sm:$0x3] %vm53_vm7, %v52_v14  }
  0x88   :  { %v58_v15 = vld [vmem:[#allocation0] sm:$0x3] }
  0x89   :  { %60 = vst [vmem:[%s120_s1] sm:$0x3] %v58_v15 }

// kernel: fingerprint_forward.5
= control target key start
LH: loop header
LB: loop body
LE: loop exit
PB: predicated region body
PF: predicated region fallthrough
CT: control target
= control target key end

     0   :  { %vm59_vm0 = vcmask 1043456   ;;  %vm46_vm1 = vcmask 195584   ;;  %vm152_vm2 = vcmask 261120   ;;  %s290_s1 = inlined_call_operand.vmem [shape: bf16[24,32], index: 1, kind: input, shape index: {}]   ;;  %s291_s0 = inlined_call_operand.vmem [shape: f32[64,24], index: 0, kind: input, shape index: {}]   ;;  %s292_s2 = inlined_call_operand.vmem [shape: f32[1,32], index: 2, kind: input, shape index: {}]   ;;  %s293_s3 = inlined_call_operand.vmem [shape: f32[64,32], index: 3, kind: output, shape index: {}]  }
   0x1   :  { %v196_v0 = vld [vmem:[%s290_s1] sm:$0xff]   ;;  %v197_v1 = vld [vmem:[%s290_s1 + $0x8] ss:$0 sps:$4 sm:$0xff]   ;;  %v17_v8 = vld [vmem:[%s291_s0 + $0x10] sm:$0xff] }
   0x2   :  { %v15_v2 = vld [vmem:[%s291_s0] sm:$0xff]  ;;  %178 = vmatprep.subr.bf16.mxu0 %v196_v0  ;;  %190 = vmatprep.subr.bf16.mxu1 %v196_v0  ;;  %v16_v3 = vld [vmem:[%s291_s0 + $0x8] sm:$0xff]  ;;  %v18_v9 = vld [vmem:[%s291_s0 + $0x18] sm:$0xff]  ;;  %v61_v11 = vsel %vm59_vm0, %v197_v1, 0 }
   0x3   :  { %v19_v4 = vld [vmem:[%s291_s0 + $0x20] sm:$0xff]  ;;  %v20_v5 = vld [vmem:[%s291_s0 + $0x28] sm:$0xff]  ;;  %179 = vmatpush3.bf16.msra.mxu0 %v196_v0  ;;  %192 = vmatpush3.bf16.msra.mxu1 %v196_v0  ;;  %v23_v6 = vpack.c.bf16 %v16_v3, %v15_v2  ;;  %v21_v10 = vld [vmem:[%s291_s0 + $0x30] sm:$0xff]  ;;  %v24_v13 = vpack.c.bf16 %v18_v9, %v17_v8 }
   0x4   :  { %v25_v7 = vpack.c.bf16 %v20_v5, %v19_v4  ;;  %194 = vmatprep.subr.msk.bf16.mxu0 %vm59_vm0, %v197_v1  ;;  %195 = vmatprep.subr.msk.bf16.mxu1 %vm59_vm0, %v197_v1  ;;  %v22_v12 = vld [vmem:[%s291_s0 + $0x38] sm:$0xff]  ;;  %v165_v15 = vld [vmem:[%s292_s2] ss:$0 sm:$0xff] }
   0x5   :  { %182 = vmatprep.mubr.msk.bf16.mxu0 %vm46_vm1, %v23_v6  ;;  %v26_v14 = vpack.c.bf16 %v22_v12, %v21_v10 }
   0x6   :  { %186 = vmatprep.mubr.msk.bf16.mxu1 %vm46_vm1, %v25_v7 }
   0x7   :  { %181 = vmatpush3.bf16.msra.mxu0 %v61_v11  ;;  %193 = vmatpush3.bf16.msra.mxu1 %v61_v11 }
   0xa   :  { %183 = vmatmul.mubr.msk.bf16.vlgmr.msra.gmra.mrb[0].mxu0 %vm46_vm1, %v24_v13  ;;  %187 = vmatmul.mubr.msk.bf16.vlgmr.msra.gmra.mrb[0].mxu1 %vm46_vm1, %v26_v14 }
  0xdd   :  { %v184_v16 = vpop.f32.mrb[0].mxu0  ;;  %v188_v17 = vpop.f32.mrb[0].mxu1 }
  0xde   :  { %v106_v18 = vadd.f32 %v184_v16, %v165_v15  ;;  %v122_v19 = vadd.f32 %v188_v17, %v165_v15  ;;  %v97_v20 = vpop.f32.mrb[1].mxu0  ;;  %v113_v21 = vpop.f32.mrb[1].mxu1 }
  0xdf   :  { %v98_v22 = vadd.f32 %v165_v15, %v97_v20  ;;  %v114_v23 = vadd.f32 %v165_v15, %v113_v21  ;;  %v185_v24 = vpop.f32.mrb[2].mxu0  ;;  %v189_v25 = vpop.f32.mrb[2].mxu1 }
  0xe0   :  { %vm130_vm3 = vcmp.ge.f32.partialorder %v106_v18, 0.0  ;;  %v138_v26 = vmul.f32 0.01, %v106_v18  ;;  %vm134_vm4 = vcmp.ge.f32.partialorder %v122_v19, 0.0  ;;  %v142_v27 = vmul.f32 0.01, %v122_v19 }
  0xe1   :  { %vm128_vm5 = vcmp.ge.f32.partialorder %v98_v22, 0.0  ;;  %v136_v28 = vmul.f32 0.01, %v98_v22  ;;  %vm132_vm6 = vcmp.ge.f32.partialorder %v114_v23, 0.0  ;;  %v140_v29 = vmul.f32 0.01, %v114_v23 }
  0xe2   :  { %v146_v30 = vsel %vm130_vm3, %v106_v18, %v138_v26  ;;  %v150_v31 = vsel %vm134_vm4, %v122_v19, %v142_v27  ;;  %v109_v32 = vadd.f32 %v185_v24, %v165_v15  ;;  %v125_v33 = vadd.f32 %v189_v25, %v165_v15  ;;  %v100_v34 = vpop.f32.mrb[3].mxu0  ;;  %v116_v35 = vpop.f32.mrb[3].mxu1 }
  0xe3   :  { %155 = vst.msk [vmem:[%s293_s3 + $0x10] sm:$0xff] %vm152_vm2, %v146_v30  ;;  %159 = vst.msk [vmem:[%s293_s3 + $0x30] sm:$0xff] %vm152_vm2, %v150_v31  ;;  %v144_v36 = vsel %vm128_vm5, %v98_v22, %v136_v28  ;;  %v148_v37 = vsel %vm132_vm6, %v114_v23, %v140_v29  ;;  %v101_v38 = vadd.f32 %v165_v15, %v100_v34 }
  0xe4   :  { %v117_v39 = vadd.f32 %v165_v15, %v116_v35  ;;  %153 = vst.msk [vmem:[%s293_s3] sm:$0xff] %vm152_vm2, %v144_v36  ;;  %157 = vst.msk [vmem:[%s293_s3 + $0x20] sm:$0xff] %vm152_vm2, %v148_v37  ;;  %vm131_vm7 = vcmp.ge.f32.partialorder %v109_v32, 0.0  ;;  %v139_v40 = vmul.f32 0.01, %v109_v32  ;;  %vm135_vm8 = vcmp.ge.f32.partialorder %v125_v33, 0.0 }
  0xe5   :  { %v143_v41 = vmul.f32 0.01, %v125_v33  ;;  %vm129_vm9 = vcmp.ge.f32.partialorder %v101_v38, 0.0  ;;  %v137_v42 = vmul.f32 0.01, %v101_v38 }
  0xe6   :  { %vm133_vm10 = vcmp.ge.f32.partialorder %v117_v39, 0.0  ;;  %v141_v43 = vmul.f32 0.01, %v117_v39  ;;  %v147_v44 = vsel %vm131_vm7, %v109_v32, %v139_v40 }
  0xe7   :  { %v151_v45 = vsel %vm135_vm8, %v125_v33, %v143_v41  ;;  %156 = vst.msk [vmem:[%s293_s3 + $0x18] sm:$0xff] %vm152_vm2, %v147_v44  ;;  %v145_v46 = vsel %vm129_vm9, %v101_v38, %v137_v42 }
  0xe8   :  { %160 = vst.msk [vmem:[%s293_s3 + $0x38] sm:$0xff] %vm152_vm2, %v151_v45  ;;  %v149_v47 = vsel %vm133_vm10, %v117_v39, %v141_v43  ;;  %154 = vst.msk [vmem:[%s293_s3 + $0x8] sm:$0xff] %vm152_vm2, %v145_v46 }
  0xe9   :  { %158 = vst.msk [vmem:[%s293_s3 + $0x28] sm:$0xff] %vm152_vm2, %v149_v47 }

// kernel: fingerprint_forward.4
= control target key start
LH: loop header
LB: loop body
LE: loop exit
PB: predicated region body
PF: predicated region fallthrough
CT: control target
= control target key end

     0   :  { %v105_v0 = vmov 0.0   ;;  %vm106_vm0 = vmmov 0   ;;  %vm33_vm1 = vcmask 130048   ;;  %vm84_vm3 = vcmask 261120   ;;  %s145_s1 = inlined_call_operand.vmem [shape: bf16[16,32], index: 1, kind: input, shape index: {}]   ;;  %s146_s0 = inlined_call_operand.vmem [shape: f32[16,16], index: 0, kind: input, shape index: {}]   ;;  %s147_s2 = inlined_call_operand.vmem [shape: f32[1,32], index: 2, kind: input, shape index: {}]   ;;  %s148_s3 = inlined_call_operand.vmem [shape: f32[16,32], index: 3, kind: output, shape index: {}]  }
   0x1   :  { %96 = vmatprep.subr.bf16.mxu0 %v105_v0  ;;  %v104_v1 = vld [vmem:[%s145_s1] sm:$0xff]   ;;  %98 = vmatprep.mubr.msk.bf16.mxu0 %vm106_vm0, %v105_v0  ;;  %v16_v3 = vld [vmem:[%s146_s0 + $0x8] sm:$0xff] }
   0x2   :  { %v15_v2 = vld [vmem:[%s146_s0] sm:$0xff]  ;;  %97 = vmatpush3.bf16.msra.mxu0 %v104_v1 }
   0x3   :  { %v17_v4 = vpack.c.bf16 %v16_v3, %v15_v2  ;;  %v91_v5 = vld [vmem:[%s147_s2] ss:$0 sm:$0xff] }
   0x5   :  { %99 = vmatmul.mubr.msk.bf16.vlgmr.msra.gmra.mrb[0].mxu0 %vm33_vm1, %v17_v4 }
  0xd8   :  { %v71_v6 = vpop.f32.mrb[0].mxu0 }
  0xd9   :  { %v72_v7 = vadd.f32 %v91_v5, %v71_v6  ;;  %v100_v8 = vpop.f32.mrb[1].mxu0 }
  0xda   :  { %v74_v9 = vpop.f32.mrb[2].mxu0 }
  0xdb   :  { %vm78_vm2 = vcmp.ge.f32.partialorder %v72_v7, 0.0  ;;  %v80_v10 = vmul.f32 0.01, %v72_v7  ;;  %v75_v11 = vadd.f32 %v91_v5, %v74_v9  ;;  %v101_v12 = vpop.f32.mrb[3].mxu0 }
  0xdd   :  { %v82_v13 = vsel %vm78_vm2, %v72_v7, %v80_v10  ;;  %vm79_vm4 = vcmp.ge.f32.partialorder %v75_v11, 0.0  ;;  %v81_v14 = vmul.f32 0.01, %v75_v11 }
  0xde   :  { %85 = vst.msk [vmem:[%s148_s3] sm:$0xff] %vm84_vm3, %v82_v13 }
  0xdf   :  { %v83_v15 = vsel %vm79_vm4, %v75_v11, %v81_v14 }
  0xe0   :  { %86 = vst.msk [vmem:[%s148_s3 + $0x8] sm:$0xff] %vm84_vm3, %v83_v15 }

// kernel: fingerprint_forward.6
= control target key start
LH: loop header
LB: loop body
LE: loop exit
PB: predicated region body
PF: predicated region fallthrough
CT: control target
= control target key end

     0   :  { %vm120_vm0 = vcmask 257024   ;;  %v2205_v30 = vmov 0   ;;  %s2946_s0 = inlined_call_operand.vmem [shape: f32[2,8,32], index: 0, kind: input, shape index: {}]   ;;  %s2947_s1 = inlined_call_operand.vmem [shape: f32[2,8,4,32], index: 1, kind: input, shape index: {}]   ;;  %s2948_s2 = inlined_call_operand.vmem [shape: bf16[2,32,8], index: 2, kind: input, shape index: {}]   ;;  %s2949_s3 = inlined_call_operand.vmem [shape: f32[2,8,4], index: 3, kind: input, shape index: {}]   ;;  %s2950_s4 = inlined_call_operand.vmem [shape: f32[2,8,4], index: 4, kind: input, shape index: {}]   ;;  %s2951_s5 = inlined_call_operand.vmem [shape: f32[2,1,32], index: 5, kind: input, shape index: {}]   ;;  %s2952_s6 = inlined_call_operand.vmem [shape: f32[2,1,32], index: 6, kind: input, shape index: {}]   ;;  %s2953_s7 = inlined_call_operand.vmem [shape: f32[2,1,1], index: 7, kind: input, shape index: {}]   ;;  %s2954_s8 = inlined_call_operand.vmem [shape: bf16[2,32,32], index: 8, kind: input, shape index: {}]   ;;  %s2955_s9 = inlined_call_operand.vmem [shape: f32[2,1,32], index: 9, kind: input, shape index: {}]   ;;  %s2956_s10 = inlined_call_operand.vmem [shape: bf16[2,32,96], index: 10, kind: input, shape index: {}]   ;;  %s2957_s11 = inlined_call_operand.vmem [shape: bf16[2,32,96], index: 11, kind: input, shape index: {}]   ;;  %s2958_s12 = inlined_call_operand.vmem [shape: f32[2,1,96], index: 12, kind: input, shape index: {}]   ;;  %s2959_s13 = inlined_call_operand.vmem [shape: f32[2,1,96], index: 13, kind: input, shape index: {}]   ;;  %s2960_s14 = inlined_call_operand.hbm [shape: f32[2,8,32], index: 14, kind: output, shape index: {0}]   ;;  %s2961_s15 = inlined_call_operand.vmem [shape: f32[2,8,32], index: 15, kind: output, shape index: {1}]  }
   0x1   :  { %v2297_v0 = vld [vmem:[%s2947_s1 + $0x20] sm:$0xf]  ;;  %v2311_v4 = vld [vmem:[%s2947_s1 + $0x24] sm:$0xf]  ;;  %v2324_v9 = vld [vmem:[%s2947_s1 + $0x28] sm:$0xf]  ;;  %2112 = vset.pattern.permute.xlu0 %v2205_v30 }
   0x2   :  { %v1954_v1 = vld [vmem:[%s2952_s6] ss:$0 sm:$0xff]  ;;  %v2316_v5 = vld [vmem:[%s2947_s1 + $0x4] sm:$0xf]  ;;  %v2330_v11 = vld [vmem:[%s2947_s1 + $0x8] sm:$0xf] }
   0x3   :  { %v112_v2 = vmul.f32 %v1954_v1, %v2297_v0  ;;  %v2306_v3 = vld [vmem:[%s2947_s1] sm:$0xf]  ;;  %v113_v7 = vmul.f32 %v1954_v1, %v2311_v4  ;;  %v105_v8 = vmul.f32 %v1954_v1, %v2316_v5  ;;  %v2336_v13 = vld [vmem:[%s2947_s1 + $0x2c] sm:$0xf]  ;;  %v114_v16 = vmul.f32 %v1954_v1, %v2324_v9  ;;  %v2348_v17 = vld [vmem:[%s2947_s1 + $0x30] sm:$0xf] }
   0x4   :  { %v104_v6 = vmul.f32 %v1954_v1, %v2306_v3  ;;  %v2341_v14 = vld [vmem:[%s2947_s1 + $0xc] sm:$0xf]  ;;  %v2353_v18 = vld [vmem:[%s2947_s1 + $0x10] sm:$0xf]  ;;  %v106_v20 = vmul.f32 %v1954_v1, %v2330_v11  ;;  %v115_v21 = vmul.f32 %v1954_v1, %v2336_v13  ;;  %v116_v23 = vmul.f32 %v1954_v1, %v2348_v17  ;;  %v2368_v29 = vld [vmem:[%s2947_s1 + $0x34] sm:$0xf] }
   0x5   :  { %v145_v10 = vsel %vm120_vm0, %v112_v2, 0.0  ;;  %v148_v15 = vsel %vm120_vm0, %v113_v7, 0.0  ;;  %v124_v19 = vsel %vm120_vm0, %v105_v8, 0.0  ;;  %v107_v22 = vmul.f32 %v1954_v1, %v2341_v14  ;;  %v2375_v33 = vld [vmem:[%s2947_s1 + $0x14] sm:$0xf] }
   0x6   :  { %146 = vadd.xlane.f32.xlu1 %v145_v10  ;;  %v121_v12 = vsel %vm120_vm0, %v104_v6, 0.0  ;;  %v108_v24 = vmul.f32 %v1954_v1, %v2353_v18  ;;  %v151_v25 = vsel %vm120_vm0, %v114_v16, 0.0  ;;  %v127_v26 = vsel %vm120_vm0, %v106_v20, 0.0  ;;  %v2381_v35 = vld [vmem:[%s2947_s1 + $0x38] sm:$0xf] }
   0x7   :  { %122 = vadd.xlane.f32.xlu0 %v121_v12  ;;  %v154_v27 = vsel %vm120_vm0, %v115_v21, 0.0  ;;  %v130_v28 = vsel %vm120_vm0, %v107_v22, 0.0  ;;  %v157_v31 = vsel %vm120_vm0, %v116_v23, 0.0  ;;  %v117_v34 = vmul.f32 %v1954_v1, %v2368_v29  ;;  %v2386_v36 = vld [vmem:[%s2947_s1 + $0x18] sm:$0xf] }
   0x8   :  { %v133_v32 = vsel %vm120_vm0, %v108_v24, 0.0  ;;  %v109_v37 = vmul.f32 %v1954_v1, %v2375_v33  ;;  %v2393_v39 = vld [vmem:[%s2947_s1 + $0x3c] sm:$0xf]  ;;  %v118_v40 = vmul.f32 %v1954_v1, %v2381_v35  ;;  %v110_v42 = vmul.f32 %v1954_v1, %v2386_v36 }
   0x9   :  { %v160_v38 = vsel %vm120_vm0, %v117_v34, 0.0 }
   0xa   :  { %149 = vadd.xlane.f32.xlu1 %v148_v15  ;;  %v136_v41 = vsel %vm120_vm0, %v109_v37, 0.0 }
   0xb   :  { %125 = vadd.xlane.f32.xlu0 %v124_v19 }
   0xe   :  { %152 = vadd.xlane.f32.xlu1 %v151_v25 }
   0xf   :  { %128 = vadd.xlane.f32.xlu0 %v127_v26 }
  0x12   :  { %155 = vadd.xlane.f32.xlu1 %v154_v27 }
  0x13   :  { %131 = vadd.xlane.f32.xlu0 %v130_v28 }
  0x16   :  { %158 = vadd.xlane.f32.xlu1 %v157_v31 }
  0x17   :  { %134 = vadd.xlane.f32.xlu0 %v133_v32 }
  0x18   :  { %21 = vsyncpa [#allocation3], 0  ;;  %v2401_v43 = vld [vmem:[%s2947_s1 + $0x1c] sm:$0xf]  ;;  %v163_v44 = vsel %vm120_vm0, %v118_v40, 0.0  ;;  %v119_v45 = vmul.f32 %v1954_v1, %v2393_v39  ;;  %v139_v46 = vsel %vm120_vm0, %v110_v42, 0.0 }
  0x19   :  { %v111_v47 = vmul.f32 %v1954_v1, %v2401_v43  ;;  %v2410_v48 = vld [vmem:[%s2946_s0 + $0x8] sm:$0xff]  ;;  %v1953_v49 = vld [vmem:[%s2951_s5] ss:$0 sm:$0xff]  ;;  %vm90_vm1 = vcmask 261120   ;;  %v185_v1 = vlaneseq  ;;  %vm251_vm2 = vcmask 1041409   ;;  %s2208_s20 = smov 64  }
  0x1a   :  { %161 = vadd.xlane.f32.xlu1 %v160_v38  ;;  %v2418_v50 = vld [vmem:[%s2946_s0] sm:$0xff]  ;;  %v166_v51 = vsel %vm120_vm0, %v119_v45, 0.0  ;;  %v89_v52 = vmul.f32 %v1953_v49, %v2410_v48  ;;  %vm253_vm3 = vcmask 1042434   ;;  %vm255_vm4 = vcmask 1043459   ;;  %s2209_s23 = smov 96   ;;  %s2210_s24 = smov 32  }
  0x1b   :  { %137 = vadd.xlane.f32.xlu0 %v136_v41  ;;  %v142_v53 = vsel %vm120_vm0, %v111_v47, 0.0  ;;  %v88_v54 = vmul.f32 %v1953_v49, %v2418_v50  ;;  %v1955_v57 = vld [vmem:[%s2953_s7] ss:$0 sm:$0xff]  ;;  %v186_v7 = vand.u32 127, %v185_v1  ;;  %v2429_v8 = vshrl.u32 %v185_v1, 7 }
  0x1c   :  { %v94_v55 = vsel %vm90_vm1, %v89_v52, 0.0  ;;  %vm257_vm5 = vcmask 1044484   ;;  %vm259_vm6 = vcmask 1045509   ;;  %vm261_vm7 = vcmask 1046534  }
  0x1d   :  { %v91_v56 = vsel %vm90_vm1, %v88_v54, 0.0  ;;  %v2432_v15 = vsub.s32 %v186_v7, %v2429_v8  ;;  %vm263_vm8 = vcmask 1047559   ;;  %vm296_vm11 = vcmask 31744  }
  0x1e   :  { %164 = vadd.xlane.f32.xlu1 %v163_v44  ;;  %vm2207_vm12 = vmmov 0   ;;  %vm926_vm15 = vcmask 64512  }
  0x1f   :  { %140 = vadd.xlane.f32.xlu0 %v139_v46 }
  0x22   :  { %167 = vadd.xlane.f32.xlu1 %v166_v51 }
  0x23   :  { %143 = vadd.xlane.f32.xlu0 %v142_v53 }
  0x26   :  { %95 = vadd.xlane.f32.xlu1 %v94_v55 }
  0x27   :  { %92 = vadd.xlane.f32.xlu0 %v91_v56 }
  0x3d   :  { %283 = vperm.xlu0 %2112, %v1955_v57  }
  0x93   :  { %v147_v58 = vpop.xlane.xlu1 %146 }
  0x94   :  { %v123_v59 = vpop.xlane.xlu0 %122  ;;  %v222_v19 = vrot.slane %v147_v58, %v2432_v15 }
  0x95   :  { %v190_v31 = vrot.slane %v123_v59, %v2432_v15 }
  0x97   :  { %v150_v60 = vpop.xlane.xlu1 %149 }
  0x98   :  { %v126_v61 = vpop.xlane.xlu0 %125  ;;  %v226_v20 = vrot.slane %v150_v60, %v2432_v15 }
  0x99   :  { %v194_v26 = vrot.slane %v126_v61, %v2432_v15 }
  0x9a   :  { %v265_v24 = vsel %vm251_vm2, %v226_v20, %v222_v19 }
  0x9b   :  { %v153_v62 = vpop.xlane.xlu1 %152  ;;  %v252_v41 = vsel %vm251_vm2, %v194_v26, %v190_v31 }
  0x9c   :  { %v129_v63 = vpop.xlane.xlu0 %128  ;;  %v230_v22 = vrot.slane %v153_v62, %v2432_v15 }
  0x9d   :  { %v198_v30 = vrot.slane %v129_v63, %v2432_v15 }
  0x9e   :  { %v266_v28 = vsel %vm253_vm3, %v230_v22, %v265_v24 }
  0x9f   :  { %v156_v2 = vpop.xlane.xlu1 %155  ;;  %v254_v46 = vsel %vm253_vm3, %v198_v30, %v252_v41 }
  0xa0   :  { %v132_v6 = vpop.xlane.xlu0 %131  ;;  %v234_v27 = vrot.slane %v156_v2, %v2432_v15 }
  0xa1   :  { %v202_v32 = vrot.slane %v132_v6, %v2432_v15 }
  0xa2   :  { %v267_v42 = vsel %vm255_vm4, %v234_v27, %v266_v28 }
  0xa3   :  { %v159_v10 = vpop.xlane.xlu1 %158  ;;  %v256_v51 = vsel %vm255_vm4, %v202_v32, %v254_v46  ;;  %v71_v46 = vld [vmem:[%s2950_s4] sm:$0xff] }
  0xa4   :  { %v135_v12 = vpop.xlane.xlu0 %134  ;;  %v238_v34 = vrot.slane %v159_v10, %v2432_v15 }
  0xa5   :  { %v206_v37 = vrot.slane %v135_v12, %v2432_v15  ;;  %v69_v12 = vld [vmem:[%s2949_s3] sm:$0xff] }
  0xa6   :  { %v268_v54 = vsel %vm257_vm5, %v238_v34, %v267_v42 }
  0xa7   :  { %v162_v16 = vpop.xlane.xlu1 %161  ;;  %v258_v55 = vsel %vm257_vm5, %v206_v37, %v256_v51  ;;  %v2481_v51 = vsub.s32 0, %v2429_v8 }
  0xa8   :  { %v138_v21 = vpop.xlane.xlu0 %137  ;;  %v242_v44 = vrot.slane %v162_v16, %v2432_v15 }
  0xa9   :  { %v210_v45 = vrot.slane %v138_v21, %v2432_v15  ;;  %v70_v21 = vld [vmem:[%s2949_s3 + $0x8] sm:$0xff] }
  0xaa   :  { %v269_v57 = vsel %vm259_vm6, %v242_v44, %v268_v54  ;;  %v2484_v54 = vsub.s32 3, %v2429_v8 }
  0xab   :  { %v165_v23 = vpop.xlane.xlu1 %164  ;;  %v260_v56 = vsel %vm259_vm6, %v210_v45, %v258_v55 }
  0xac   :  { %v141_v25 = vpop.xlane.xlu0 %140  ;;  %v246_v47 = vrot.slane %v165_v23, %v2432_v15 }
  0xad   :  { %v214_v49 = vrot.slane %v141_v25, %v2432_v15 }
  0xae   :  { %v270_v58 = vsel %vm261_vm7, %v246_v47, %v269_v57 }
  0xaf   :  { %v168_v38 = vpop.xlane.xlu1 %167  ;;  %v262_v59 = vsel %vm261_vm7, %v214_v49, %v260_v56  ;;  %v2478_v49 = vsub.s32 2, %v2429_v8 }
  0xb0   :  { %v144_v40 = vpop.xlane.xlu0 %143  ;;  %v250_v52 = vrot.slane %v168_v38, %v2432_v15 }
  0xb1   :  { %v218_v53 = vrot.slane %v144_v40, %v2432_v15 }
  0xb2   :  { %v271_v60 = vsel %vm263_vm8, %v250_v52, %v270_v58  ;;  %v2489_v58 = vsub.s32 1, %v2429_v8 }
  0xb3   :  { %v96_v61 = vpop.xlane.xlu1 %95  ;;  %v264_v62 = vsel %vm263_vm8, %v218_v53, %v262_v59  ;;  %v72_v59 = vld [vmem:[%s2950_s4 + $0x8] sm:$0xff] }
  0xb4   :  { %v93_v63 = vpop.xlane.xlu0 %92  ;;  %v275_v1 = vadd.f32 %v271_v60, %v96_v61 }
  0xb5   :  { %v274_v2 = vadd.f32 %v264_v62, %v93_v63  ;;  %v2497_v63 = vsub.s32 4, %v2429_v8 }
  0xbc   :  { %v284_v6 = vpop.permute.xlu0 %283 }
  0xbd   :  { %v286_v7 = vadd.f32 %v284_v6, %v274_v2  ;;  %v287_v10 = vadd.f32 %v284_v6, %v275_v1  ;;  %v2502_v6 = vsub.s32 5, %v2429_v8 }
  0xbf   :  { %v290_v16 = vmul.f32 0.01, %v286_v7  ;;  %v291_v19 = vmul.f32 0.01, %v287_v10  ;;  %vm288_vm9 = vcmp.ge.f32.partialorder %v286_v7, 0.0  ;;  %vm289_vm10 = vcmp.ge.f32.partialorder %v287_v10, 0.0 }
  0xc1   :  { %v292_v20 = vsel %vm288_vm9, %v286_v7, %v290_v16  ;;  %v293_v22 = vsel %vm289_vm10, %v287_v10, %v291_v19 }
  0xc2   :  { %v294_v23 = vadd.f32 %v292_v20, %v69_v12  ;;  %v295_v25 = vadd.f32 %v293_v22, %v70_v21  ;;  %v2507_v12 = vsub.s32 6, %v2429_v8  ;;  %v2512_v20 = vsub.s32 7, %v2429_v8 }
  0xc4   :  { %v297_v24 = vsel %vm296_vm11, %v294_v23, -inf  ;;  %v300_v26 = vsel %vm296_vm11, %v295_v25, -inf }
  0xc5   :  { %298 = vmax.xlane.f32.xlu1 %v297_v24 }
  0xc9   :  { %301 = vmax.xlane.f32.xlu1 %v300_v26  ;;  %v2113_v26 = vld [vmem:[%s2954_s8] sm:$0xff]  }
 0x152   :  { %v299_v27 = vpop.xlane.xlu1 %298 }
 0x153   :  { %v303_v28 = vsub.f32 %v294_v23, %v299_v27  ;;  %v2206_v27 = vmov 0.0  }
 0x154   :  { %2041 = vmatprep.subr.bf16.mxu0 %v2206_v27  ;;  %2045 = vmatprep.mubr.msk.bf16.mxu0 %vm2207_vm12, %v2206_v27 }
 0x155   :  { %v305_v30 = vmul.f32 1.442695, %v303_v28  ;;  %2042 = vmatpush3.bf16.msra.mxu0 %v2113_v26  ;;  %v2114_v28 = vld [vmem:[%s2954_s8 + $0x8] sm:$0xff]   ;;  %2049 = vmatprep.subr.bf16.mxu1 %v2206_v27 }
 0x156   :  { %v302_v31 = vpop.xlane.xlu1 %301  ;;  %2043 = vmatprep.subr.bf16.mxu0 %v2206_v27  ;;  %2053 = vmatprep.mubr.msk.bf16.mxu1 %vm2207_vm12, %v2206_v27 }
 0x157   :  { %2129 = vpow2.f32 %v305_v30  ;;  %v304_v32 = vsub.f32 %v295_v25, %v302_v31 }
 0x159   :  { %v307_v34 = vmul.f32 1.442695, %v304_v32  ;;  %2044 = vmatpush3.bf16.msra.mxu0 %v2114_v28 }
 0x15a   :  { %2057 = vmatprep.subr.bf16.mxu0 %v2206_v27 }
 0x15b   :  { %2131 = vpow2.f32 %v307_v34 }
 0x161   :  { %v2130_v37 = vpop.eup %2129 }
 0x162   :  { %v309_v38 = vsel %vm296_vm11, %v2130_v37, 0.0 }
 0x163   :  { %310 = vadd.xlane.f32.xlu1 %v309_v38 }
 0x165   :  { %v2132_v40 = vpop.eup %2131 }
 0x166   :  { %v312_v41 = vsel %vm296_vm11, %v2132_v40, 0.0 }
 0x167   :  { %313 = vadd.xlane.f32.xlu1 %v312_v41 }
 0x1f0   :  { %v311_v42 = vpop.xlane.xlu1 %310 }
 0x1f1   :  { %2133 = vrcp.f32 %v311_v42 }
 0x1f4   :  { %v314_v44 = vpop.xlane.xlu1 %313 }
 0x1f5   :  { %2135 = vrcp.f32 %v314_v44 }
 0x1fb   :  { %v2134_v45 = vpop.eup %2133 }
 0x1fc   :  { %v316_v47 = vmul.f32 %v2134_v45, %v2130_v37 }
 0x1fe   :  { %v319_v52 = vmul.f32 %v316_v47, %v71_v46 }
 0x1ff   :  { %v2136_v53 = vpop.eup %2135 }
 0x200   :  { %v318_v55 = vmul.f32 %v2136_v53, %v2132_v40  ;;  %v338_v56 = vrot.slane %v319_v52, %v2478_v49  ;;  %v324_v57 = vrot.slane %v319_v52, %v2481_v51  ;;  %v345_v61 = vrot.slane %v319_v52, %v2484_v54 }
 0x201   :  { %v331_v62 = vrot.slane %v319_v52, %v2489_v58  ;;  %v352_v1 = vrot.slane %v319_v52, %v2497_v63  ;;  %v359_v7 = vrot.slane %v319_v52, %v2502_v6  ;;  %v366_v16 = vrot.slane %v319_v52, %v2507_v12 }
 0x202   :  { %340 = vbcast.lane.b32.xlu0 %v338_v56, 256  ;;  %326 = vbcast.lane.b32.xlu1 %v324_v57, 256  ;;  %v320_v60 = vmul.f32 %v318_v55, %v72_v59  ;;  %v373_v21 = vrot.slane %v319_v52, %v2512_v20  ;;  %v561_v30 = vsel %vm296_vm11, %v319_v52, 0.0 }
 0x204   :  { %v380_v2 = vrot.slane %v320_v60, %v2481_v51  ;;  %v387_v10 = vrot.slane %v320_v60, %v2489_v58  ;;  %v394_v19 = vrot.slane %v320_v60, %v2478_v49  ;;  %v401_v22 = vrot.slane %v320_v60, %v2484_v54 }
 0x205   :  { %v408_v23 = vrot.slane %v320_v60, %v2497_v63  ;;  %v415_v24 = vrot.slane %v320_v60, %v2502_v6  ;;  %v422_v25 = vrot.slane %v320_v60, %v2507_v12  ;;  %v429_v8 = vrot.slane %v320_v60, %v2512_v20 }
 0x206   :  { %347 = vbcast.lane.b32.xlu0 %v345_v61, 256  ;;  %333 = vbcast.lane.b32.xlu1 %v331_v62, 256  ;;  %v564_v31 = vsel %vm296_vm11, %v320_v60, 0.0 }
 0x20a   :  { %354 = vbcast.lane.b32.xlu0 %v352_v1, 256  ;;  %382 = vbcast.lane.b32.xlu1 %v380_v2, 256 }
 0x20e   :  { %361 = vbcast.lane.b32.xlu0 %v359_v7, 256  ;;  %389 = vbcast.lane.b32.xlu1 %v387_v10, 256 }
 0x212   :  { %368 = vbcast.lane.b32.xlu0 %v366_v16, 256  ;;  %396 = vbcast.lane.b32.xlu1 %v394_v19, 256 }
 0x216   :  { %375 = vbcast.lane.b32.xlu0 %v373_v21, 256  ;;  %403 = vbcast.lane.b32.xlu1 %v401_v22, 256 }
 0x21a   :  { %410 = vbcast.lane.b32.xlu1 %v408_v23, 256 }
 0x21e   :  { %417 = vbcast.lane.b32.xlu1 %v415_v24, 256 }
 0x222   :  { %424 = vbcast.lane.b32.xlu1 %v422_v25, 256 }
 0x226   :  { %431 = vbcast.lane.b32.xlu1 %v429_v8, 256 }
 0x235   :  { %562 = vadd.xlane.f32.xlu0 %v561_v30 }
 0x24a   :  { %565 = vadd.xlane.f32.xlu1 %v564_v31 }
 0x274   :  { %v341_v32 = vpop.permute.xlu0 %340  ;;  %v327_v34 = vpop.permute.xlu1 %326 }
 0x275   :  { %v435_v37 = vmul.f32 %v341_v32, %v2330_v11  ;;  %v433_v38 = vmul.f32 %v327_v34, %v2306_v3 }
 0x277   :  { %v463_v40 = vsel %vm120_vm0, %v435_v37, 0.0  ;;  %v449_v41 = vsel %vm120_vm0, %v433_v38, 0.0 }
 0x278   :  { %v464_v42 = vrot.slane %v463_v40, 4  ;;  %v450_v44 = vrot.slane %v449_v41, 4  ;;  %v348_v45 = vpop.permute.xlu0 %347  ;;  %v334_v46 = vpop.permute.xlu1 %333 }
 0x279   :  { %v436_v47 = vmul.f32 %v348_v45, %v2341_v14  ;;  %v434_v52 = vmul.f32 %v334_v46, %v2316_v5 }
 0x27a   :  { %v465_v53 = vadd.f32 %v464_v42, %v463_v40  ;;  %v451_v55 = vadd.f32 %v450_v44, %v449_v41 }
 0x27b   :  { %v470_v56 = vsel %vm120_vm0, %v436_v47, 0.0  ;;  %v456_v11 = vsel %vm120_vm0, %v434_v52, 0.0 }
 0x27c   :  { %v466_v57 = vrot.slane %v465_v53, 2  ;;  %v452_v3 = vrot.slane %v451_v55, 2  ;;  %v471_v59 = vrot.slane %v470_v56, 4  ;;  %v457_v60 = vrot.slane %v456_v11, 4  ;;  %v355_v61 = vpop.permute.xlu0 %354  ;;  %v383_v62 = vpop.permute.xlu1 %382 }
 0x27d   :  { %v437_v1 = vmul.f32 %v355_v61, %v2353_v18  ;;  %v441_v2 = vmul.f32 %v383_v62, %v2297_v0 }
 0x27e   :  { %v467_v7 = vadd.f32 %v466_v57, %v465_v53  ;;  %v472_v14 = vadd.f32 %v471_v59, %v470_v56  ;;  %v458_v10 = vadd.f32 %v457_v60, %v456_v11  ;;  %v453_v19 = vadd.f32 %v452_v3, %v451_v55 }
 0x27f   :  { %v477_v5 = vsel %vm120_vm0, %v437_v1, 0.0  ;;  %v505_v16 = vsel %vm120_vm0, %v441_v2, 0.0 }
 0x280   :  { %v473_v21 = vrot.slane %v472_v14, 2  ;;  %v459_v22 = vrot.slane %v458_v10, 2  ;;  %v362_v23 = vpop.permute.xlu0 %361  ;;  %v390_v24 = vpop.permute.xlu1 %389  ;;  %v478_v25 = vrot.slane %v477_v5, 4  ;;  %v506_v8 = vrot.slane %v505_v16, 4 }
 0x281   :  { %v438_v26 = vmul.f32 %v362_v23, %v2375_v33  ;;  %v442_v18 = vmul.f32 %v390_v24, %v2311_v4  ;;  %v468_v28 = vrot.slane %v467_v7, 1  ;;  %v454_v38 = vrot.slane %v453_v19, 1 }
 0x282   :  { %v474_v0 = vadd.f32 %v473_v21, %v472_v14  ;;  %v460_v30 = vadd.f32 %v459_v22, %v458_v10  ;;  %v479_v31 = vadd.f32 %v478_v25, %v477_v5  ;;  %v507_v40 = vadd.f32 %v506_v8, %v505_v16 }
 0x283   :  { %v512_v32 = vsel %vm120_vm0, %v442_v18, 0.0  ;;  %v484_v41 = vsel %vm120_vm0, %v438_v26, 0.0  ;;  %v469_v44 = vadd.f32 %v468_v28, %v467_v7  ;;  %v455_v55 = vadd.f32 %v454_v38, %v453_v19 }
 0x284   :  { %v369_v34 = vpop.permute.xlu0 %368  ;;  %v397_v37 = vpop.permute.xlu1 %396  ;;  %v513_v42 = vrot.slane %v512_v32, 4  ;;  %v475_v45 = vrot.slane %v474_v0, 1  ;;  %v461_v46 = vrot.slane %v460_v30, 1  ;;  %v480_v47 = vrot.slane %v479_v31, 2 }
 0x285   :  { %v485_v33 = vrot.slane %v484_v41, 4  ;;  %v439_v4 = vmul.f32 %v369_v34, %v2386_v36  ;;  %v443_v52 = vmul.f32 %v397_v37, %v2324_v9  ;;  %v508_v56 = vrot.slane %v507_v40, 2 }
 0x286   :  { %v514_v57 = vadd.f32 %v513_v42, %v512_v32  ;;  %v569_v60 = vpack.c.bf16 %v469_v44, %v469_v44  ;;  %v476_v61 = vadd.f32 %v475_v45, %v474_v0  ;;  %v462_v62 = vadd.f32 %v461_v46, %v460_v30 }
 0x287   :  { %v491_v3 = vsel %vm120_vm0, %v439_v4, 0.0  ;;  %v519_v59 = vsel %vm120_vm0, %v443_v52, 0.0  ;;  %v481_v1 = vadd.f32 %v480_v47, %v479_v31  ;;  %v486_v2 = vadd.f32 %v485_v33, %v484_v41 }
 0x288   :  { %v404_v53 = vpop.permute.xlu1 %403  ;;  %v376_v11 = vpop.permute.xlu0 %375  ;;  %v492_v7 = vrot.slane %v491_v3, 4  ;;  %v520_v14 = vrot.slane %v519_v59, 4  ;;  %v567_v9 = vpack.c.bf16 %v455_v55, %v455_v55  ;;  %v509_v5 = vadd.f32 %v508_v56, %v507_v40 }
 0x289   :  { %v440_v36 = vmul.f32 %v376_v11, %v2401_v43  ;;  %v515_v16 = vrot.slane %v514_v57, 2  ;;  %v2557_v22 = vunpack.c.l.b16 %v569_v60  ;;  %v570_v23 = vpack.c.bf16 %v476_v61, %v476_v61 }
 0x28a   :  { %v493_v19 = vadd.f32 %v492_v7, %v491_v3  ;;  %v521_v21 = vadd.f32 %v520_v14, %v519_v59  ;;  %v568_v24 = vpack.c.bf16 %v462_v62, %v462_v62  ;;  %v482_v8 = vrot.slane %v481_v1, 1 }
 0x28b   :  { %v498_v25 = vsel %vm120_vm0, %v440_v36, 0.0  ;;  %v487_v26 = vrot.slane %v486_v2, 2  ;;  %v612_v30 = vunpack.c.l.b16 %v567_v9  ;;  %v510_v31 = vrot.slane %v509_v5, 1 }
 0x28c   :  { %v411_v10 = vpop.permute.xlu1 %410  ;;  %v522_v18 = vrot.slane %v521_v21, 2  ;;  %v499_v28 = vrot.slane %v498_v25, 4  ;;  %v444_v43 = vmul.f32 %v404_v53, %v2336_v13  ;;  %v516_v34 = vadd.f32 %v515_v16, %v514_v57 }
 0x28d   :  { %v445_v32 = vmul.f32 %v411_v10, %v2348_v17  ;;  %v494_v37 = vrot.slane %v493_v19, 2  ;;  %v2562_v41 = vunpack.c.l.b16 %v570_v23  ;;  %v613_v46 = vunpack.c.l.b16 %v568_v24 }
 0x28e   :  { %v523_v38 = vadd.f32 %v522_v18, %v521_v21  ;;  %v500_v40 = vadd.f32 %v499_v28, %v498_v25  ;;  %v526_v42 = vsel %vm120_vm0, %v444_v43, 0.0  ;;  %v2567_v47 = vadd.f32 %v482_v8, %v481_v1 }
 0x28f   :  { %v533_v44 = vsel %vm120_vm0, %v445_v32, 0.0  ;;  %v488_v33 = vadd.f32 %v487_v26, %v486_v2  ;;  %v527_v52 = vrot.slane %v526_v42, 4  ;;  %v511_v56 = vadd.f32 %v510_v31, %v509_v5 }
 0x290   :  { %v418_v0 = vpop.permute.xlu1 %417  ;;  %v501_v4 = vrot.slane %v500_v40, 2  ;;  %v534_v17 = vrot.slane %v533_v44, 4  ;;  %v517_v11 = vrot.slane %v516_v34, 1  ;;  %v495_v57 = vadd.f32 %v494_v37, %v493_v19 }
 0x291   :  { %v446_v45 = vmul.f32 %v418_v0, %v2368_v29  ;;  %v524_v3 = vrot.slane %v523_v38, 1  ;;  %v528_v59 = vadd.f32 %v527_v52, %v526_v42  ;;  %v628_v62 = vsel %vm251_vm2, %v613_v46, %v612_v30 }
 0x292   :  { %v535_v60 = vadd.f32 %v534_v17, %v533_v44  ;;  %v489_v1 = vrot.slane %v488_v33, 1  ;;  %v502_v2 = vadd.f32 %v501_v4, %v500_v40  ;;  %v518_v5 = vadd.f32 %v517_v11, %v516_v34 }
 0x293   :  { %v540_v53 = vsel %vm120_vm0, %v446_v45, 0.0  ;;  %v529_v36 = vrot.slane %v528_v59, 2  ;;  %v496_v16 = vrot.slane %v495_v57, 1  ;;  %v525_v19 = vadd.f32 %v524_v3, %v523_v38 }
 0x294   :  { %v425_v13 = vpop.permute.xlu1 %424  ;;  %v541_v61 = vrot.slane %v540_v53, 4  ;;  %v536_v10 = vrot.slane %v535_v60, 2  ;;  %v575_v26 = vpack.c.bf16 %v511_v56, %v511_v56  ;;  %v503_v18 = vrot.slane %v502_v2, 1 }
 0x295   :  { %v447_v55 = vmul.f32 %v425_v13, %v2381_v35  ;;  %v530_v23 = vadd.f32 %v529_v36, %v528_v59  ;;  %v490_v30 = vadd.f32 %v489_v1, %v488_v33  ;;  %v576_v37 = vpack.c.bf16 %v518_v5, %v518_v5 }
 0x296   :  { %v542_v9 = vadd.f32 %v541_v61, %v540_v53  ;;  %v537_v24 = vadd.f32 %v536_v10, %v535_v60  ;;  %v497_v40 = vadd.f32 %v496_v16, %v495_v57  ;;  %v577_v42 = vpack.c.bf16 %v525_v19, %v525_v19 }
 0x297   :  { %v547_v29 = vsel %vm120_vm0, %v447_v55, 0.0  ;;  %v531_v31 = vrot.slane %v530_v23, 1  ;;  %v629_v46 = vsel %vm253_vm3, %v2557_v22, %v628_v62  ;;  %v504_v4 = vadd.f32 %v503_v18, %v502_v2 }
 0x298   :  { %v548_v7 = vrot.slane %v547_v29, 4  ;;  %v432_v14 = vpop.permute.xlu1 %431  ;;  %v543_v25 = vrot.slane %v542_v9, 2  ;;  %v538_v43 = vrot.slane %v537_v24, 1  ;;  %v571_v33 = vpack.c.bf16 %v2567_v47, %v2567_v47 }
 0x299   :  { %v448_v35 = vmul.f32 %v432_v14, %v2393_v39  ;;  %v532_v38 = vadd.f32 %v531_v31, %v530_v23  ;;  %v572_v56 = vpack.c.bf16 %v490_v30, %v490_v30  ;;  %v621_v11 = vunpack.c.l.b16 %v576_v37  ;;  %v2116_v37 = vld [vmem:[%s2957_s11 + $0x8] sm:$0xff]  }
 0x29a   :  { %v549_v21 = vadd.f32 %v548_v7, %v547_v29  ;;  %v544_v32 = vadd.f32 %v543_v25, %v542_v9  ;;  %v539_v44 = vadd.f32 %v538_v43, %v537_v24  ;;  %v620_v59 = vunpack.c.l.b16 %v575_v26  ;;  %v2115_v43 = vld [vmem:[%s2957_s11] sm:$0xff]  }
 0x29b   :  { %v554_v8 = vsel %vm120_vm0, %v448_v35, 0.0  ;;  %v578_v17 = vpack.c.bf16 %v532_v38, %v532_v38  ;;  %v573_v60 = vpack.c.bf16 %v497_v40, %v497_v40  ;;  %v622_v61 = vunpack.c.l.b16 %v577_v42  ;;  %v1956_v42 = vld [vmem:[%s2955_s9] ss:$0 sm:$0xff] }
 0x29c   :  { %v550_v28 = vrot.slane %v549_v21, 2  ;;  %v555_v0 = vrot.slane %v554_v8, 4  ;;  %v545_v45 = vrot.slane %v544_v32, 1  ;;  %v579_v53 = vpack.c.bf16 %v539_v44, %v539_v44 }
 0x29d   :  { %v574_v1 = vpack.c.bf16 %v504_v4, %v504_v4  ;;  %v623_v7 = vunpack.c.l.b16 %v578_v17  ;;  %v616_v2 = vunpack.c.l.b16 %v571_v33  ;;  %v630_v14 = vsel %vm255_vm4, %v2562_v41, %v629_v46 }
 0x29e   :  { %v551_v39 = vadd.f32 %v550_v28, %v549_v21  ;;  %v556_v34 = vadd.f32 %v555_v0, %v554_v8  ;;  %v546_v55 = vadd.f32 %v545_v45, %v544_v32  ;;  %v624_v47 = vunpack.c.l.b16 %v579_v53 }
 0x29f   :  { %v617_v36 = vunpack.c.l.b16 %v572_v56  ;;  %v635_v10 = vsel %vm251_vm2, %v621_v11, %v620_v59  ;;  %v618_v5 = vunpack.c.l.b16 %v573_v60  ;;  %v619_v21 = vunpack.c.l.b16 %v574_v1  ;;  %v1966_v11 = vld [vmem:[%s2959_s13] ss:$0 sm:$0xff] }
 0x2a0   :  { %v552_v13 = vrot.slane %v551_v39, 1  ;;  %v557_v52 = vrot.slane %v556_v34, 2  ;;  %v580_v29 = vpack.c.bf16 %v546_v55, %v546_v55  ;;  %v636_v16 = vsel %vm253_vm3, %v622_v61, %v635_v10 }
 0x2a1   :  { %v637_v23 = vsel %vm255_vm4, %v623_v7, %v636_v16  ;;  %v631_v25 = vsel %vm257_vm5, %v616_v2, %v630_v14  ;;  %v777_v40 = vpack.c.bf16 %v2410_v48, %v2418_v50 }
 0x2a2   :  { %v553_v57 = vadd.f32 %v552_v13, %v551_v39  ;;  %v558_v3 = vadd.f32 %v557_v52, %v556_v34  ;;  %v625_v9 = vunpack.c.l.b16 %v580_v29  ;;  %v638_v8 = vsel %vm257_vm5, %v624_v47, %v637_v23  ;;  %v2117_v39 = vld [vmem:[%s2956_s10] sm:$0xff]   ;;  %v2118_v34 = vld [vmem:[%s2956_s10 + $0x8] sm:$0xff]  }
 0x2a3   :  { %v632_v41 = vsel %vm259_vm6, %v617_v36, %v631_v25  ;;  %2050 = vmatpush3.bf16.msra.mxu1 %v2117_v39  ;;  %v1962_v36 = vld [vmem:[%s2958_s12] ss:$0 sm:$0xff] }
 0x2a4   :  { %v581_v22 = vpack.c.bf16 %v553_v57, %v553_v57  ;;  %v559_v62 = vrot.slane %v558_v3, 1  ;;  %v639_v18 = vsel %vm259_vm6, %v625_v9, %v638_v8  ;;  %v633_v28 = vsel %vm261_vm7, %v618_v5, %v632_v41  ;;  %2051 = vmatprep.subr.bf16.mxu1 %v2206_v27 }
 0x2a5   :  { %v634_v30 = vsel %vm263_vm8, %v619_v21, %v633_v28 }
 0x2a6   :  { %v560_v35 = vadd.f32 %v559_v62, %v558_v3  ;;  %v626_v19 = vunpack.c.l.b16 %v581_v22 }
 0x2a7   :  { %2052 = vmatpush3.bf16.msra.mxu1 %v2118_v34 }
 0x2a8   :  { %v582_v24 = vpack.c.bf16 %v560_v35, %v560_v35  ;;  %v640_v0 = vsel %vm261_vm7, %v626_v19, %v639_v18 }
 0x2aa   :  { %v627_v26 = vunpack.c.l.b16 %v582_v24 }
 0x2ac   :  { %v641_v31 = vsel %vm263_vm8, %v627_v26, %v640_v0 }
 0x2ad   :  { %v642_v32 = vpack.c.b16 %v641_v31, %v634_v30 }
 0x2af   :  { %2046 = vmatmul.mubr.msk.bf16.vlgmr.msra.gmra.mrb[0].mxu0 %vm90_vm1, %v642_v32 }
 0x2b0   :  { %2058 = vmatpush3.bf16.msra.mxu0 %v2115_v43  ;;  %2061 = vmatprep.mubr.msk.bf16.mxu0 %vm2207_vm12, %v2206_v27 }
 0x2b1   :  { %2059 = vmatprep.subr.bf16.mxu0 %v2206_v27 }
 0x2b4   :  { %2060 = vmatpush3.bf16.msra.mxu0 %v2116_v37 }
 0x2b7   :  { %2062 = vmatmul.mubr.msk.bf16.vlgmr.msra.gmra.mrb[4].mxu0 %vm90_vm1, %v777_v40 }
 0x2c2   :  { %v563_v38 = vpop.xlane.xlu0 %562 }
 0x2c3   :  { %v594_v45 = vmul.f32 %v1956_v42, %v563_v38 }
 0x2d7   :  { %v566_v44 = vpop.xlane.xlu1 %565 }
 0x2d8   :  { %v595_v4 = vmul.f32 %v1956_v42, %v566_v44 }
 0x382   :  { %v692_v46 = vpop.f32.mrb[0].mxu0 }
 0x383   :  { %v693_v13 = vadd.f32 %v692_v46, %v594_v45  ;;  %v2047_v52 = vpop.f32.mrb[1].mxu0 }
 0x384   :  { %v695_v33 = vpop.f32.mrb[2].mxu0 }
 0x385   :  { %v701_v17 = vmul.f32 1.442695, %v693_v13  ;;  %v696_v53 = vadd.f32 %v695_v33, %v595_v4  ;;  %v2048_v55 = vpop.f32.mrb[3].mxu0  ;;  %vm699_vm13 = vcmp.gt.f32.partialorder %v693_v13, 0.0  ;;  %v2119_v4 = vld [vmem:[%s2948_s2] sm:$0xff]  }
 0x387   :  { %2137 = vpow2.f32 %v701_v17  ;;  %v703_v56 = vmul.f32 1.442695, %v696_v53  ;;  %vm700_vm14 = vcmp.gt.f32.partialorder %v696_v53, 0.0 }
 0x389   :  { %2139 = vpow2.f32 %v703_v56 }
 0x38a   :  { %v838_v57 = vpop.f32.mrb[4].mxu0 }
 0x38b   :  { %v839_v3 = vadd.f32 %v1966_v11, %v838_v57  ;;  %v2063_v59 = vpop.f32.mrb[5].mxu0 }
 0x38c   :  { %v841_v60 = vpop.f32.mrb[6].mxu0 }
 0x38d   :  { %v842_v61 = vadd.f32 %v1966_v11, %v841_v60  ;;  %v2064_v29 = vpop.f32.mrb[7].mxu0  ;;  %861 = vrot.lane.b32.xlu0 %v839_v3, %s2208_s20 }
 0x38f   :  { %863 = vrot.lane.b32.xlu1 %v842_v61, %s2208_s20 }
 0x391   :  { %v2138_v1 = vpop.eup %2137 }
 0x392   :  { %v1960_v7 = vadd.f32 -1.0, %v2138_v1  ;;  %v1981_v1 = vld [vmem:[%s2951_s5 + $0x1] ss:$0 sm:$0xff] }
 0x393   :  { %v2140_v22 = vpop.eup %2139 }
 0x394   :  { %v1961_v62 = vadd.f32 -1.0, %v2140_v22  ;;  %v707_v2 = vsel %vm699_vm13, %v693_v13, %v1960_v7  ;;  %vm933_vm13 = vcmask 1043456  }
 0x396   :  { %v708_v14 = vsel %vm700_vm14, %v696_v53, %v1961_v62  ;;  %v2120_v62 = vld [vmem:[%s2948_s2 + $0x8] sm:$0xff]  }
 0x397   :  { %v709_v47 = vpack.c.bf16 %v708_v14, %v707_v2 }
 0x399   :  { %2054 = vmatmul.mubr.msk.bf16.vlgmr.msra.gmra.mrb[0].mxu1 %vm90_vm1, %v709_v47 }
 0x39a   :  { %2067 = vmatprep.mubr.msk.bf16.mxu1 %vm926_vm15, %v2119_v4 }
 0x3ff   :  { %v862_v28 = vpop.permute.xlu0 %861 }
 0x401   :  { %v864_v43 = vpop.permute.xlu1 %863 }
 0x46c   :  { %v770_v10 = vpop.f32.mrb[0].mxu1 }
 0x46d   :  { %v771_v9 = vadd.f32 %v1962_v36, %v770_v10  ;;  %v2055_v35 = vpop.f32.mrb[1].mxu1 }
 0x46e   :  { %v773_v5 = vpop.f32.mrb[2].mxu1  ;;  %v1983_v35 = vld [vmem:[%s2952_s6 + $0x1] ss:$0 sm:$0xff] }
 0x46f   :  { %v845_v16 = vadd.f32 %v839_v3, %v771_v9  ;;  %v774_v19 = vadd.f32 %v1962_v36, %v773_v5  ;;  %v2056_v21 = vpop.f32.mrb[3].mxu1  ;;  %v2122_v36 = vld [vmem:[%s2948_s2 + $0x18] sm:$0xff]  }
 0x471   :  { %v1970_v23 = vmul.f32 -1.442695, %v845_v16  ;;  %v846_v24 = vadd.f32 %v842_v61, %v774_v19 }
 0x473   :  { %2141 = vpow2.f32 %v1970_v23  ;;  %v1971_v25 = vmul.f32 -1.442695, %v846_v24 }
 0x475   :  { %2143 = vpow2.f32 %v1971_v25 }
 0x47d   :  { %v2142_v8 = vpop.eup %2141 }
 0x47e   :  { %v853_v26 = vadd.f32 1.0, %v2142_v8 }
 0x47f   :  { %v2144_v41 = vpop.eup %2143 }
 0x480   :  { %2145 = vrcp.f32 %v853_v26  ;;  %v854_v18 = vadd.f32 1.0, %v2144_v41 }
 0x482   :  { %2147 = vrcp.f32 %v854_v18 }
 0x48a   :  { %v2146_v0 = vpop.eup %2145 }
 0x48b   :  { %v867_v30 = vmul.f32 %v2146_v0, %v862_v28  ;;  %v881_v46 = vsub.f32 1.0, %v2146_v0 }
 0x48c   :  { %v2148_v31 = vpop.eup %2147 }
 0x48d   :  { %v868_v32 = vmul.f32 %v2148_v31, %v864_v43  ;;  %871 = vrot.lane.b32.xlu0 %v867_v30, %s2208_s20  ;;  %v882_v33 = vsub.f32 1.0, %v2148_v31 }
 0x48f   :  { %873 = vrot.lane.b32.xlu1 %v868_v32, %s2208_s20 }
 0x4ff   :  { %v872_v37 = vpop.permute.xlu0 %871 }
 0x500   :  { %v877_v40 = vadd.f32 %v872_v37, %v771_v9 }
 0x501   :  { %v874_v39 = vpop.permute.xlu1 %873 }
 0x502   :  { %2149 = vtanh.f32 %v877_v40  ;;  %v878_v34 = vadd.f32 %v874_v39, %v774_v19 }
 0x504   :  { %2151 = vtanh.f32 %v878_v34 }
 0x50c   :  { %v2150_v42 = vpop.eup %2149 }
 0x50d   :  { %885 = vrot.lane.b32.xlu0 %v2150_v42, %s2209_s23 }
 0x50e   :  { %v2152_v38 = vpop.eup %2151 }
 0x50f   :  { %887 = vrot.lane.b32.xlu1 %v2152_v38, %s2209_s23 }
 0x511   :  { %895 = vrot.lane.b32.xlu0 %v2418_v50, %s2210_s24 }
 0x513   :  { %897 = vrot.lane.b32.xlu1 %v2410_v48, %s2210_s24  ;;  %v2121_v48 = vld [vmem:[%s2948_s2 + $0x10] sm:$0xff]  }
 0x514   :  { %2073 = vmatprep.mubr.msk.bf16.mxu0 %vm926_vm15, %v2121_v48 }
 0x57f   :  { %v886_v44 = vpop.permute.xlu0 %885 }
 0x580   :  { %v891_v52 = vmul.f32 %v886_v44, %v881_v46 }
 0x581   :  { %v888_v45 = vpop.permute.xlu1 %887 }
 0x582   :  { %v892_v55 = vmul.f32 %v888_v45, %v882_v33 }
 0x583   :  { %v896_v13 = vpop.permute.xlu0 %895 }
 0x584   :  { %v901_v17 = vmul.f32 %v2146_v0, %v896_v13 }
 0x585   :  { %v898_v53 = vpop.permute.xlu1 %897 }
 0x586   :  { %v2636_v50 = vadd.f32 %v901_v17, %v891_v52  ;;  %v902_v56 = vmul.f32 %v2148_v31, %v898_v53 }
 0x588   :  { %v2641_v11 = vadd.f32 %v902_v56, %v892_v55  ;;  %vm905_vm9 = vcmp.ge.f32.partialorder %v2636_v50, 0.0  ;;  %v907_v57 = vmul.f32 0.01, %v2636_v50 }
 0x58a   :  { %v909_v3 = vsel %vm905_vm9, %v2636_v50, %v907_v57  ;;  %vm906_vm10 = vcmp.ge.f32.partialorder %v2641_v11, 0.0  ;;  %v908_v59 = vmul.f32 0.01, %v2641_v11 }
 0x58b   :  { %v911_v60 = vpack.c.bf16 %v909_v3, %v909_v3 }
 0x58c   :  { %v910_v61 = vsel %vm906_vm10, %v2641_v11, %v908_v59 }
 0x58d   :  { %924 = vrot.lane.b32.xlu0 %v911_v60, %s2209_s23  ;;  %v912_v29 = vpack.c.bf16 %v910_v61, %v910_v61 }
 0x58f   :  { %997 = vrot.lane.b32.xlu1 %v912_v29, %s2209_s23 }
 0x591   :  { %1088 = vrot.lane.b32.xlu0 %v1981_v1, %s2210_s24 }
 0x5ff   :  { %v925_v7 = vpop.permute.xlu0 %924 }
 0x600   :  { %v935_v22 = vsel %vm933_vm13, %v925_v7, 0  ;;  %2101 = vmatprep.subr.msk.bf16.mxu1 %vm933_vm13, %v925_v7 }
 0x601   :  { %2066 = vmatpush3.bf16.msra.mxu1 %v935_v22  ;;  %v998_v2 = vpop.permute.xlu1 %997 }
 0x602   :  { %v1006_v14 = vsel %vm933_vm13, %v998_v2, 0  ;;  %2102 = vmatprep.subr.msk.bf16.mxu0 %vm933_vm13, %v998_v2  ;;  %2077 = vmatprep.subr.bf16.mxu1 %v2206_v27 }
 0x603   :  { %v1089_v47 = vpop.permute.xlu0 %1088  ;;  %2072 = vmatpush3.bf16.msra.mxu0 %v1006_v14 }
 0x604   :  { %v1091_v10 = vmul.f32 %v1089_v47, %v909_v3  ;;  %v1092_v9 = vmul.f32 %v1089_v47, %v910_v61  ;;  %2068 = vmatmul.mubr.msk.bf16.vlgmr.msra.gmra.mrb[4].mxu1 %vm926_vm15, %v2120_v62  ;;  %2085 = vmatprep.subr.bf16.mxu0 %v2206_v27 }
 0x605   :  { %2081 = vmatprep.mubr.msk.bf16.mxu1 %vm2207_vm12, %v2206_v27 }
 0x606   :  { %1097 = vrot.lane.b32.xlu0 %v1092_v9, %s2209_s23  ;;  %1095 = vrot.lane.b32.xlu1 %v1091_v10, %s2209_s23 }
 0x607   :  { %2074 = vmatmul.mubr.msk.bf16.vlgmr.msra.gmra.mrb[8].mxu0 %vm926_vm15, %v2122_v36 }
 0x608   :  { %2089 = vmatprep.mubr.msk.bf16.mxu0 %vm2207_vm12, %v2206_v27 }
 0x678   :  { %v1096_v47 = vpop.permute.xlu1 %1095  ;;  %v1098_v10 = vpop.permute.xlu0 %1097 }
 0x679   :  { %v1101_v9 = vsel %vm90_vm1, %v1096_v47, 0.0 }
 0x6d7   :  { %v2675_v5 = vpop.f32.mrb[4].mxu1 }
 0x6d8   :  { %v2679_v16 = vcombine.high %v2675_v5, %v2675_v5  ;;  %v2681_v19 = vpop.f32.mrb[5].mxu1  ;;  %v1119_v21 = vmul.f32 %v2675_v5, %v1983_v35 }
 0x6d9   :  { %v2684_v23 = vpop.f32.mrb[6].mxu1  ;;  %v1115_v24 = vmul.f32 %v1983_v35, %v2681_v19  ;;  %v2709_v40 = vcombine.high %v2681_v19, %v2681_v19 }
 0x6da   :  { %v1143_v25 = vsel %vm120_vm0, %v1119_v21, 0.0  ;;  %v2688_v8 = vpop.f32.mrb[7].mxu1  ;;  %v2690_v26 = vpop.f32.mrb[8].mxu0  ;;  %v1120_v41 = vmul.f32 %v1983_v35, %v2679_v16  ;;  %v1121_v34 = vmul.f32 %v2684_v23, %v1983_v35  ;;  %v2729_v55 = vcombine.high %v2684_v23, %v2684_v23 }
 0x6db   :  { %1144 = vadd.xlane.f32.xlu0 %v1143_v25  ;;  %v1131_v18 = vsel %vm120_vm0, %v1115_v24, 0.0  ;;  %v2696_v28 = vcombine.high %v2690_v26, %v2690_v26  ;;  %v1127_v0 = vmul.f32 %v2690_v26, %v1983_v35  ;;  %v2699_v30 = vpop.f32.mrb[9].mxu0  ;;  %v1116_v46 = vmul.f32 %v1983_v35, %v2709_v40  ;;  %v1985_v24 = vld [vmem:[%s2953_s7 + $0x1] ss:$0 sm:$0xff] }
 0x6dc   :  { %1132 = vadd.xlane.f32.xlu1 %v1131_v18  ;;  %v2701_v31 = vpop.f32.mrb[10].mxu0  ;;  %v1146_v39 = vsel %vm120_vm0, %v1120_v41, 0.0  ;;  %v2715_v42 = vcombine.high %v2699_v30, %v2699_v30  ;;  %v1149_v45 = vsel %vm120_vm0, %v1121_v34, 0.0  ;;  %v1123_v4 = vmul.f32 %v1983_v35, %v2699_v30 }
 0x6dd   :  { %v1167_v43 = vsel %vm120_vm0, %v1127_v0, 0.0  ;;  %v1128_v32 = vmul.f32 %v1983_v35, %v2696_v28  ;;  %v2705_v37 = vpop.f32.mrb[11].mxu0  ;;  %v1129_v44 = vmul.f32 %v2701_v31, %v1983_v35  ;;  %v1134_v33 = vsel %vm120_vm0, %v1116_v46, 0.0 }
 0x6de   :  { %v1124_v52 = vmul.f32 %v1983_v35, %v2715_v42  ;;  %v1155_v17 = vsel %vm120_vm0, %v1123_v4, 0.0  ;;  %v1117_v56 = vmul.f32 %v1983_v35, %v2688_v8  ;;  %v2734_v48 = vcombine.high %v2705_v37, %v2705_v37 }
 0x6df   :  { %1147 = vadd.xlane.f32.xlu0 %v1146_v39  ;;  %v1170_v38 = vsel %vm120_vm0, %v1128_v32, 0.0  ;;  %v1173_v13 = vsel %vm120_vm0, %v1129_v44, 0.0  ;;  %v1125_v57 = vmul.f32 %v1983_v35, %v2705_v37  ;;  %v2739_v3 = vcombine.high %v2688_v8, %v2688_v8 }
 0x6e0   :  { %1168 = vadd.xlane.f32.xlu1 %v1167_v43  ;;  %v1158_v53 = vsel %vm120_vm0, %v1124_v52, 0.0  ;;  %v1137_v59 = vsel %vm120_vm0, %v1117_v56, 0.0  ;;  %v1122_v60 = vmul.f32 %v1983_v35, %v2729_v55  ;;  %v2745_v61 = vcombine.high %v2701_v31, %v2701_v31 }
 0x6e1   :  { %v1161_v29 = vsel %vm120_vm0, %v1125_v57, 0.0  ;;  %v1126_v1 = vmul.f32 %v1983_v35, %v2734_v48  ;;  %v1118_v22 = vmul.f32 %v1983_v35, %v2739_v3  ;;  %v1104_v21 = vsel %vm90_vm1, %v1098_v10, 0.0 }
 0x6e2   :  { %v1152_v7 = vsel %vm120_vm0, %v1122_v60, 0.0  ;;  %v1130_v2 = vmul.f32 %v1983_v35, %v2745_v61 }
 0x6e3   :  { %1150 = vadd.xlane.f32.xlu0 %v1149_v45  ;;  %v1164_v62 = vsel %vm120_vm0, %v1126_v1, 0.0  ;;  %v1140_v14 = vsel %vm120_vm0, %v1118_v22, 0.0 }
 0x6e4   :  { %1171 = vadd.xlane.f32.xlu1 %v1170_v38  ;;  %v1176_v36 = vsel %vm120_vm0, %v1130_v2, 0.0 }
 0x6e7   :  { %1135 = vadd.xlane.f32.xlu0 %v1134_v33 }
 0x6e8   :  { %1174 = vadd.xlane.f32.xlu1 %v1173_v13 }
 0x6eb   :  { %1156 = vadd.xlane.f32.xlu0 %v1155_v17 }
 0x6ec   :  { %1159 = vadd.xlane.f32.xlu1 %v1158_v53 }
 0x6ef   :  { %1138 = vadd.xlane.f32.xlu0 %v1137_v59 }
 0x6f0   :  { %1162 = vadd.xlane.f32.xlu1 %v1161_v29 }
 0x6f3   :  { %1153 = vadd.xlane.f32.xlu0 %v1152_v7 }
 0x6f4   :  { %1165 = vadd.xlane.f32.xlu1 %v1164_v62 }
 0x6f7   :  { %1141 = vadd.xlane.f32.xlu0 %v1140_v14 }
 0x6f8   :  { %1177 = vadd.xlane.f32.xlu1 %v1176_v36 }
 0x6fb   :  { %1102 = vadd.xlane.f32.xlu0 %v1101_v9 }
 0x6fc   :  { %1105 = vadd.xlane.f32.xlu1 %v1104_v21 }
 0x711   :  { %1285 = vperm.xlu0 %2112, %v1985_v24  }
 0x768   :  { %v1145_v35 = vpop.xlane.xlu0 %1144 }
 0x769   :  { %v1133_v25 = vpop.xlane.xlu1 %1132  ;;  %v1214_v36 = vrot.slane %v1145_v35, %v2432_v15 }
 0x76a   :  { %v1198_v59 = vrot.slane %v1133_v25, %v2432_v15 }
 0x76c   :  { %v1148_v41 = vpop.xlane.xlu0 %1147 }
 0x76d   :  { %v1169_v18 = vpop.xlane.xlu1 %1168  ;;  %v1218_v21 = vrot.slane %v1148_v41, %v2432_v15 }
 0x76e   :  { %v1246_v60 = vrot.slane %v1169_v18, %v2432_v15 }
 0x770   :  { %v1151_v0 = vpop.xlane.xlu0 %1150 }
 0x771   :  { %v1172_v43 = vpop.xlane.xlu1 %1171  ;;  %v1222_v18 = vrot.slane %v1151_v0, %v2432_v15 }
 0x772   :  { %v1250_v1 = vrot.slane %v1172_v43, %v2432_v15 }
 0x774   :  { %v1136_v32 = vpop.xlane.xlu0 %1135 }
 0x775   :  { %v1175_v39 = vpop.xlane.xlu1 %1174  ;;  %v1202_v33 = vrot.slane %v1136_v32, %v2432_v15 }
 0x776   :  { %v1254_v24 = vrot.slane %v1175_v39, %v2432_v15 }
 0x777   :  { %v1259_v62 = vsel %vm251_vm2, %v1202_v33, %v1198_v59 }
 0x778   :  { %v1157_v34 = vpop.xlane.xlu0 %1156 }
 0x779   :  { %v1160_v38 = vpop.xlane.xlu1 %1159  ;;  %v1230_v46 = vrot.slane %v1157_v34, %v2432_v15 }
 0x77a   :  { %v1234_v4 = vrot.slane %v1160_v38, %v2432_v15 }
 0x77c   :  { %v1139_v44 = vpop.xlane.xlu0 %1138  ;;  %v1266_v53 = vsel %vm251_vm2, %v1234_v4, %v1230_v46 }
 0x77d   :  { %v1163_v45 = vpop.xlane.xlu1 %1162  ;;  %v1206_v56 = vrot.slane %v1139_v44, %v2432_v15 }
 0x77e   :  { %v1238_v13 = vrot.slane %v1163_v45, %v2432_v15 }
 0x77f   :  { %v1260_v10 = vsel %vm253_vm3, %v1206_v56, %v1259_v62 }
 0x780   :  { %v1154_v52 = vpop.xlane.xlu0 %1153  ;;  %v1267_v29 = vsel %vm253_vm3, %v1238_v13, %v1266_v53 }
 0x781   :  { %v1166_v17 = vpop.xlane.xlu1 %1165  ;;  %v1226_v38 = vrot.slane %v1154_v52, %v2432_v15 }
 0x782   :  { %v1242_v57 = vrot.slane %v1166_v17, %v2432_v15 }
 0x784   :  { %v1268_v7 = vsel %vm255_vm4, %v1242_v57, %v1267_v29  ;;  %v1142_v22 = vpop.xlane.xlu0 %1141  ;;  %v2178_v29 = vld [vmem:[%s2949_s3 + $0x8] sm:$0xff] }
 0x785   :  { %v1269_v2 = vsel %vm257_vm5, %v1246_v60, %v1268_v7  ;;  %v1210_v14 = vrot.slane %v1142_v22, %v2432_v15  ;;  %v1178_v47 = vpop.xlane.xlu1 %1177 }
 0x786   :  { %v1270_v9 = vsel %vm259_vm6, %v1250_v1, %v1269_v2  ;;  %v1258_v32 = vrot.slane %v1178_v47, %v2432_v15  ;;  %v2177_v15 = vld [vmem:[%s2949_s3] sm:$0xff] }
 0x787   :  { %v1261_v25 = vsel %vm255_vm4, %v1210_v14, %v1260_v10  ;;  %v1271_v35 = vsel %vm261_vm7, %v1254_v24, %v1270_v9 }
 0x788   :  { %v1262_v43 = vsel %vm257_vm5, %v1214_v36, %v1261_v25  ;;  %v1103_v45 = vpop.xlane.xlu0 %1102  ;;  %v1272_v39 = vsel %vm263_vm8, %v1258_v32, %v1271_v35 }
 0x789   :  { %v1263_v34 = vsel %vm259_vm6, %v1218_v21, %v1262_v43  ;;  %v1106_v46 = vpop.xlane.xlu1 %1105 }
 0x78a   :  { %v1264_v44 = vsel %vm261_vm7, %v1222_v18, %v1263_v34  ;;  %v1276_v0 = vadd.f32 %v1272_v39, %v1106_v46  ;;  %v2179_v34 = vld [vmem:[%s2950_s4] sm:$0xff]  ;;  %v2180_v39 = vld [vmem:[%s2950_s4 + $0x8] sm:$0xff] }
 0x78b   :  { %v1265_v41 = vsel %vm263_vm8, %v1226_v38, %v1264_v44 }
 0x78c   :  { %v1275_v4 = vadd.f32 %v1265_v41, %v1103_v45 }
 0x790   :  { %v1286_v13 = vpop.permute.xlu0 %1285 }
 0x791   :  { %v1288_v33 = vadd.f32 %v1286_v13, %v1275_v4  ;;  %v1289_v17 = vadd.f32 %v1286_v13, %v1276_v0 }
 0x793   :  { %v1292_v53 = vmul.f32 0.01, %v1288_v33  ;;  %v1293_v56 = vmul.f32 0.01, %v1289_v17  ;;  %vm1290_vm14 = vcmp.ge.f32.partialorder %v1288_v33, 0.0  ;;  %vm1291_vm15 = vcmp.ge.f32.partialorder %v1289_v17, 0.0 }
 0x795   :  { %v1294_v57 = vsel %vm1290_vm14, %v1288_v33, %v1292_v53  ;;  %v1295_v59 = vsel %vm1291_vm15, %v1289_v17, %v1293_v56 }
 0x796   :  { %v1296_v52 = vadd.f32 %v2177_v15, %v1294_v57  ;;  %v1297_v1 = vadd.f32 %v2178_v29, %v1295_v59 }
 0x798   :  { %v1298_v60 = vsel %vm296_vm11, %v1296_v52, -inf  ;;  %v1301_v7 = vsel %vm296_vm11, %v1297_v1, -inf }
 0x799   :  { %1299 = vmax.xlane.f32.xlu1 %v1298_v60 }
 0x79d   :  { %1302 = vmax.xlane.f32.xlu1 %v1301_v7 }
 0x826   :  { %v1300_v22 = vpop.xlane.xlu1 %1299 }
 0x827   :  { %v1304_v62 = vsub.f32 %v1296_v52, %v1300_v22 }
 0x829   :  { %v1306_v2 = vmul.f32 1.442695, %v1304_v62 }
 0x82a   :  { %v1303_v14 = vpop.xlane.xlu1 %1302 }
 0x82b   :  { %2153 = vpow2.f32 %v1306_v2  ;;  %v1305_v47 = vsub.f32 %v1297_v1, %v1303_v14 }
 0x82d   :  { %v1308_v36 = vmul.f32 1.442695, %v1305_v47 }
 0x82f   :  { %2155 = vpow2.f32 %v1308_v36 }
 0x835   :  { %v2154_v10 = vpop.eup %2153 }
 0x836   :  { %v1310_v9 = vsel %vm296_vm11, %v2154_v10, 0.0 }
 0x837   :  { %1311 = vadd.xlane.f32.xlu1 %v1310_v9 }
 0x839   :  { %v2156_v21 = vpop.eup %2155 }
 0x83a   :  { %v1313_v24 = vsel %vm296_vm11, %v2156_v21, 0.0 }
 0x83b   :  { %1314 = vadd.xlane.f32.xlu1 %v1313_v24 }
 0x8c4   :  { %v1312_v25 = vpop.xlane.xlu1 %1311 }
 0x8c5   :  { %2157 = vrcp.f32 %v1312_v25 }
 0x8c8   :  { %v1315_v18 = vpop.xlane.xlu1 %1314 }
 0x8c9   :  { %2159 = vrcp.f32 %v1315_v18 }
 0x8cf   :  { %v2158_v43 = vpop.eup %2157 }
 0x8d0   :  { %v1317_v32 = vmul.f32 %v2158_v43, %v2154_v10 }
 0x8d2   :  { %v1320_v35 = vmul.f32 %v2179_v34, %v1317_v32 }
 0x8d3   :  { %v2160_v38 = vpop.eup %2159 }
 0x8d4   :  { %v1319_v44 = vmul.f32 %v2160_v38, %v2156_v21  ;;  %v1332_v45 = vrot.slane %v1320_v35, %v2489_v58  ;;  %v1325_v41 = vrot.slane %v1320_v35, %v2481_v51  ;;  %v1339_v4 = vrot.slane %v1320_v35, %v2478_v49 }
 0x8d5   :  { %v1346_v13 = vrot.slane %v1320_v35, %v2484_v54  ;;  %v1353_v17 = vrot.slane %v1320_v35, %v2497_v63  ;;  %v1360_v56 = vrot.slane %v1320_v35, %v2502_v6  ;;  %v1374_v52 = vrot.slane %v1320_v35, %v2512_v20 }
 0x8d6   :  { %v1321_v46 = vmul.f32 %v2180_v39, %v1319_v44  ;;  %1334 = vbcast.lane.b32.xlu0 %v1332_v45, 256  ;;  %1327 = vbcast.lane.b32.xlu1 %v1325_v41, 256 }
 0x8d8   :  { %v1395_v0 = vrot.slane %v1321_v46, %v2478_v49  ;;  %v1402_v33 = vrot.slane %v1321_v46, %v2484_v54  ;;  %v1409_v53 = vrot.slane %v1321_v46, %v2497_v63  ;;  %v1416_v57 = vrot.slane %v1321_v46, %v2502_v6  ;;  %v2123_v6 = vld [vmem:[%s2954_s8 + $0x10] sm:$0xff]  }
 0x8d9   :  { %v1423_v49 = vrot.slane %v1321_v46, %v2507_v12  ;;  %v1381_v59 = vrot.slane %v1321_v46, %v2481_v51  ;;  %v1430_v54 = vrot.slane %v1321_v46, %v2512_v20  ;;  %v1388_v15 = vrot.slane %v1321_v46, %v2489_v58  ;;  %2078 = vmatpush3.bf16.msra.mxu1 %v2123_v6  ;;  %v2124_v51 = vld [vmem:[%s2954_s8 + $0x18] sm:$0xff]  }
 0x8da   :  { %1341 = vbcast.lane.b32.xlu0 %v1339_v4, 256  ;;  %1397 = vbcast.lane.b32.xlu1 %v1395_v0, 256  ;;  %v1367_v63 = vrot.slane %v1320_v35, %v2507_v12  ;;  %v1565_v58 = vsel %vm296_vm11, %v1321_v46, 0.0  ;;  %v1562_v12 = vsel %vm296_vm11, %v1320_v35, 0.0  ;;  %v1782_v20 = vpack.c.bf16 %v2641_v11, %v2636_v50 }
 0x8db   :  { %2079 = vmatprep.subr.bf16.mxu1 %v2206_v27 }
 0x8dd   :  { %2080 = vmatpush3.bf16.msra.mxu1 %v2124_v51 }
 0x8de   :  { %1348 = vbcast.lane.b32.xlu0 %v1346_v13, 256  ;;  %1404 = vbcast.lane.b32.xlu1 %v1402_v33, 256 }
 0x8df   :  { %2093 = vmatprep.subr.bf16.mxu1 %v2206_v27 }
 0x8e2   :  { %1355 = vbcast.lane.b32.xlu0 %v1353_v17, 256  ;;  %1411 = vbcast.lane.b32.xlu1 %v1409_v53, 256 }
 0x8e6   :  { %1362 = vbcast.lane.b32.xlu0 %v1360_v56, 256  ;;  %1418 = vbcast.lane.b32.xlu1 %v1416_v57, 256 }
 0x8ea   :  { %1425 = vbcast.lane.b32.xlu1 %v1423_v49, 256  ;;  %1383 = vbcast.lane.b32.xlu0 %v1381_v59, 256 }
 0x8ee   :  { %1432 = vbcast.lane.b32.xlu1 %v1430_v54, 256  ;;  %1390 = vbcast.lane.b32.xlu0 %v1388_v15, 256 }
 0x8f2   :  { %1369 = vbcast.lane.b32.xlu0 %v1367_v63, 256 }
 0x8f6   :  { %1376 = vbcast.lane.b32.xlu0 %v1374_v52, 256 }
 0x912   :  { %1566 = vadd.xlane.f32.xlu1 %v1565_v58 }
 0x915   :  { %1563 = vadd.xlane.f32.xlu0 %v1562_v12 }
 0x92b   :  { %1797 = vrot.lane.b32.xlu0 %v1782_v20, %s2209_s23 }
 0x948   :  { %v1335_v60 = vpop.permute.xlu0 %1334  ;;  %v1328_v29 = vpop.permute.xlu1 %1327 }
 0x949   :  { %v1435_v1 = vmul.f32 %v1335_v60, %v2709_v40  ;;  %v1434_v7 = vmul.f32 %v1328_v29, %v2681_v19 }
 0x94b   :  { %v1457_v22 = vsel %vm120_vm0, %v1435_v1, 0.0  ;;  %v1450_v62 = vsel %vm120_vm0, %v1434_v7, 0.0 }
 0x94c   :  { %v1458_v2 = vrot.slane %v1457_v22, 4  ;;  %v1451_v14 = vrot.slane %v1450_v62, 4  ;;  %v1342_v47 = vpop.permute.xlu0 %1341  ;;  %v1398_v36 = vpop.permute.xlu1 %1397 }
 0x94d   :  { %v1436_v10 = vmul.f32 %v1342_v47, %v2688_v8  ;;  %v1444_v44 = vmul.f32 %v1398_v36, %v2705_v37 }
 0x94e   :  { %v1459_v9 = vadd.f32 %v1458_v2, %v1457_v22  ;;  %v1452_v21 = vadd.f32 %v1451_v14, %v1450_v62 }
 0x94f   :  { %v1464_v24 = vsel %vm120_vm0, %v1436_v10, 0.0  ;;  %v1520_v57 = vsel %vm120_vm0, %v1444_v44, 0.0 }
 0x950   :  { %v1460_v25 = vrot.slane %v1459_v9, 2  ;;  %v1453_v18 = vrot.slane %v1452_v21, 2  ;;  %v1465_v43 = vrot.slane %v1464_v24, 4  ;;  %v1349_v40 = vpop.permute.xlu0 %1348  ;;  %v1405_v32 = vpop.permute.xlu1 %1404 }
 0x951   :  { %v1437_v19 = vmul.f32 %v1349_v40, %v2739_v3  ;;  %v1445_v8 = vmul.f32 %v1405_v32, %v2734_v48 }
 0x952   :  { %v1461_v34 = vadd.f32 %v1460_v25, %v1459_v9  ;;  %v1454_v35 = vadd.f32 %v1453_v18, %v1452_v21  ;;  %v1466_v38 = vadd.f32 %v1465_v43, %v1464_v24 }
 0x953   :  { %v1471_v45 = vsel %vm120_vm0, %v1437_v19, 0.0  ;;  %v1527_v49 = vsel %vm120_vm0, %v1445_v8, 0.0 }
 0x954   :  { %v1462_v41 = vrot.slane %v1461_v34, 1  ;;  %v1455_v39 = vrot.slane %v1454_v35, 1  ;;  %v1467_v46 = vrot.slane %v1466_v38, 2  ;;  %v1356_v4 = vpop.permute.xlu0 %1355  ;;  %v1412_v0 = vpop.permute.xlu1 %1411  ;;  %v1472_v13 = vrot.slane %v1471_v45, 4 }
 0x955   :  { %v1438_v33 = vmul.f32 %v2675_v5, %v1356_v4  ;;  %v1446_v17 = vmul.f32 %v2690_v26, %v1412_v0  ;;  %v1521_v5 = vrot.slane %v1520_v57, 4  ;;  %v1528_v12 = vrot.slane %v1527_v49, 4 }
 0x956   :  { %v1463_v3 = vadd.f32 %v1462_v41, %v1461_v34  ;;  %v1456_v53 = vadd.f32 %v1455_v39, %v1454_v35  ;;  %v1468_v56 = vadd.f32 %v1467_v46, %v1466_v38  ;;  %v1473_v37 = vadd.f32 %v1472_v13, %v1471_v45 }
 0x957   :  { %v1478_v48 = vsel %vm120_vm0, %v1438_v33, 0.0  ;;  %v1534_v59 = vsel %vm120_vm0, %v1446_v17, 0.0  ;;  %v1522_v14 = vadd.f32 %v1521_v5, %v1520_v57  ;;  %v1529_v9 = vadd.f32 %v1528_v12, %v1527_v49 }
 0x958   :  { %v1569_v54 = vpack.c.bf16 %v1463_v3, %v1463_v3  ;;  %v1568_v15 = vpack.c.bf16 %v1456_v53, %v1456_v53  ;;  %v1469_v63 = vrot.slane %v1468_v56, 1  ;;  %v1363_v52 = vpop.permute.xlu0 %1362  ;;  %v1419_v6 = vpop.permute.xlu1 %1418  ;;  %v1474_v51 = vrot.slane %v1473_v37, 2 }
 0x959   :  { %v1479_v26 = vrot.slane %v1478_v48, 4  ;;  %v1535_v20 = vrot.slane %v1534_v59, 4  ;;  %v1439_v62 = vmul.f32 %v1363_v52, %v2679_v16  ;;  %v1447_v24 = vmul.f32 %v1419_v6, %v2696_v28 }
 0x95a   :  { %v1470_v58 = vadd.f32 %v1469_v63, %v1468_v56  ;;  %v1616_v60 = vunpack.c.l.b16 %v1569_v54  ;;  %v1615_v29 = vunpack.c.l.b16 %v1568_v15  ;;  %v1475_v1 = vadd.f32 %v1474_v51, %v1473_v37 }
 0x95b   :  { %v1480_v7 = vadd.f32 %v1479_v26, %v1478_v48  ;;  %v1485_v21 = vsel %vm120_vm0, %v1439_v62, 0.0  ;;  %v1536_v32 = vadd.f32 %v1535_v20, %v1534_v59  ;;  %v1541_v16 = vsel %vm120_vm0, %v1447_v24, 0.0 }
 0x95c   :  { %v1570_v22 = vpack.c.bf16 %v1470_v58, %v1470_v58  ;;  %v1384_v2 = vpop.permute.xlu0 %1383  ;;  %v1476_v47 = vrot.slane %v1475_v1, 1  ;;  %v1426_v25 = vpop.permute.xlu1 %1425  ;;  %v1631_v18 = vsel %vm251_vm2, %v1616_v60, %v1615_v29  ;;  %v1486_v34 = vrot.slane %v1485_v21, 4 }
 0x95d   :  { %v1481_v36 = vrot.slane %v1480_v7, 2  ;;  %v1442_v35 = vmul.f32 %v1384_v2, %v2699_v30  ;;  %v1523_v44 = vrot.slane %v1522_v14, 2  ;;  %v1542_v39 = vrot.slane %v1541_v16, 4 }
 0x95e   :  { %v1617_v10 = vunpack.c.l.b16 %v1570_v22  ;;  %v1477_v43 = vadd.f32 %v1476_v47, %v1475_v1  ;;  %v1487_v41 = vadd.f32 %v1486_v34, %v1485_v21  ;;  %v1448_v46 = vmul.f32 %v2701_v31, %v1426_v25 }
 0x95f   :  { %v1482_v40 = vadd.f32 %v1481_v36, %v1480_v7  ;;  %v1506_v28 = vsel %vm120_vm0, %v1442_v35, 0.0  ;;  %v1530_v4 = vrot.slane %v1529_v9, 2  ;;  %v1537_v13 = vrot.slane %v1536_v32, 2 }
 0x960   :  { %v1632_v19 = vsel %vm253_vm3, %v1617_v10, %v1631_v18  ;;  %v1391_v38 = vpop.permute.xlu0 %1390  ;;  %v1571_v45 = vpack.c.bf16 %v1477_v43, %v1477_v43  ;;  %v1543_v17 = vadd.f32 %v1542_v39, %v1541_v16  ;;  %v1507_v3 = vrot.slane %v1506_v28, 4  ;;  %v1433_v56 = vpop.permute.xlu1 %1432 }
 0x961   :  { %v1483_v8 = vrot.slane %v1482_v40, 1  ;;  %v1548_v53 = vsel %vm120_vm0, %v1448_v46, 0.0  ;;  %v1524_v57 = vadd.f32 %v1523_v44, %v1522_v14  ;;  %v1488_v48 = vrot.slane %v1487_v41, 2 }
 0x962   :  { %v1618_v33 = vunpack.c.l.b16 %v1571_v45  ;;  %v1549_v49 = vrot.slane %v1548_v53, 4  ;;  %v1544_v59 = vrot.slane %v1543_v17, 2  ;;  %v1508_v54 = vadd.f32 %v1507_v3, %v1506_v28 }
 0x963   :  { %v1484_v0 = vadd.f32 %v1483_v8, %v1482_v40  ;;  %v1443_v15 = vmul.f32 %v1391_v38, %v2715_v42  ;;  %v1531_v63 = vadd.f32 %v1530_v4, %v1529_v9  ;;  %v1449_v6 = vmul.f32 %v1433_v56, %v2745_v61 }
 0x964   :  { %v1370_v30 = vpop.permute.xlu0 %1369  ;;  %v1550_v52 = vadd.f32 %v1549_v49, %v1548_v53  ;;  %v1633_v5 = vsel %vm255_vm4, %v1618_v33, %v1632_v19  ;;  %v1538_v51 = vadd.f32 %v1537_v13, %v1536_v32  ;;  %v1509_v26 = vrot.slane %v1508_v54, 2 }
 0x965   :  { %v1572_v37 = vpack.c.bf16 %v1484_v0, %v1484_v0  ;;  %v1513_v58 = vsel %vm120_vm0, %v1443_v15, 0.0  ;;  %v1555_v1 = vsel %vm120_vm0, %v1449_v6, 0.0  ;;  %v1489_v42 = vadd.f32 %v1488_v48, %v1487_v41 }
 0x966   :  { %v1551_v60 = vrot.slane %v1550_v52, 2  ;;  %v1514_v29 = vrot.slane %v1513_v58, 4  ;;  %v1545_v7 = vadd.f32 %v1544_v59, %v1543_v17  ;;  %v1510_v22 = vadd.f32 %v1509_v26, %v1508_v54 }
 0x967   :  { %v1619_v31 = vunpack.c.l.b16 %v1572_v37  ;;  %v1556_v62 = vrot.slane %v1555_v1, 4  ;;  %v1440_v61 = vmul.f32 %v2684_v23, %v1370_v30  ;;  %v1525_v47 = vrot.slane %v1524_v57, 1 }
 0x968   :  { %v1377_v12 = vpop.permute.xlu0 %1376  ;;  %v1515_v2 = vadd.f32 %v1514_v29, %v1513_v58  ;;  %v1511_v36 = vrot.slane %v1510_v22, 1  ;;  %v1552_v10 = vadd.f32 %v1551_v60, %v1550_v52  ;;  %v1532_v21 = vrot.slane %v1531_v63, 1 }
 0x969   :  { %v2866_v20 = vsel %vm257_vm5, %v1619_v31, %v1633_v5  ;;  %v1441_v14 = vmul.f32 %v1377_v12, %v2729_v55  ;;  %v1557_v9 = vadd.f32 %v1556_v62, %v1555_v1  ;;  %v1492_v25 = vsel %vm120_vm0, %v1440_v61, 0.0 }
 0x96a   :  { %v1516_v24 = vrot.slane %v1515_v2, 2  ;;  %v1539_v43 = vrot.slane %v1538_v51, 1  ;;  %v1490_v40 = vrot.slane %v1489_v42, 1  ;;  %v1546_v32 = vrot.slane %v1545_v7, 1 }
 0x96b   :  { %v1499_v18 = vsel %vm120_vm0, %v1441_v14, 0.0  ;;  %v1558_v19 = vrot.slane %v1557_v9, 2  ;;  %v1512_v34 = vadd.f32 %v1511_v36, %v1510_v22  ;;  %v1493_v35 = vrot.slane %v1492_v25, 4 }
 0x96c   :  { %v1517_v16 = vadd.f32 %v1516_v24, %v1515_v2  ;;  %v1500_v23 = vrot.slane %v1499_v18, 4  ;;  %v1526_v38 = vadd.f32 %v1525_v47, %v1524_v57  ;;  %v1553_v55 = vrot.slane %v1552_v10, 1 }
 0x96d   :  { %v1559_v44 = vadd.f32 %v1558_v19, %v1557_v9  ;;  %v1533_v45 = vadd.f32 %v1532_v21, %v1531_v63  ;;  %v1494_v41 = vadd.f32 %v1493_v35, %v1492_v25  ;;  %v1540_v28 = vadd.f32 %v1539_v43, %v1538_v51  ;;  %v2127_v35 = vld [vmem:[%s2956_s10 + $0x10] sm:$0xff]  }
 0x96e   :  { %v1518_v8 = vrot.slane %v1517_v16, 1  ;;  %v1501_v39 = vadd.f32 %v1500_v23, %v1499_v18  ;;  %v1491_v46 = vadd.f32 %v1490_v40, %v1489_v42  ;;  %v1547_v4 = vadd.f32 %v1546_v32, %v1545_v7  ;;  %v2125_v32 = vld [vmem:[%s2957_s11 + $0x10] sm:$0xff]   ;;  %2086 = vmatpush3.bf16.msra.mxu0 %v2127_v35  ;;  %v2128_v23 = vld [vmem:[%s2956_s10 + $0x18] sm:$0xff]  }
 0x96f   :  { %v1560_v0 = vrot.slane %v1559_v44, 1  ;;  %v1576_v13 = vpack.c.bf16 %v1512_v34, %v1512_v34  ;;  %v1495_v17 = vrot.slane %v1494_v41, 2  ;;  %v1578_v53 = vpack.c.bf16 %v1526_v38, %v1526_v38  ;;  %2087 = vmatprep.subr.bf16.mxu0 %v2206_v27  ;;  %v1991_v38 = vld [vmem:[%s2955_s9 + $0x1] ss:$0 sm:$0xff] }
 0x970   :  { %v1519_v33 = vadd.f32 %v1518_v8, %v1517_v16  ;;  %v1502_v3 = vrot.slane %v1501_v39, 2  ;;  %v1554_v56 = vadd.f32 %v1553_v55, %v1552_v10  ;;  %v1579_v30 = vpack.c.bf16 %v1533_v45, %v1533_v45 }
 0x971   :  { %v1496_v49 = vadd.f32 %v1495_v17, %v1494_v41  ;;  %v1580_v48 = vpack.c.bf16 %v1540_v28, %v1540_v28  ;;  %v1573_v59 = vpack.c.bf16 %v1491_v46, %v1491_v46  ;;  %v1581_v54 = vpack.c.bf16 %v1547_v4, %v1547_v4 }
 0x972   :  { %v1577_v37 = vpack.c.bf16 %v1519_v33, %v1519_v33  ;;  %v1503_v57 = vadd.f32 %v1502_v3, %v1501_v39  ;;  %v1561_v15 = vadd.f32 %v1560_v0, %v1559_v44  ;;  %v1623_v63 = vunpack.c.l.b16 %v1576_v13  ;;  %2088 = vmatpush3.bf16.msra.mxu0 %v2128_v23 }
 0x973   :  { %v1497_v52 = vrot.slane %v1496_v49, 1  ;;  %v1625_v5 = vunpack.c.l.b16 %v1578_v53  ;;  %v1582_v51 = vpack.c.bf16 %v1554_v56, %v1554_v56  ;;  %v1626_v26 = vunpack.c.l.b16 %v1579_v30 }
 0x974   :  { %v1624_v31 = vunpack.c.l.b16 %v1577_v37  ;;  %v1504_v6 = vrot.slane %v1503_v57, 1  ;;  %v1627_v29 = vunpack.c.l.b16 %v1580_v48  ;;  %v1620_v1 = vunpack.c.l.b16 %v1573_v59  ;;  %v2011_v37 = vld [vmem:[%s2959_s13 + $0x1] ss:$0 sm:$0xff] }
 0x975   :  { %v1498_v12 = vadd.f32 %v1497_v52, %v1496_v49  ;;  %v1583_v7 = vpack.c.bf16 %v1561_v15, %v1561_v15  ;;  %v1628_v22 = vunpack.c.l.b16 %v1581_v54  ;;  %v1629_v14 = vunpack.c.l.b16 %v1582_v51 }
 0x976   :  { %v1638_v58 = vsel %vm251_vm2, %v1624_v31, %v1623_v63  ;;  %v1505_v60 = vadd.f32 %v1504_v6, %v1503_v57  ;;  %v1635_v21 = vsel %vm259_vm6, %v1620_v1, %v2866_v20  ;;  %v2126_v20 = vld [vmem:[%s2957_s11 + $0x18] sm:$0xff]   ;;  %v2002_v63 = vld [vmem:[%s2958_s12 + $0x1] ss:$0 sm:$0xff]  ;;  %s2211_s12 = smov [#allocation2]  }
 0x977   :  { %v1639_v42 = vsel %vm253_vm3, %v1625_v5, %v1638_v58  ;;  %v1574_v2 = vpack.c.bf16 %v1498_v12, %v1498_v12  ;;  %v1630_v24 = vunpack.c.l.b16 %v1583_v7  ;;  %s1938_s13 = sshll.u32 %s2211_s12, 4  ;;  %s1939_s13 = int_to_ptr.vmem [resolvable:$true] %s1938_s13 }
 0x978   :  { %v1640_v62 = vsel %vm255_vm4, %v1626_v26, %v1639_v42  ;;  %v1575_v61 = vpack.c.bf16 %v1505_v60, %v1505_v60  ;;  %p2186_p1 = scmp.lt.s32.totalorder %s1939_s13, %s1939_s13 }
 0x979   :  { %v1641_v47 = vsel %vm257_vm5, %v1627_v29, %v1640_v62  ;;  %v1621_v36 = vunpack.c.l.b16 %v1574_v2 }
 0x97a   :  { %v1622_v10 = vunpack.c.l.b16 %v1575_v61  ;;  %v1642_v9 = vsel %vm259_vm6, %v1628_v22, %v1641_v47 }
 0x97b   :  { %v1643_v25 = vsel %vm261_vm7, %v1629_v14, %v1642_v9  ;;  %v1636_v18 = vsel %vm261_vm7, %v1621_v36, %v1635_v21 }
 0x97c   :  { %v1637_v43 = vsel %vm263_vm8, %v1622_v10, %v1636_v18  ;;  %v1644_v40 = vsel %vm263_vm8, %v1630_v24, %v1643_v25 }
 0x97d   :  { %v1645_v19 = vpack.c.b16 %v1644_v40, %v1637_v43 }
 0x97f   :  { %2082 = vmatmul.mubr.msk.bf16.vlgmr.msra.gmra.mrb[8].mxu1 %vm90_vm1, %v1645_v19 }
 0x980   :  { %2094 = vmatpush3.bf16.msra.mxu1 %v2125_v32  ;;  %2097 = vmatprep.mubr.msk.bf16.mxu1 %vm2207_vm12, %v2206_v27 }
 0x981   :  { %2095 = vmatprep.subr.bf16.mxu1 %v2206_v27 }
 0x984   :  { %2096 = vmatpush3.bf16.msra.mxu1 %v2126_v20 }
 0x99f   :  { %v1567_v55 = vpop.xlane.xlu1 %1566 }
 0x9a0   :  { %v1598_v8 = vmul.f32 %v1991_v38, %v1567_v55 }
 0x9a2   :  { %v1564_v34 = vpop.xlane.xlu0 %1563 }
 0x9a3   :  { %v1597_v44 = vmul.f32 %v1991_v38, %v1564_v34 }
 0x9a6   :  { %v1798_v16 = vpop.permute.xlu0 %1797 }
 0x9a7   :  { %2098 = vmatmul.mubr.msk.bf16.vlgmr.msra.gmra.mrb[12].mxu1 %vm90_vm1, %v1798_v16 }
 0xa52   :  { %v1695_v45 = vpop.f32.mrb[8].mxu1 }
 0xa53   :  { %v1696_v41 = vadd.f32 %v1695_v45, %v1597_v44  ;;  %v2083_v39 = vpop.f32.mrb[9].mxu1 }
 0xa54   :  { %v1698_v28 = vpop.f32.mrb[10].mxu1 }
 0xa55   :  { %v1704_v46 = vmul.f32 1.442695, %v1696_v41  ;;  %v1699_v4 = vadd.f32 %v1698_v28, %v1598_v8  ;;  %v2084_v0 = vpop.f32.mrb[11].mxu1  ;;  %vm1702_vm0 = vcmp.gt.f32.partialorder %v1696_v41, 0.0 }
 0xa57   :  { %2161 = vpow2.f32 %v1704_v46  ;;  %v1706_v13 = vmul.f32 1.442695, %v1699_v4  ;;  %vm1703_vm2 = vcmp.gt.f32.partialorder %v1699_v4, 0.0 }
 0xa59   :  { %2163 = vpow2.f32 %v1706_v13 }
 0xa61   :  { %v2162_v33 = vpop.eup %2161 }
 0xa62   :  { %v1995_v27 = vadd.f32 -1.0, %v2162_v33 }
 0xa63   :  { %v2164_v17 = vpop.eup %2163 }
 0xa64   :  { %v1996_v3 = vadd.f32 -1.0, %v2164_v17  ;;  %v1710_v53 = vsel %vm1702_vm0, %v1696_v41, %v1995_v27 }
 0xa66   :  { %v1711_v56 = vsel %vm1703_vm2, %v1699_v4, %v1996_v3 }
 0xa67   :  { %v1712_v30 = vpack.c.bf16 %v1711_v56, %v1710_v53 }
 0xa69   :  { %2090 = vmatmul.mubr.msk.bf16.vlgmr.msra.gmra.mrb[12].mxu0 %vm90_vm1, %v1712_v30 }
 0xa7a   :  { %v1848_v49 = vpop.f32.mrb[12].mxu1 }
 0xa7b   :  { %v1849_v57 = vadd.f32 %v2011_v37, %v1848_v49  ;;  %v2099_v48 = vpop.f32.mrb[13].mxu1 }
 0xa7c   :  { %v1851_v59 = vpop.f32.mrb[14].mxu1 }
 0xa7d   :  { %v1852_v54 = vadd.f32 %v2011_v37, %v1851_v59  ;;  %1871 = vrot.lane.b32.xlu1 %v1849_v57, %s2208_s20  ;;  %v2100_v15 = vpop.f32.mrb[15].mxu1 }
 0xa7f   :  { %1873 = vrot.lane.b32.xlu0 %v1852_v54, %s2208_s20 }
 0xaef   :  { %v1872_v2 = vpop.permute.xlu1 %1871 }
 0xaf1   :  { %v1874_v47 = vpop.permute.xlu0 %1873 }
 0xb3c   :  { %v1775_v31 = vpop.f32.mrb[12].mxu0 }
 0xb3d   :  { %v1776_v52 = vadd.f32 %v2002_v63, %v1775_v31  ;;  %v2091_v6 = vpop.f32.mrb[13].mxu0 }
 0xb3e   :  { %v1778_v5 = vpop.f32.mrb[14].mxu0 }
 0xb3f   :  { %v1855_v51 = vadd.f32 %v1849_v57, %v1776_v52  ;;  %v1779_v26 = vadd.f32 %v2002_v63, %v1778_v5  ;;  %v2092_v58 = vpop.f32.mrb[15].mxu0 }
 0xb41   :  { %v2015_v12 = vmul.f32 -1.442695, %v1855_v51  ;;  %v1856_v60 = vadd.f32 %v1852_v54, %v1779_v26 }
 0xb43   :  { %2165 = vpow2.f32 %v2015_v12  ;;  %v2016_v29 = vmul.f32 -1.442695, %v1856_v60 }
 0xb45   :  { %2167 = vpow2.f32 %v2016_v29 }
 0xb4d   :  { %v2166_v1 = vpop.eup %2165 }
 0xb4e   :  { %v1863_v42 = vadd.f32 1.0, %v2166_v1 }
 0xb4f   :  { %v2168_v7 = vpop.eup %2167 }
 0xb50   :  { %2169 = vrcp.f32 %v1863_v42  ;;  %v1864_v22 = vadd.f32 1.0, %v2168_v7 }
 0xb52   :  { %2171 = vrcp.f32 %v1864_v22 }
 0xb5a   :  { %v2170_v62 = vpop.eup %2169 }
 0xb5b   :  { %v1877_v61 = vmul.f32 %v2170_v62, %v1872_v2  ;;  %v1891_v43 = vsub.f32 1.0, %v2170_v62  ;;  %v1903_v32 = vmul.f32 %v2170_v62, %v2636_v50 }
 0xb5c   :  { %v2172_v14 = vpop.eup %2171 }
 0xb5d   :  { %1881 = vrot.lane.b32.xlu1 %v1877_v61, %s2208_s20  ;;  %v1878_v36 = vmul.f32 %v2172_v14, %v1874_v47  ;;  %v1892_v20 = vsub.f32 1.0, %v2172_v14  ;;  %v1904_v35 = vmul.f32 %v2172_v14, %v2641_v11 }
 0xb5f   :  { %1883 = vrot.lane.b32.xlu0 %v1878_v36, %s2208_s20  ;;  %s2181_s20 = scalar_lea.vmem %s1939_s13, 256 }
 0xb60   :  { %p2182_p0 = scmp.ne.s32.totalorder %s1939_s13, %s2181_s20  ;;  %p2187_p2 = scmp.lt.s32.totalorder %s2181_s20, %s2181_s20 }
 0xb62   :  { %p2188_p3 = por %p2187_p2, %p2186_p1 }
 0xb64   :  { %p2189_p4 = pnand %p2188_p3, %p2182_p0 }
 0xbcf   :  { %v1882_v10 = vpop.permute.xlu1 %1881 }
 0xbd0   :  { %v1887_v9 = vadd.f32 %v1882_v10, %v1776_v52 }
 0xbd1   :  { %v1884_v21 = vpop.permute.xlu0 %1883 }
 0xbd2   :  { %2173 = vtanh.f32 %v1887_v9  ;;  %v1888_v24 = vadd.f32 %v1884_v21, %v1779_v26 }
 0xbd4   :  { %2175 = vtanh.f32 %v1888_v24 }
 0xbdc   :  { %v2174_v25 = vpop.eup %2173 }
 0xbdd   :  { %1895 = vrot.lane.b32.xlu1 %v2174_v25, %s2209_s23 }
 0xbde   :  { %v2176_v18 = vpop.eup %2175 }
 0xbdf   :  { %1897 = vrot.lane.b32.xlu0 %v2176_v18, %s2209_s23 }
 0xc4f   :  { %v1896_v40 = vpop.permute.xlu1 %1895 }
 0xc50   :  { %v1901_v19 = vmul.f32 %v1896_v40, %v1891_v43 }
 0xc51   :  { %v1898_v34 = vpop.permute.xlu0 %1897 }
 0xc52   :  { %v1905_v16 = vadd.f32 %v1903_v32, %v1901_v19  ;;  %v1902_v23 = vmul.f32 %v1898_v34, %v1892_v20 }
 0xc54   :  { %v1906_v38 = vadd.f32 %v1904_v35, %v1902_v23  ;;  %1909 = vrot.lane.b32.xlu1 %v1905_v16, %s2209_s23  ;;  %vm1917_vm3 = vcmp.ge.f32.partialorder %v1905_v16, 0.0  ;;  %v1919_v55 = vmul.f32 0.01, %v1905_v16 }
 0xc56   :  { %1911 = vrot.lane.b32.xlu0 %v1906_v38, %s2209_s23  ;;  %v1921_v44 = vsel %vm1917_vm3, %v1905_v16, %v1919_v55  ;;  %vm1918_vm4 = vcmp.ge.f32.partialorder %v1906_v38, 0.0  ;;  %v1920_v45 = vmul.f32 0.01, %v1906_v38 }
 0xc58   :  { %1925 = vrot.lane.b32.xlu1 %v1921_v44, %s2209_s23  ;;  %v1922_v50 = vsel %vm1918_vm4, %v1906_v38, %v1920_v45 }
 0xc5a   :  { %1927 = vrot.lane.b32.xlu0 %v1922_v50, %s2209_s23 }
 0xcc6   :  { %v1910_v8 = vpop.permute.xlu1 %1909 }
 0xcc7   :  { %1915 = vst.msk [vmem:[#allocation2] sm:$0xff] %vm90_vm1, %v1910_v8 }
 0xcc8   :  { %v1912_v11 = vpop.permute.xlu0 %1911 }
 0xcc9   :  { %1916 = vst.msk [vmem:[#allocation2 + $0x8] sm:$0xff] %vm90_vm1, %v1912_v11 }
 0xcca   :  { %v1926_v41 = vpop.permute.xlu1 %1925 }
 0xccb   :  { %2192 = shalt.err (!%p2189_p4)
}
 0xccc   :  { %s2193_s23 = scalar_lea.hbm %s2960_s14, 256 }
 0xccd   :  { %p2194_p5 = scmp.ne.s32.totalorder %s2960_s14, %s2193_s23  ;;  %p2197_p6 = scmp.lt.u32.totalorder %s2193_s23, %s2960_s14 }
 0xccf   :  { %p2199_p7 = pnand %p2197_p6, %p2194_p5 }
 0xcd1   :  { %2202 = shalt.err (!%p2199_p7)
}
 0xcd2   :  { %s2212_s1 = smov 128   ;;  %s2213_s4 = smov 8   ;;  %1931 = vst.msk [vmem:[%s2961_s15] sm:$0xff] %vm90_vm1, %v1926_v41  ;;  %v1928_v39 = vpop.permute.xlu0 %1927 }
 0xcd3   :  { %1944 = dma.vmem_to_hbm [thread:$0]  %s1939_s13, 256, %s2960_s14, [#allocation3], %s2212_s1, %s2212_s1, %s2213_s4  }
 0xcd4   :  { %1932 = vst.msk [vmem:[%s2961_s15 + $0x8] sm:$0xff] %vm90_vm1, %v1928_v39 }
 0xcd5   :  { %2203 = dma.done.wait [#allocation3], 256  }
 0xcd6   :  { %2204 = vsyncadd [#allocation3], 4294967040 }
 0xcd7   :  { %1952 = vsyncpa [#allocation3], 1 }

// kernel: fingerprint_forward.7
= control target key start
LH: loop header
LB: loop body
LE: loop exit
PB: predicated region body
PF: predicated region fallthrough
CT: control target
= control target key end

     0   :  { %s1545_s0 = inlined_call_operand.vmem [shape: f32[2,8,32], index: 0, kind: input, shape index: {}]   ;;  %s1546_s1 = inlined_call_operand.vmem [shape: f32[2,8,1], index: 1, kind: input, shape index: {}]   ;;  %s1547_s2 = inlined_call_operand.vmem [shape: f32[1,32], index: 2, kind: input, shape index: {}]   ;;  %s1548_s3 = inlined_call_operand.vmem [shape: f32[1,32], index: 3, kind: input, shape index: {}]   ;;  %s1549_s4 = inlined_call_operand.<no memory space> [shape: f32[1,1], index: 4, kind: input, shape index: {}]   ;;  %s1550_s5 = inlined_call_operand.vmem [shape: bf16[32,32], index: 5, kind: input, shape index: {}]   ;;  %s1551_s6 = inlined_call_operand.vmem [shape: f32[1,32], index: 6, kind: input, shape index: {}]   ;;  %s1552_s7 = inlined_call_operand.vmem [shape: bf16[32,96], index: 7, kind: input, shape index: {}]   ;;  %s1553_s8 = inlined_call_operand.vmem [shape: bf16[32,96], index: 8, kind: input, shape index: {}]   ;;  %s1554_s9 = inlined_call_operand.vmem [shape: f32[1,96], index: 9, kind: input, shape index: {}]   ;;  %s1555_s10 = inlined_call_operand.vmem [shape: f32[1,96], index: 10, kind: input, shape index: {}]   ;;  %s1556_s11 = inlined_call_operand.vmem [shape: bf16[32,32], index: 11, kind: input, shape index: {}]   ;;  %s1557_s12 = inlined_call_operand.vmem [shape: f32[1,32], index: 12, kind: input, shape index: {}]   ;;  %s1558_s13 = inlined_call_operand.vmem [shape: bf16[32,32], index: 13, kind: input, shape index: {}]   ;;  %s1559_s14 = inlined_call_operand.vmem [shape: f32[1,32], index: 14, kind: input, shape index: {}]   ;;  %s1560_s15 = inlined_call_operand.vmem [shape: bf16[32,4], index: 15, kind: input, shape index: {}]   ;;  %s1561_s16 = inlined_call_operand.vmem [shape: f32[1,4], index: 16, kind: input, shape index: {}]   ;;  %s1562_s17 = inlined_call_operand.vmem [shape: bf16[4,4], index: 17, kind: input, shape index: {}]   ;;  %s1563_s18 = inlined_call_operand.vmem [shape: f32[1,4], index: 18, kind: input, shape index: {}]   ;;  %s1564_s19 = inlined_call_operand.hbm [shape: f32[2,4], index: 19, kind: output, shape index: {}]  }
   0x1   :  { %1567 = sst [smem:[#allocation6_spill]] %s1545_s0  ;;  %v24_v0 = vstv %s1549_s4 }
   0x2   :  { %1568 = sst [smem:[#allocation7_spill]] %s1546_s1  ;;  %25 = vst [vmem:[#allocation2] sm:$0x1] %v24_v0 }
   0x3   :  { %1569 = sst [smem:[#allocation8_spill]] %s1547_s2 }
   0x4   :  { %1570 = sst [smem:[#allocation9_spill]] %s1548_s3 }
   0x5   :  { %s1571_s1 = sld [smem:[#allocation7_spill]]  ;;  %v1191_v2 = vmov 0   ;;  %vm82_vm0 = vcmask 261120   ;;  %s1572_s25 = sld [smem:[#allocation6_spill]] }
   0x6   :  { %1125 = vset.pattern.permute.xlu0 %v1191_v2  ;;  %1126 = vset.pattern.permute.xlu1 %v1191_v2  ;;  %s1573_s26 = sld [smem:[#allocation9_spill]] }
   0xb   :  { %v69_v1 = vld [vmem:[%s1571_s1 + $0x8] sm:$0xff]  ;;  %v68_v3 = vld [vmem:[%s1571_s1] sm:$0xff] }
   0xc   :  { %77 = vperm.xlu0 %1125, %v69_v1   ;;  %v66_v4 = vld [vmem:[%s1572_s25] sm:$0xff]  ;;  %v67_v7 = vld [vmem:[%s1572_s25 + $0x8] sm:$0xff] }
   0xd   :  { %v989_v5 = vld [vmem:[%s1573_s26] ss:$0 sm:$0xff] }
   0xe   :  { %v176_v6 = vmul.f32 %v989_v5, %v66_v4  ;;  %v177_v9 = vmul.f32 %v989_v5, %v67_v7 }
  0x10   :  { %72 = vperm.xlu0 %1125, %v68_v3   ;;  %v178_v8 = vsel %vm82_vm0, %v176_v6, 0.0 }
  0x11   :  { %179 = vadd.xlane.f32.xlu1 %v178_v8 }
  0x12   :  { %26 = vsyncpa [#allocation4], 0  ;;  %v181_v10 = vsel %vm82_vm0, %v177_v9, 0.0  ;;  %v1127_v11 = vld [vmem:[%s1550_s5] sm:$0xff]   ;;  %v1192_v12 = vmov 0.0   ;;  %v1128_v13 = vld [vmem:[%s1550_s5 + $0x8] sm:$0xff]   ;;  %v101_v14 = vpack.c.bf16 %v67_v7, %v66_v4  ;;  %v211_v20 = vlaneseq }
  0x13   :  { %1048 = vmatprep.subr.bf16.mxu0 %v1192_v12  ;;  %1056 = vmatprep.subr.bf16.mxu1 %v1192_v12  ;;  %vm1193_vm1 = vmmov 0   ;;  %v1333_v15 = vld [vmem:[%s1553_s8] sm:$0xff]   ;;  %v1342_v16 = vld [vmem:[%s1553_s8 + $0x8] sm:$0xff]   ;;  %vm97_vm2 = vcmp.eq.f32.partialorder %v68_v3, 0.0  ;;  %vm98_vm3 = vcmp.eq.f32.partialorder %v69_v1, 0.0  ;;  %vm202_vm4 = vcmask 1041409  }
  0x14   :  { %1049 = vmatpush3.bf16.msra.mxu0 %v1127_v11  ;;  %1052 = vmatprep.mubr.msk.bf16.mxu0 %vm1193_vm1, %v1192_v12  ;;  %v991_v17 = vld [vmem:[#allocation2] ss:$0 sm:$0xff]  ;;  %v99_v18 = vsel %vm97_vm2, -9e+08, %v1192_v12  ;;  %v100_v19 = vsel %vm98_vm3, -9e+08, %v1192_v12 }
  0x15   :  { %182 = vadd.xlane.f32.xlu1 %v181_v10  ;;  %1050 = vmatprep.subr.bf16.mxu0 %v1192_v12  ;;  %v212_v21 = vand.u32 127, %v211_v20  ;;  %v1351_v22 = vshrl.u32 %v211_v20, 7  ;;  %s1574_s23 = sld [smem:[#allocation8_spill]]  ;;  %vm205_vm7 = vcmask 254976   ;;  %vm257_vm9 = vcmask 58368   ;;  %s1194_s3 = smov 64  }
  0x16   :  { %1060 = vmatprep.mubr.msk.bf16.mxu1 %vm1193_vm1, %v1192_v12  ;;  %s1196_s0 = smov 32   ;;  %vm925_vm3 = vcmask 1041408  }
  0x17   :  { %v1354_v23 = vsub.s32 %v212_v21, %v1351_v22 }
  0x18   :  { %1051 = vmatpush3.bf16.msra.mxu0 %v1128_v13 }
  0x19   :  { %1064 = vmatprep.subr.bf16.mxu0 %v1192_v12 }
  0x1b   :  { %1053 = vmatmul.mubr.msk.bf16.vlgmr.msra.gmra.mrb[0].mxu0 %vm82_vm0, %v101_v14  ;;  %v1366_v45 = vld [vmem:[%s1574_s23] ss:$0 sm:$0xff] }
  0x1c   :  { %1065 = vmatpush3.bf16.msra.mxu0 %v1333_v15  ;;  %1068 = vmatprep.mubr.msk.bf16.mxu0 %vm1193_vm1, %v1192_v12 }
  0x1d   :  { %1066 = vmatprep.subr.bf16.mxu0 %v1192_v12 }
  0x20   :  { %1067 = vmatpush3.bf16.msra.mxu0 %v1342_v16 }
  0x21   :  { %1080 = vmatprep.subr.bf16.mxu0 %v1192_v12 }
  0x26   :  { %231 = vperm.xlu1 %1126, %v991_v17  }
  0x2a   :  { %241 = vperm.xlu1 %1126, %v99_v18  }
  0x2e   :  { %244 = vperm.xlu1 %1126, %v100_v19  }
  0x8b   :  { %v78_v24 = vpop.permute.xlu0 %77 }
  0x8c   :  { %v81_v25 = vmul.f32 %v78_v24, %v67_v7  ;;  %v276_v26 = vrot.slane %v78_v24, %v1354_v23 }
  0x8e   :  { %v90_v27 = vsel %vm82_vm0, %v81_v25, 0.0 }
  0x8f   :  { %v91_v28 = vrot.slane %v90_v27, 4  ;;  %v73_v29 = vpop.permute.xlu0 %72 }
  0x90   :  { %v80_v30 = vmul.f32 %v73_v29, %v66_v4  ;;  %v272_v31 = vrot.slane %v73_v29, %v1354_v23 }
  0x91   :  { %v92_v32 = vadd.f32 %v91_v28, %v90_v27 }
  0x92   :  { %v83_v33 = vsel %vm82_vm0, %v80_v30, 0.0  ;;  %v1361_v34 = vsel %vm202_vm4, %v276_v26, %v272_v31 }
  0x93   :  { %v93_v35 = vrot.slane %v92_v32, 2  ;;  %v84_v36 = vrot.slane %v83_v33, 4 }
  0x95   :  { %v94_v37 = vadd.f32 %v93_v35, %v92_v32  ;;  %v85_v38 = vadd.f32 %v84_v36, %v83_v33  ;;  %v282_v35 = vsub.s32 0, %v1351_v22 }
  0x97   :  { %v95_v39 = vrot.slane %v94_v37, 1  ;;  %v86_v40 = vrot.slane %v85_v38, 2 }
  0x99   :  { %v96_v41 = vadd.f32 %v95_v39, %v94_v37  ;;  %v87_v42 = vadd.f32 %v86_v40, %v85_v38  ;;  %v289_v38 = vsub.s32 1, %v1351_v22  ;;  %v1410_v40 = vld [vmem:[%s1555_s10] ss:$0 sm:$0xff]  ;;  %s1197_s10 = smov [#allocation3]  }
  0x9a   :  { %s977_s29 = sshll.u32 %s1197_s10, 4  ;;  %s978_s29 = int_to_ptr.vmem [resolvable:$true] %s977_s29 }
  0x9b   :  { %v88_v43 = vrot.slane %v87_v42, 1  ;;  %vm185_vm5 = vcmp.ge.f32.partialorder %v96_v41, 0.0  ;;  %v187_v44 = vmul.f32 0.01, %v96_v41  ;;  %v395_v47 = vpack.c.bf16 %v96_v41, %v96_v41  ;;  %p1172_p1 = scmp.lt.s32.totalorder %s978_s29, %s978_s29 }
  0x9d   :  { %v89_v46 = vadd.f32 %v88_v43, %v87_v42  ;;  %v189_v48 = vsel %vm185_vm5, %v96_v41, %v187_v44  ;;  %v410_v54 = vunpack.c.l.b16 %v395_v47  ;;  %v1131_v42 = vld [vmem:[%s1552_s7] sm:$0xff]   ;;  %v1132_v43 = vld [vmem:[%s1552_s7 + $0x8] sm:$0xff]  }
  0x9e   :  { %v198_v49 = vmul.f32 %v1366_v45, %v189_v48  ;;  %v180_v2 = vpop.xlane.xlu1 %179  ;;  %1057 = vmatpush3.bf16.msra.mxu1 %v1131_v42  ;;  %v985_v44 = vld [vmem:[%s1551_s6] ss:$0 sm:$0xff] }
  0x9f   :  { %v394_v50 = vpack.c.bf16 %v89_v46, %v89_v46  ;;  %vm184_vm6 = vcmp.ge.f32.partialorder %v89_v46, 0.0  ;;  %v186_v51 = vmul.f32 0.01, %v89_v46  ;;  %v1370_v52 = vsel %vm202_vm4, %v96_v41, %v89_v46  ;;  %1058 = vmatprep.subr.bf16.mxu1 %v1192_v12 }
  0xa0   :  { %v201_v57 = vrot.slane %v198_v49, 7  ;;  %v216_v6 = vrot.slane %v180_v2, %v1354_v23 }
  0xa1   :  { %v409_v53 = vunpack.c.l.b16 %v394_v50  ;;  %v188_v55 = vsel %vm184_vm6, %v89_v46, %v186_v51 }
  0xa2   :  { %v197_v56 = vmul.f32 %v1366_v45, %v188_v55  ;;  %v183_v3 = vpop.xlane.xlu1 %182  ;;  %1059 = vmatpush3.bf16.msra.mxu1 %v1132_v43 }
  0xa3   :  { %v411_v58 = vsel %vm202_vm4, %v410_v54, %v409_v53  ;;  %v220_v7 = vrot.slane %v183_v3, %v1354_v23  ;;  %1072 = vmatprep.subr.bf16.mxu1 %v1192_v12 }
  0xa4   :  { %v412_v59 = vpack.c.b16 %v411_v58, %v411_v58  ;;  %v203_v60 = vsel %vm202_vm4, %v201_v57, %v197_v56 }
  0xa5   :  { %v206_v61 = vsel %vm205_vm7, %v203_v60, 0.0  ;;  %v1388_v9 = vsel %vm202_vm4, %v220_v7, %v216_v6 }
  0xa6   :  { %1069 = vmatmul.mubr.msk.bf16.vlgmr.msra.gmra.mrb[4].mxu0 %vm82_vm0, %v412_v59  ;;  %207 = vadd.xlane.f32.xlu0 %v206_v61  ;;  %v1383_v4 = vpop.permute.xlu1 %231 }
  0xa7   :  { %1081 = vmatpush3.bf16.msra.mxu0 %v1333_v15  ;;  %1084 = vmatprep.mubr.msk.bf16.mxu0 %vm1193_vm1, %v1192_v12 }
  0xa8   :  { %1082 = vmatprep.subr.bf16.mxu0 %v1192_v12 }
  0xaa   :  { %v242_v5 = vpop.permute.xlu1 %241 }
  0xab   :  { %1083 = vmatpush3.bf16.msra.mxu0 %v1342_v16  ;;  %v249_v13 = vrot.slane %v242_v5, %v1354_v23 }
  0xac   :  { %1096 = vmatprep.subr.bf16.mxu0 %v1192_v12 }
  0xae   :  { %v245_v8 = vpop.permute.xlu1 %244 }
  0xaf   :  { %v253_v14 = vrot.slane %v245_v8, %v1354_v23 }
  0xb1   :  { %v1395_v18 = vsel %vm202_vm4, %v253_v14, %v249_v13 }
  0xee   :  { %v162_v62 = vpop.f32.mrb[0].mxu0 }
  0xef   :  { %v1054_v63 = vpop.f32.mrb[1].mxu0  ;;  %v1425_v46 = vadd.f32 %v985_v44, %v162_v62 }
  0xf0   :  { %v165_v0 = vpop.f32.mrb[2].mxu0 }
  0xf1   :  { %v1055_v1 = vpop.f32.mrb[3].mxu0  ;;  %v1428_v49 = vadd.f32 %v985_v44, %v165_v0 }
 0x133   :  { %v208_v10 = vpop.xlane.xlu0 %207 }
 0x134   :  { %v223_v11 = vadd.f32 %v1388_v9, %v208_v10 }
 0x136   :  { %v234_v15 = vadd.f32 %v1383_v4, %v223_v11 }
 0x138   :  { %v236_v16 = vmul.f32 0.01, %v234_v15  ;;  %vm235_vm8 = vcmp.ge.f32.partialorder %v234_v15, 0.0 }
 0x13a   :  { %v237_v17 = vsel %vm235_vm8, %v234_v15, %v236_v16 }
 0x13b   :  { %v256_v19 = vadd.f32 %v1395_v18, %v237_v17 }
 0x13d   :  { %v258_v20 = vsel %vm257_vm9, %v256_v19, -inf }
 0x13e   :  { %259 = vmax.xlane.f32.xlu1 %v258_v20 }
 0x179   :  { %v462_v21 = vpop.f32.mrb[4].mxu0 }
 0x17a   :  { %v1070_v24 = vpop.f32.mrb[5].mxu0  ;;  %v463_v41 = vadd.f32 %v1410_v40, %v462_v21  ;;  %v1442_v21 = vld [vmem:[%s1554_s9] ss:$0 sm:$0xff]  ;;  %s1195_s9 = smov 96  }
 0x17b   :  { %v465_v25 = vpop.f32.mrb[6].mxu0 }
 0x17c   :  { %v1071_v26 = vpop.f32.mrb[7].mxu0 }
 0x1cb   :  { %v260_v27 = vpop.xlane.xlu1 %259 }
 0x1cc   :  { %v261_v23 = vsub.f32 %v256_v19, %v260_v27 }
 0x1ce   :  { %v262_v28 = vmul.f32 1.442695, %v261_v23 }
 0x1d0   :  { %1139 = vpow2.f32 %v262_v28 }
 0x1da   :  { %v1140_v29 = vpop.eup %1139 }
 0x1db   :  { %v264_v30 = vsel %vm257_vm9, %v1140_v29, 0.0 }
 0x1dc   :  { %265 = vadd.xlane.f32.xlu0 %v264_v30 }
 0x269   :  { %v266_v31 = vpop.xlane.xlu0 %265 }
 0x26a   :  { %1141 = vrcp.f32 %v266_v31 }
 0x274   :  { %v1142_v32 = vpop.eup %1141 }
 0x275   :  { %v268_v33 = vmul.f32 %v1142_v32, %v1140_v29 }
 0x277   :  { %v279_v36 = vmul.f32 %v1361_v34, %v268_v33 }
 0x279   :  { %v283_v37 = vrot.slane %v279_v36, %v282_v35  ;;  %v290_v39 = vrot.slane %v279_v36, %v289_v38 }
 0x27b   :  { %285 = vbcast.lane.b32.xlu0 %v283_v37, 256 }
 0x27f   :  { %292 = vbcast.lane.b32.xlu0 %v290_v39, 256 }
 0x283   :  { %476 = vrot.lane.b32.xlu0 %v463_v41, %s1194_s3 }
 0x2ed   :  { %v286_v47 = vpop.permute.xlu0 %285 }
 0x2ee   :  { %v294_v48 = vmul.f32 %v286_v47, %v1425_v46 }
 0x2f0   :  { %v296_v50 = vsel %vm82_vm0, %v294_v48, 0.0 }
 0x2f1   :  { %v297_v51 = vrot.slane %v296_v50, 4  ;;  %v293_v53 = vpop.permute.xlu0 %292 }
 0x2f2   :  { %v295_v54 = vmul.f32 %v293_v53, %v1428_v49 }
 0x2f3   :  { %v298_v55 = vadd.f32 %v297_v51, %v296_v50 }
 0x2f4   :  { %v303_v56 = vsel %vm82_vm0, %v295_v54, 0.0 }
 0x2f5   :  { %v299_v57 = vrot.slane %v298_v55, 2  ;;  %v304_v58 = vrot.slane %v303_v56, 4  ;;  %v477_v33 = vpop.permute.xlu0 %476 }
 0x2f7   :  { %v300_v59 = vadd.f32 %v299_v57, %v298_v55  ;;  %v305_v60 = vadd.f32 %v304_v58, %v303_v56 }
 0x2f9   :  { %v301_v61 = vrot.slane %v300_v59, 1  ;;  %v306_v62 = vrot.slane %v305_v60, 2 }
 0x2fb   :  { %v302_v63 = vadd.f32 %v301_v61, %v300_v59  ;;  %v307_v1 = vadd.f32 %v306_v62, %v305_v60 }
 0x2fd   :  { %v312_v2 = vmul.f32 1.442695, %v302_v63  ;;  %v308_v0 = vrot.slane %v307_v1, 1  ;;  %vm310_vm10 = vcmp.gt.f32.partialorder %v302_v63, 0.0 }
 0x2ff   :  { %1143 = vpow2.f32 %v312_v2  ;;  %v309_v3 = vadd.f32 %v308_v0, %v307_v1 }
 0x301   :  { %v314_v5 = vmul.f32 1.442695, %v309_v3  ;;  %vm311_vm11 = vcmp.gt.f32.partialorder %v309_v3, 0.0 }
 0x303   :  { %1145 = vpow2.f32 %v314_v5 }
 0x309   :  { %v1144_v6 = vpop.eup %1143 }
 0x30a   :  { %v992_v7 = vadd.f32 -1.0, %v1144_v6 }
 0x30c   :  { %v318_v8 = vsel %vm310_vm10, %v302_v63, %v992_v7 }
 0x30d   :  { %v1146_v10 = vpop.eup %1145  ;;  %v320_v13 = vpack.c.bf16 %v318_v8, %v318_v8 }
 0x30e   :  { %v993_v11 = vadd.f32 -1.0, %v1146_v10 }
 0x30f   :  { %v335_v16 = vunpack.c.l.b16 %v320_v13 }
 0x310   :  { %v319_v14 = vsel %vm311_vm11, %v309_v3, %v993_v11 }
 0x311   :  { %v321_v15 = vpack.c.bf16 %v319_v14, %v319_v14 }
 0x313   :  { %v336_v17 = vunpack.c.l.b16 %v321_v15 }
 0x315   :  { %v337_v19 = vsel %vm202_vm4, %v336_v17, %v335_v16 }
 0x316   :  { %v338_v20 = vpack.c.b16 %v337_v19, %v337_v19 }
 0x318   :  { %1061 = vmatmul.mubr.msk.bf16.vlgmr.msra.gmra.mrb[0].mxu1 %vm82_vm0, %v338_v20 }
 0x319   :  { %1073 = vmatpush3.bf16.msra.mxu1 %v1131_v42  ;;  %1076 = vmatprep.mubr.msk.bf16.mxu1 %vm1193_vm1, %v1192_v12 }
 0x31a   :  { %1074 = vmatprep.subr.bf16.mxu1 %v1192_v12 }
 0x31d   :  { %1075 = vmatpush3.bf16.msra.mxu1 %v1132_v43 }
 0x31e   :  { %1088 = vmatprep.subr.bf16.mxu1 %v1192_v12 }
 0x3eb   :  { %v388_v24 = vpop.f32.mrb[0].mxu1 }
 0x3ec   :  { %v389_v25 = vadd.f32 %v1442_v21, %v388_v24  ;;  %v1062_v26 = vpop.f32.mrb[1].mxu1 }
 0x3ed   :  { %v391_v27 = vpop.f32.mrb[2].mxu1 }
 0x3ee   :  { %v468_v23 = vadd.f32 %v463_v41, %v389_v25  ;;  %v1063_v28 = vpop.f32.mrb[3].mxu1 }
 0x3f0   :  { %v1002_v29 = vmul.f32 -1.442695, %v468_v23 }
 0x3f2   :  { %1147 = vpow2.f32 %v1002_v29 }
 0x3fc   :  { %v1148_v30 = vpop.eup %1147 }
 0x3fd   :  { %v472_v31 = vadd.f32 1.0, %v1148_v30 }
 0x3ff   :  { %1149 = vrcp.f32 %v472_v31 }
 0x409   :  { %v1150_v32 = vpop.eup %1149 }
 0x40a   :  { %v479_v36 = vmul.f32 %v1150_v32, %v477_v33  ;;  %v486_v43 = vsub.f32 1.0, %v1150_v32 }
 0x40c   :  { %481 = vrot.lane.b32.xlu1 %v479_v36, %s1194_s3 }
 0x47e   :  { %v482_v37 = vpop.permute.xlu1 %481 }
 0x47f   :  { %v484_v39 = vadd.f32 %v482_v37, %v389_v25 }
 0x481   :  { %1151 = vtanh.f32 %v484_v39 }
 0x48b   :  { %v1152_v42 = vpop.eup %1151 }
 0x48c   :  { %488 = vrot.lane.b32.xlu0 %v1152_v42, %s1195_s9 }
 0x490   :  { %495 = vrot.lane.b32.xlu0 %v1370_v52, %s1196_s0 }
 0x494   :  { %503 = vrot.lane.b32.xlu0 %v1366_v45, %s1196_s0 }
 0x4fe   :  { %v489_v41 = vpop.permute.xlu0 %488 }
 0x4ff   :  { %v491_v47 = vmul.f32 %v489_v41, %v486_v43 }
 0x502   :  { %v496_v44 = vpop.permute.xlu0 %495 }
 0x503   :  { %v498_v48 = vmul.f32 %v1150_v32, %v496_v44 }
 0x505   :  { %v1449_v50 = vadd.f32 %v498_v48, %v491_v47 }
 0x506   :  { %v504_v53 = vpop.permute.xlu0 %503 }
 0x507   :  { %vm500_vm12 = vcmp.ge.f32.partialorder %v1449_v50, 0.0  ;;  %v501_v51 = vmul.f32 0.01, %v1449_v50  ;;  %v623_v8 = vpack.c.bf16 %v1449_v50, %v1449_v50 }
 0x509   :  { %v502_v54 = vsel %vm500_vm12, %v1449_v50, %v501_v51 }
 0x50a   :  { %v506_v55 = vmul.f32 %v504_v53, %v502_v54 }
 0x50c   :  { %508 = vrot.lane.b32.xlu0 %v506_v55, %s1195_s9 }
 0x57e   :  { %v509_v52 = vpop.permute.xlu0 %508 }
 0x57f   :  { %v511_v45 = vsel %vm205_vm7, %v509_v52, 0.0 }
 0x580   :  { %512 = vadd.xlane.f32.xlu1 %v511_v45 }
 0x60d   :  { %v513_v56 = vpop.xlane.xlu1 %512 }
 0x60e   :  { %v514_v57 = vadd.f32 %v513_v56, %v1388_v9 }
 0x610   :  { %v515_v58 = vadd.f32 %v514_v57, %v1383_v4 }
 0x612   :  { %v517_v59 = vmul.f32 0.01, %v515_v58  ;;  %vm516_vm13 = vcmp.ge.f32.partialorder %v515_v58, 0.0 }
 0x614   :  { %v518_v60 = vsel %vm516_vm13, %v515_v58, %v517_v59 }
 0x615   :  { %v519_v61 = vadd.f32 %v518_v60, %v1395_v18 }
 0x617   :  { %v520_v62 = vsel %vm257_vm9, %v519_v61, -inf }
 0x618   :  { %521 = vmax.xlane.f32.xlu0 %v520_v62 }
 0x6a5   :  { %v522_v63 = vpop.xlane.xlu0 %521 }
 0x6a6   :  { %v523_v1 = vsub.f32 %v519_v61, %v522_v63 }
 0x6a8   :  { %v524_v2 = vmul.f32 1.442695, %v523_v1 }
 0x6aa   :  { %1153 = vpow2.f32 %v524_v2 }
 0x6b4   :  { %v1154_v0 = vpop.eup %1153 }
 0x6b5   :  { %v526_v3 = vsel %vm257_vm9, %v1154_v0, 0.0 }
 0x6b6   :  { %527 = vadd.xlane.f32.xlu0 %v526_v3 }
 0x743   :  { %v528_v5 = vpop.xlane.xlu0 %527 }
 0x744   :  { %1155 = vrcp.f32 %v528_v5 }
 0x74e   :  { %v1156_v9 = vpop.eup %1155 }
 0x74f   :  { %v530_v4 = vmul.f32 %v1156_v9, %v1154_v0  ;;  %v1133_v0 = vld [vmem:[%s1556_s11] sm:$0xff]  }
 0x751   :  { %v531_v6 = vmul.f32 %v530_v4, %v1361_v34 }
 0x753   :  { %v542_v18 = vrot.slane %v531_v6, %v289_v38  ;;  %v535_v7 = vrot.slane %v531_v6, %v282_v35 }
 0x755   :  { %544 = vbcast.lane.b32.xlu0 %v542_v18, 256  ;;  %537 = vbcast.lane.b32.xlu1 %v535_v7, 256 }
 0x759   :  { %625 = vrot.lane.b32.xlu1 %v623_v8, %s1195_s9 }
 0x7c7   :  { %v545_v10 = vpop.permute.xlu0 %544  ;;  %v538_v11 = vpop.permute.xlu1 %537 }
 0x7c8   :  { %v547_v13 = vmul.f32 %v545_v10, %v1428_v49  ;;  %v546_v14 = vmul.f32 %v538_v11, %v1425_v46  ;;  %v1135_v10 = vld [vmem:[%s1558_s13] sm:$0xff]  }
 0x7c9   :  { %v1008_v11 = vld [vmem:[%s1557_s12] ss:$0 sm:$0xff] }
 0x7ca   :  { %v555_v34 = vsel %vm82_vm0, %v547_v13, 0.0  ;;  %v548_v38 = vsel %vm82_vm0, %v546_v14, 0.0 }
 0x7cb   :  { %v556_v15 = vrot.slane %v555_v34, 4  ;;  %v549_v22 = vrot.slane %v548_v38, 4  ;;  %v626_v35 = vpop.permute.xlu1 %625 }
 0x7cc   :  { %1085 = vmatmul.mubr.msk.bf16.vlgmr.msra.gmra.mrb[8].mxu0 %vm82_vm0, %v626_v35 }
 0x7cd   :  { %v557_v16 = vadd.f32 %v556_v15, %v555_v34  ;;  %v550_v17 = vadd.f32 %v549_v22, %v548_v38  ;;  %1100 = vmatprep.mubr.msk.bf16.mxu0 %vm1193_vm1, %v1192_v12  ;;  %1097 = vmatpush3.bf16.msra.mxu0 %v1135_v10 }
 0x7ce   :  { %1098 = vmatprep.subr.bf16.mxu0 %v1192_v12 }
 0x7cf   :  { %v558_v19 = vrot.slane %v557_v16, 2  ;;  %v551_v20 = vrot.slane %v550_v17, 2 }
 0x7d1   :  { %v559_v24 = vadd.f32 %v558_v19, %v557_v16  ;;  %v552_v49 = vadd.f32 %v551_v20, %v550_v17  ;;  %v1137_v20 = vld [vmem:[%s1560_s15] sm:$0xff]  }
 0x7d3   :  { %v560_v25 = vrot.slane %v559_v24, 1  ;;  %v553_v46 = vrot.slane %v552_v49, 1 }
 0x7d5   :  { %v561_v26 = vadd.f32 %v560_v25, %v559_v24  ;;  %v554_v27 = vadd.f32 %v553_v46, %v552_v49  ;;  %v1138_v24 = vld [vmem:[%s1560_s15 + $0x8] sm:$0xff]   ;;  %v913_v49 = vld [vmem:[%s1562_s17] sm:$0x3] }
 0x7d6   :  { %v927_v25 = vsel %vm925_vm3, %v913_v49, 0  ;;  %v1012_v46 = vld [vmem:[%s1559_s14] ss:$0 sm:$0xff] }
 0x7d7   :  { %v566_v23 = vmul.f32 1.442695, %v561_v26  ;;  %v564_v28 = vmul.f32 1.442695, %v554_v27  ;;  %vm563_vm14 = vcmp.gt.f32.partialorder %v561_v26, 0.0  ;;  %vm562_vm15 = vcmp.gt.f32.partialorder %v554_v27, 0.0 }
 0x7d9   :  { %1157 = vpow2.f32 %v566_v23 }
 0x7da   :  { %1159 = vpow2.f32 %v564_v28 }
 0x7e3   :  { %v1158_v29 = vpop.eup %1157 }
 0x7e4   :  { %v1160_v30 = vpop.eup %1159  ;;  %v1004_v31 = vadd.f32 -1.0, %v1158_v29 }
 0x7e5   :  { %v1003_v32 = vadd.f32 -1.0, %v1160_v30 }
 0x7e6   :  { %v571_v33 = vsel %vm563_vm14, %v561_v26, %v1004_v31 }
 0x7e7   :  { %v573_v36 = vpack.c.bf16 %v571_v33, %v571_v33  ;;  %v570_v37 = vsel %vm562_vm15, %v554_v27, %v1003_v32  ;;  %v1016_v33 = vld [vmem:[%s1561_s16] ss:$0 sm:$0xff]  ;;  %s1167_s16 = scalar_lea.vmem %s978_s29, 32 }
 0x7e8   :  { %v572_v39 = vpack.c.bf16 %v570_v37, %v570_v37  ;;  %p1168_p0 = scmp.ne.s32.totalorder %s978_s29, %s1167_s16  ;;  %p1173_p2 = scmp.lt.s32.totalorder %s1167_s16, %s1167_s16 }
 0x7e9   :  { %v577_v42 = vunpack.c.l.b16 %v573_v36 }
 0x7ea   :  { %v576_v41 = vunpack.c.l.b16 %v572_v39  ;;  %p1174_p3 = por %p1173_p2, %p1172_p1 }
 0x7ec   :  { %v578_v43 = vsel %vm202_vm4, %v577_v42, %v576_v41  ;;  %vm921_vm4 = vcmask 31744   ;;  %p1175_p4 = pnand %p1174_p3, %p1168_p0 }
 0x7ed   :  { %v579_v44 = vpack.c.b16 %v578_v43, %v578_v43 }
 0x7ef   :  { %1077 = vmatmul.mubr.msk.bf16.vlgmr.msra.gmra.mrb[4].mxu1 %vm82_vm0, %v579_v44  ;;  %v1020_v44 = vld [vmem:[%s1563_s18] ss:$0 sm:$0xff] }
 0x7f0   :  { %1092 = vmatprep.mubr.msk.bf16.mxu1 %vm1193_vm1, %v1192_v12  ;;  %1089 = vmatpush3.bf16.msra.mxu1 %v1133_v0 }
 0x7f1   :  { %1090 = vmatprep.subr.bf16.mxu1 %v1192_v12 }
 0x89f   :  { %v664_v47 = vpop.f32.mrb[8].mxu0 }
 0x8a0   :  { %v665_v48 = vadd.f32 %v1410_v40, %v664_v47  ;;  %v1086_v51 = vpop.f32.mrb[9].mxu0 }
 0x8a1   :  { %v667_v53 = vpop.f32.mrb[10].mxu0 }
 0x8a2   :  { %678 = vrot.lane.b32.xlu1 %v665_v48, %s1194_s3  ;;  %v1087_v54 = vpop.f32.mrb[11].mxu0 }
 0x8c2   :  { %v617_v55 = vpop.f32.mrb[4].mxu1 }
 0x8c3   :  { %v1078_v52 = vpop.f32.mrb[5].mxu1  ;;  %v618_v57 = vadd.f32 %v1442_v21, %v617_v55  ;;  %v1134_v21 = vld [vmem:[%s1556_s11 + $0x8] sm:$0xff]  }
 0x8c4   :  { %v620_v45 = vpop.f32.mrb[6].mxu1  ;;  %1091 = vmatpush3.bf16.msra.mxu1 %v1134_v21 }
 0x8c5   :  { %v1079_v56 = vpop.f32.mrb[7].mxu1  ;;  %v670_v58 = vadd.f32 %v665_v48, %v618_v57  ;;  %1104 = vmatprep.subr.bf16.mxu1 %v1192_v12 }
 0x8c7   :  { %v1007_v59 = vmul.f32 -1.442695, %v670_v58 }
 0x8c9   :  { %1161 = vpow2.f32 %v1007_v59 }
 0x8d3   :  { %v1162_v60 = vpop.eup %1161 }
 0x8d4   :  { %v674_v61 = vadd.f32 1.0, %v1162_v60 }
 0x8d6   :  { %1163 = vrcp.f32 %v674_v61 }
 0x8e0   :  { %v1164_v62 = vpop.eup %1163 }
 0x8e1   :  { %v688_v5 = vsub.f32 1.0, %v1164_v62  ;;  %v694_v4 = vmul.f32 %v1164_v62, %v1449_v50  ;;  %v1136_v50 = vld [vmem:[%s1558_s13 + $0x8] sm:$0xff]  }
 0x8e2   :  { %1099 = vmatpush3.bf16.msra.mxu0 %v1136_v50 }
 0x8e3   :  { %1112 = vmatprep.subr.bf16.mxu0 %v1192_v12 }
 0x914   :  { %v679_v63 = vpop.permute.xlu1 %678 }
 0x915   :  { %v681_v40 = vmul.f32 %v1164_v62, %v679_v63 }
 0x917   :  { %683 = vrot.lane.b32.xlu0 %v681_v40, %s1194_s3 }
 0x989   :  { %v684_v1 = vpop.permute.xlu0 %683 }
 0x98a   :  { %v686_v2 = vadd.f32 %v684_v1, %v618_v57 }
 0x98c   :  { %1165 = vtanh.f32 %v686_v2 }
 0x996   :  { %v1166_v3 = vpop.eup %1165 }
 0x997   :  { %690 = vrot.lane.b32.xlu1 %v1166_v3, %s1195_s9 }
 0xa09   :  { %v691_v9 = vpop.permute.xlu1 %690 }
 0xa0a   :  { %v693_v6 = vmul.f32 %v691_v9, %v688_v5 }
 0xa0c   :  { %v695_v18 = vadd.f32 %v694_v4, %v693_v6 }
 0xa0e   :  { %770 = vrot.lane.b32.xlu1 %v695_v18, %s1195_s9  ;;  %v696_v7 = vpack.c.bf16 %v695_v18, %v695_v18 }
 0xa10   :  { %709 = vrot.lane.b32.xlu0 %v696_v7, %s1195_s9 }
 0xa80   :  { %v771_v35 = vpop.permute.xlu1 %770 }
 0xa82   :  { %v710_v8 = vpop.permute.xlu0 %709 }
 0xa83   :  { %1093 = vmatmul.mubr.msk.bf16.vlgmr.msra.gmra.mrb[8].mxu1 %vm82_vm0, %v710_v8 }
 0xa84   :  { %1108 = vmatprep.mubr.msk.bf16.mxu1 %vm1193_vm1, %v1192_v12  ;;  %1105 = vmatpush3.bf16.msra.mxu1 %v1137_v20 }
 0xa85   :  { %1106 = vmatprep.subr.bf16.mxu1 %v1192_v12 }
 0xa88   :  { %1107 = vmatpush3.bf16.msra.mxu1 %v1138_v24 }
 0xb56   :  { %v760_v13 = vpop.f32.mrb[8].mxu1 }
 0xb57   :  { %v761_v14 = vadd.f32 %v1008_v11, %v760_v13  ;;  %v1094_v34 = vpop.f32.mrb[9].mxu1 }
 0xb58   :  { %v763_v38 = vpop.f32.mrb[10].mxu1 }
 0xb59   :  { %vm766_vm2 = vcmp.ge.f32.partialorder %v761_v14, 0.0  ;;  %v767_v15 = vmul.f32 0.01, %v761_v14  ;;  %v1095_v22 = vpop.f32.mrb[11].mxu1 }
 0xb5b   :  { %v768_v16 = vsel %vm766_vm2, %v761_v14, %v767_v15 }
 0xb5c   :  { %v773_v17 = vadd.f32 %v771_v35, %v768_v16 }
 0xb5e   :  { %v774_v19 = vpack.c.bf16 %v773_v17, %v773_v17 }
 0xb60   :  { %1101 = vmatmul.mubr.msk.bf16.vlgmr.msra.gmra.mrb[12].mxu0 %vm82_vm0, %v774_v19 }
 0xb61   :  { %1114 = vmatprep.mubr.msk.bf16.mxu0 %vm1193_vm1, %v1192_v12  ;;  %1113 = vmatpush3.bf16.msra.mxu0 %v927_v25 }
 0xc33   :  { %v835_v26 = vpop.f32.mrb[12].mxu0 }
 0xc34   :  { %v836_v27 = vadd.f32 %v1012_v46, %v835_v26  ;;  %v1102_v23 = vpop.f32.mrb[13].mxu0 }
 0xc35   :  { %v838_v12 = vpop.f32.mrb[14].mxu0 }
 0xc36   :  { %vm841_vm1 = vcmp.ge.f32.partialorder %v836_v27, 0.0  ;;  %v842_v28 = vmul.f32 0.01, %v836_v27  ;;  %v1103_v29 = vpop.f32.mrb[15].mxu0 }
 0xc38   :  { %v843_v30 = vsel %vm841_vm1, %v836_v27, %v842_v28 }
 0xc39   :  { %v844_v31 = vadd.f32 %v843_v30, %v773_v17 }
 0xc3b   :  { %v845_v32 = vpack.c.bf16 %v844_v31, %v844_v31 }
 0xc3d   :  { %1109 = vmatmul.mubr.msk.bf16.vlgmr.msra.gmra.mrb[12].mxu1 %vm82_vm0, %v845_v32  ;;  %vm969_vm0 = vcmask 25600  }
 0xd10   :  { %v906_v36 = vpop.f32.mrb[12].mxu1 }
 0xd11   :  { %v907_v37 = vadd.f32 %v1016_v33, %v906_v36  ;;  %v1110_v39 = vpop.f32.mrb[13].mxu1 }
 0xd12   :  { %v909_v42 = vpop.f32.mrb[14].mxu1 }
 0xd13   :  { %v912_v41 = vpack.c.bf16 %v907_v37, %v907_v37  ;;  %v1111_v43 = vpop.f32.mrb[15].mxu1 }
 0xd15   :  { %1115 = vmatmul.mubr.msk.bf16.vlgmr.msra.gmra.mrb[16].mxu0 %vm921_vm4, %v912_v41 }
 0xde8   :  { %v963_v47 = vpop.f32.mrb[16].mxu0 }
 0xde9   :  { %v964_v48 = vadd.f32 %v1020_v44, %v963_v47  ;;  %v1116_v51 = vpop.f32.mrb[17].mxu0 }
 0xdea   :  { %v966_v53 = vpop.f32.mrb[18].mxu0 }
 0xdeb   :  { %v1117_v54 = vpop.f32.mrb[19].mxu0  ;;  %970 = vst.msk [vmem:[#allocation3] sm:$0x3] %vm969_vm0, %v964_v48 }
 0xdec   :  { %1178 = shalt.err (!%p1175_p4)
}
 0xded   :  { %s1179_s18 = scalar_lea.hbm %s1564_s19, 32 }
 0xdee   :  { %p1180_p5 = scmp.ne.s32.totalorder %s1564_s19, %s1179_s18  ;;  %p1183_p6 = scmp.lt.u32.totalorder %s1179_s18, %s1564_s19 }
 0xdf0   :  { %p1185_p7 = pnand %p1183_p6, %p1180_p5 }
 0xdf2   :  { %1188 = shalt.err (!%p1185_p7)
}
 0xdf3   :  { %980 = dma.vmem_to_hbm [thread:$0]  %s978_s29, 32, %s1564_s19, [#allocation4]  }
 0xdf4   :  { %1189 = dma.done.wait [#allocation4], 32  }
 0xdf5   :  { %1190 = vsyncadd [#allocation4], 4294967264 }
 0xdf6   :  { %984 = vsyncpa [#allocation4], 1 }

</bundles_post_ra>
